<compile_context>
chip_gen: v5e
topology: v5e:2x2
jax: 0.10.0
libtpu: 0.0.40
codegen_flags: <defaults>
</compile_context>

<pallas_src>
import math
import functools

import jax
import jax.numpy as jnp
from jax.experimental import pallas as pl
from jax.experimental.pallas import tpu as pltpu


def decoder_stack_kernel(x_ref, enc_ref, la_bias_ref, in_bias_ref,
                         watt_ref, lnp_ref, w1_ref, b1_ref, w2_ref, b2_ref,
                         out_ref, *, heads, pre_ln):
    layer = pl.program_id(1)

    # Seed the residual-stream carry at layer 0; out_ref's block index does not depend
    # on the layer axis, so it stays resident in VMEM across layers.
    @pl.when(layer == 0)
    def _():
        out_ref[...] = x_ref[...]

    Bb, S, D = x_ref.shape
    Se = enc_ref.shape[1]
    dk = D // heads
    scale = 1.0 / math.sqrt(dk)
    bf16 = jnp.bfloat16
    M = Bb * S

    x = out_ref[...].reshape(M, D).astype(jnp.float32)       # residual stream (f32)
    enc16 = enc_ref[...].reshape(Bb * Se, D)                  # bf16 matmul operand
    la_bias = la_bias_ref[...].astype(jnp.float32)            # (Bb, S, S)
    in_bias = in_bias_ref[...].astype(jnp.float32)            # (Bb, S, Se)
    watt = watt_ref[0]                                        # (D, 8D) bf16
    lnp = lnp_ref[0]                                          # (6, D)  f32

    def layer_norm(v, i):
        mu = jnp.mean(v, axis=-1, keepdims=True)
        var = jnp.mean((v - mu) ** 2, axis=-1, keepdims=True)
        return (v - mu) * jax.lax.rsqrt(var + 1e-5) * lnp[i] + lnp[i + 1]

    def attention(q, k, v, bias, wo, s_kv):
        # q: (M, D) f32 already scaled; k, v: (Bb*s_kv, D) f32; wo: (D, D) bf16;
        # bias: (Bb, S, s_kv) f32 shared by all heads.
        out = jnp.zeros((M, D), jnp.float32)
        for h in range(heads):                   # small static unroll; 2-D/3-D ops only
            sl = slice(h * dk, (h + 1) * dk)
            qh = q[:, sl].astype(bf16).reshape(Bb, S, dk)
            kh = k[:, sl].astype(bf16).reshape(Bb, s_kv, dk)
            vh = v[:, sl].astype(bf16).reshape(Bb, s_kv, dk)
            e = jnp.einsum("bqd,bkd->bqk", qh, kh,
                           preferred_element_type=jnp.float32) + bias
            m = jnp.max(e, axis=-1, keepdims=True)
            p = jnp.exp(e - m)
            w = p * pl.reciprocal(jnp.sum(p, axis=-1, keepdims=True), approx=True)
            ah = jnp.einsum("bqk,bkd->bqd", w.astype(bf16), vh,
                            preferred_element_type=jnp.float32)   # (Bb, S, dk)
            # Project this head's context through its rows of W_O and accumulate
            # (equivalent to concat(heads) @ W_O, without the lane-axis concat).
            out = out + jnp.dot(ah.reshape(M, dk).astype(bf16), wo[sl, :],
                                preferred_element_type=jnp.float32)
        return out

    def ffn(v):
        h1 = jnp.dot(v.astype(bf16), w1_ref[0],
                     preferred_element_type=jnp.float32) + b1_ref[0, 0]
        h2 = jnp.dot(h1.astype(bf16), w2_ref[0],
                     preferred_element_type=jnp.float32) + b2_ref[0, 0]
        # NOTE: the reference module applies ReLU AFTER the second Linear.
        return jnp.maximum(h2, 0.0)

    # --- masked self-attention + residual (+ LN1) -------------------------------
    res = x
    xa = layer_norm(x, 0) if pre_ln else x
    qkv = jnp.dot(xa.astype(bf16), watt[:, 0:3 * D],           # fused Q|K|V projection
                  preferred_element_type=jnp.float32)
    x = attention(qkv[:, 0:D] * scale, qkv[:, D:2 * D], qkv[:, 2 * D:3 * D],
                  la_bias, watt[:, 3 * D:4 * D], S) + res
    if not pre_ln:
        x = layer_norm(x, 0)

    # --- cross-attention over the encoder output + residual (+ LN2) -------------
    res = x
    xb = layer_norm(x, 2) if pre_ln else x
    q = jnp.dot(xb.astype(bf16), watt[:, 4 * D:5 * D],
                preferred_element_type=jnp.float32) * scale
    kv = jnp.dot(enc16, watt[:, 5 * D:7 * D],                  # fused K|V projection
                 preferred_element_type=jnp.float32)
    x = attention(q, kv[:, 0:D], kv[:, D:2 * D],
                  in_bias, watt[:, 7 * D:8 * D], Se) + res
    if not pre_ln:
        x = layer_norm(x, 2)

    # --- feed-forward + residual (+ LN3) --- (dropouts are identity in eval mode)
    res = x
    xc = layer_norm(x, 4) if pre_ln else x
    x = ffn(xc) + res
    if not pre_ln:
        x = layer_norm(x, 4)

    out_ref[...] = x.reshape(Bb, S, D).astype(out_ref.dtype)


def mask_to_bias(mask):
    """torch `masked_fill_(mask, -inf)` as an additive bias (large finite value so a
    fully-masked row degrades gracefully instead of poisoning the row with NaN)."""
    return jnp.where(mask != 0, -1e30, 0.0).astype(jnp.bfloat16)


def decoder_forward(x, encoded, la_mask, in_mask, params, *, heads, pre_ln):
    B, S, D = x.shape
    Se = encoded.shape[1]
    n_layers = params["attw"].shape[0]
    F = params["w1"].shape[-1]
    assert D % heads == 0

    # Whole batch per grid step -> M = B*S rows feed the MXU; the second grid axis
    # walks the layer stack sequentially ("arbitrary"), re-using the resident output
    # block as the carried residual stream.
    Bb = B
    grid = (B // Bb, n_layers)

    la_bias = mask_to_bias(la_mask)             # (B, S, S)  bf16 additive bias
    in_bias = mask_to_bias(in_mask)             # (B, S, Se) bf16 additive bias
    enc_bf16 = encoded.astype(jnp.bfloat16)     # only ever a matmul operand

    # Pack the 8 (D, D) attention matrices of each layer column-wise into one
    # (D, 8D) slab: [Wq_s | Wk_s | Wv_s | Wo_s | Wq_c | Wk_c | Wv_c | Wo_c].
    attw = params["attw"]                                        # (N, 8, D, D) bf16
    watt = jnp.transpose(attw, (0, 2, 1, 3)).reshape(n_layers, D, 8 * D)

    act3 = lambda b, n: (b, 0, 0)
    par3 = lambda b, n: (n, 0, 0)

    kernel = functools.partial(decoder_stack_kernel, heads=heads, pre_ln=pre_ln)
    return pl.pallas_call(
        kernel,
        out_shape=jax.ShapeDtypeStruct((B, S, D), jnp.float32),
        grid=grid,
        in_specs=[
            pl.BlockSpec((Bb, S, D), act3),        # x            (f32)
            pl.BlockSpec((Bb, Se, D), act3),       # encoded      (bf16)
            pl.BlockSpec((Bb, S, S), act3),        # self-attn mask bias  (bf16)
            pl.BlockSpec((Bb, S, Se), act3),       # cross-attn mask bias (bf16)
            pl.BlockSpec((1, D, 8 * D), par3),     # packed attention weights (bf16)
            pl.BlockSpec((1, 6, D), par3),         # ln1/ln2/ln3 gamma,beta (f32)
            pl.BlockSpec((1, D, F), par3),         # FFN W1 (bf16)
            pl.BlockSpec((1, 1, F), par3),         # FFN b1 (f32)
            pl.BlockSpec((1, F, D), par3),         # FFN W2 (bf16)
            pl.BlockSpec((1, 1, D), par3),         # FFN b2 (f32)
        ],
        out_specs=pl.BlockSpec((Bb, S, D), act3),
        compiler_params=pltpu.CompilerParams(
            dimension_semantics=("parallel", "arbitrary"),
            vmem_limit_bytes=32 * 1024 * 1024,
        ),
    )(x.astype(jnp.float32), enc_bf16, la_bias, in_bias,
      watt, params["lnp"], params["w1"], params["b1"],
      params["w2"], params["b2"])


def reference_decoder(x, encoded, la_mask, in_mask, params, *, heads, pre_ln):
    """Pure-JAX mirror of the PyTorch Decoder (eval mode), using the same
    bf16-operand / f32-accumulation matmul policy as the kernel."""
    B, S, D = x.shape
    dk = D // heads
    scale = 1.0 / math.sqrt(dk)
    n_layers = params["attw"].shape[0]

    la_bias = mask_to_bias(la_mask).astype(jnp.float32)
    in_bias = mask_to_bias(in_mask).astype(jnp.float32)
    enc = encoded.astype(jnp.bfloat16)

    def ln(v, g, b):
        mu = v.mean(-1, keepdims=True)
        var = ((v - mu) ** 2).mean(-1, keepdims=True)
        return (v - mu) * jax.lax.rsqrt(var + 1e-5) * g + b

    def mm(a, w):
        return jnp.dot(a.astype(jnp.bfloat16), w.astype(jnp.bfloat16),
                       preferred_element_type=jnp.float32)

    def mha(xq, kv, bias, wq, wk, wv, wo):
        Sq, Skv = xq.shape[1], kv.shape[1]
        q = mm(xq.reshape(B * Sq, D), wq).reshape(B, Sq, heads, dk) * scale
        k = mm(kv.reshape(B * Skv, D), wk).reshape(B, Skv, heads, dk)
        v = mm(kv.reshape(B * Skv, D), wv).reshape(B, Skv, heads, dk)
        e = jnp.einsum("bqhd,bkhd->bhqk", q.astype(jnp.bfloat16),
                       k.astype(jnp.bfloat16), preferred_element_type=jnp.float32)
        e = e + bias[:, None, :, :]
        p = jnp.exp(e - e.max(-1, keepdims=True))
        w = (p / p.sum(-1, keepdims=True)).astype(jnp.bfloat16)
        a = jnp.einsum("bhqk,bkhd->bqhd", w, v.astype(jnp.bfloat16),
                       preferred_element_type=jnp.float32)
        return mm(a.reshape(B * Sq, D), wo).reshape(B, Sq, D)

    def ffn(v, w1, b1, w2, b2):
        h1 = mm(v.reshape(B * S, D), w1) + b1
        h2 = mm(h1, w2) + b2
        return jnp.maximum(h2, 0.0).reshape(B, S, D)   # ReLU after the 2nd Linear

    x = x.astype(jnp.float32)
    for n in range(n_layers):
        aw = params["attw"][n]
        g = params["lnp"][n]
        res = x
        xa = ln(x, g[0], g[1]) if pre_ln else x
        x = mha(xa, xa, la_bias, aw[0], aw[1], aw[2], aw[3]) + res
        if not pre_ln:
            x = ln(x, g[0], g[1])
        res = x
        xb = ln(x, g[2], g[3]) if pre_ln else x
        x = mha(xb, enc, in_bias, aw[4], aw[5], aw[6], aw[7]) + res
        if not pre_ln:
            x = ln(x, g[2], g[3])
        res = x
        xc = ln(x, g[4], g[5]) if pre_ln else x
        x = ffn(xc, params["w1"][n], params["b1"][n, 0],
                params["w2"][n], params["b2"][n, 0]) + res
        if not pre_ln:
            x = ln(x, g[4], g[5])
    return x


if __name__ == "__main__":
    B, S, SE, D, HEADS, D_FF, N_LAYERS = 2, 16, 16, 128, 4, 256, 2

    key = jax.random.PRNGKey(0)
    (k_aw, k_w1, k_w2, k_b1, k_b2, k_g, k_be,
     k_x, k_enc, k_pad) = jax.random.split(key, 10)

    def nrm(k, shape, scale=0.05):
        return jax.random.normal(k, shape, dtype=jnp.float32) * scale

    gammas = 1.0 + nrm(k_g, (N_LAYERS, 3, D))
    betas = nrm(k_be, (N_LAYERS, 3, D))
    lnp = jnp.stack([gammas[:, 0], betas[:, 0],
                     gammas[:, 1], betas[:, 1],
                     gammas[:, 2], betas[:, 2]], axis=1)          # (N, 6, D)

    params = {
        # rows 0..3 = self-attn [Wq, Wk, Wv, Wo]; rows 4..7 = cross-attn; layers stacked.
        "attw": nrm(k_aw, (N_LAYERS, 8, D, D)).astype(jnp.bfloat16),
        "lnp": lnp,                                               # f32
        "w1": nrm(k_w1, (N_LAYERS, D, D_FF)).astype(jnp.bfloat16),
        "b1": nrm(k_b1, (N_LAYERS, 1, D_FF)),
        "w2": nrm(k_w2, (N_LAYERS, D_FF, D)).astype(jnp.bfloat16),
        "b2": nrm(k_b2, (N_LAYERS, 1, D)),
    }

    x = jax.random.normal(k_x, (B, S, D), dtype=jnp.float32)
    encoded = jax.random.normal(k_enc, (B, SE, D), dtype=jnp.float32)

    # Look-ahead (causal) mask for self-attention: True == masked.
    la_mask = jnp.broadcast_to(jnp.triu(jnp.ones((S, S), jnp.bool_), k=1), (B, S, S))
    # Encoder padding mask for cross-attention, broadcast over query positions;
    # keep position 0 always visible so no row is fully masked.
    pad = jax.random.uniform(k_pad, (B, SE)) < 0.25
    pad = pad.at[:, 0].set(False)
    in_mask = jnp.broadcast_to(pad[:, None, :], (B, S, SE))

    # TODO(synk): dropout (p=0.1) is identity in eval mode and is omitted from the kernel.
    for pre_ln in (True, False):
        out = decoder_forward(x, encoded, la_mask, in_mask, params,
                              heads=HEADS, pre_ln=pre_ln)
        out = jax.block_until_ready(out)
        ref = reference_decoder(x, encoded, la_mask, in_mask, params,
                                heads=HEADS, pre_ln=pre_ln)
        assert out.shape == (B, S, D)
        assert jnp.allclose(out, ref, atol=1e-2, rtol=1e-2), (
            f"pre_ln={pre_ln}: mismatch vs JAX reference, "
            f"max abs diff {jnp.max(jnp.abs(out - ref))}")

    print("KERNEL_OK")
</pallas_src>

<mosaic_0001>
module attributes {stable_mosaic.version = 11 : i64} {
  func.func @decoder_stack_kernel(%arg0: i32, %arg1: i32, %arg2: memref<2x16x128xf32, #tpu.memory_space<vmem>>, %arg3: memref<2x16x128xbf16, #tpu.memory_space<vmem>>, %arg4: memref<2x16x16xbf16, #tpu.memory_space<vmem>>, %arg5: memref<2x16x16xbf16, #tpu.memory_space<vmem>>, %arg6: memref<1x128x1024xbf16, #tpu.memory_space<vmem>>, %arg7: memref<1x6x128xf32, #tpu.memory_space<vmem>>, %arg8: memref<1x128x256xbf16, #tpu.memory_space<vmem>>, %arg9: memref<1x1x256xf32, #tpu.memory_space<vmem>>, %arg10: memref<1x256x128xbf16, #tpu.memory_space<vmem>>, %arg11: memref<1x1x128xf32, #tpu.memory_space<vmem>>, %arg12: memref<2x16x128xf32, #tpu.memory_space<vmem>>) attributes {dimension_semantics = [#tpu.dimension_semantics<parallel>, #tpu.dimension_semantics<arbitrary>], iteration_bounds = array<i64: 1, 2>, scalar_prefetch = 0 : i64, scratch_operands = 0 : i64, tpu.core_type = #tpu.core_type<tc>, window_params = [{transform_indices = @transform_0, window_bounds = array<i64: 2, 16, 128>}, {transform_indices = @transform_1, window_bounds = array<i64: 2, 16, 128>}, {transform_indices = @transform_2, window_bounds = array<i64: 2, 16, 16>}, {transform_indices = @transform_3, window_bounds = array<i64: 2, 16, 16>}, {transform_indices = @transform_4, window_bounds = array<i64: 1, 128, 1024>}, {transform_indices = @transform_5, window_bounds = array<i64: 1, 6, 128>}, {transform_indices = @transform_6, window_bounds = array<i64: 1, 128, 256>}, {transform_indices = @transform_7, window_bounds = array<i64: 1, 1, 256>}, {transform_indices = @transform_8, window_bounds = array<i64: 1, 256, 128>}, {transform_indices = @transform_9, window_bounds = array<i64: 1, 1, 128>}, {transform_indices = @transform_10, window_bounds = array<i64: 2, 16, 128>}]} {
    %c0_i32 = arith.constant 0 : i32
    %0 = arith.cmpi eq, %arg1, %c0_i32 : i32
    %1 = arith.extui %0 : i1 to i32
    %c0_i32_0 = arith.constant 0 : i32
    %2 = arith.cmpi ne, %1, %c0_i32_0 : i32
    scf.if %2 {
      %c0_97 = arith.constant 0 : index
      %c0_98 = arith.constant 0 : index
      %c0_99 = arith.constant 0 : index
      %369 = vector.load %arg2[%c0_97, %c0_98, %c0_99] : memref<2x16x128xf32, #tpu.memory_space<vmem>>, vector<2x16x128xf32>
      %c0_100 = arith.constant 0 : index
      %c0_101 = arith.constant 0 : index
      %c0_102 = arith.constant 0 : index
      %370 = vector.load %arg12[%c0_100, %c0_101, %c0_102] : memref<2x16x128xf32, #tpu.memory_space<vmem>>, vector<2x16x128xf32>
      tpu.vector_store %arg12[%c0_100, %c0_101, %c0_102], %369 {strides = array<i32>} : memref<2x16x128xf32, #tpu.memory_space<vmem>>, vector<2x16x128xf32>,
    } else {
    }
    %c0 = arith.constant 0 : index
    %c0_1 = arith.constant 0 : index
    %c0_2 = arith.constant 0 : index
    %3 = vector.load %arg12[%c0, %c0_1, %c0_2] : memref<2x16x128xf32, #tpu.memory_space<vmem>>, vector<2x16x128xf32>
    %4 = vector.shape_cast %3 : vector<2x16x128xf32> to vector<32x128xf32>
    %c0_3 = arith.constant 0 : index
    %c0_4 = arith.constant 0 : index
    %c0_5 = arith.constant 0 : index
    %5 = vector.load %arg3[%c0_3, %c0_4, %c0_5] : memref<2x16x128xbf16, #tpu.memory_space<vmem>>, vector<2x16x128xbf16>
    %6 = vector.shape_cast %5 : vector<2x16x128xbf16> to vector<32x128xbf16>
    %c0_6 = arith.constant 0 : index
    %c0_7 = arith.constant 0 : index
    %c0_8 = arith.constant 0 : index
    %7 = vector.load %arg4[%c0_6, %c0_7, %c0_8] : memref<2x16x16xbf16, #tpu.memory_space<vmem>>, vector<2x16x16xbf16>
    %8 = arith.extf %7 : vector<2x16x16xbf16> to vector<2x16x16xf32>
    %c0_9 = arith.constant 0 : index
    %c0_10 = arith.constant 0 : index
    %c0_11 = arith.constant 0 : index
    %9 = vector.load %arg5[%c0_9, %c0_10, %c0_11] : memref<2x16x16xbf16, #tpu.memory_space<vmem>>, vector<2x16x16xbf16>
    %10 = arith.extf %9 : vector<2x16x16xbf16> to vector<2x16x16xf32>
    %c0_12 = arith.constant 0 : index
    %c0_13 = arith.constant 0 : index
    %c0_14 = arith.constant 0 : index
    %11 = vector.load %arg6[%c0_12, %c0_13, %c0_14] : memref<1x128x1024xbf16, #tpu.memory_space<vmem>>, vector<1x128x1024xbf16>
    %12 = vector.shape_cast %11 : vector<1x128x1024xbf16> to vector<128x1024xbf16>
    %c0_15 = arith.constant 0 : index
    %c0_16 = arith.constant 0 : index
    %c0_17 = arith.constant 0 : index
    %13 = vector.load %arg7[%c0_15, %c0_16, %c0_17] : memref<1x6x128xf32, #tpu.memory_space<vmem>>, vector<1x6x128xf32>
    %14 = vector.shape_cast %13 : vector<1x6x128xf32> to vector<6x128xf32>
    %cst = arith.constant dense<0.000000e+00> : vector<32xf32>
    %15 = vector.multi_reduction <add>, %4, %cst [1] : vector<32x128xf32> to vector<32xf32>
    %16 = vector.shape_cast %15 : vector<32xf32> to vector<32x1xf32>
    %cst_18 = arith.constant 1.280000e+02 : f32
    %17 = vector.broadcast %cst_18 : f32 to vector<32x1xf32>
    %18 = arith.divf %16, %17 : vector<32x1xf32>
    %19 = vector.broadcast %18 : vector<32x1xf32> to vector<32x128xf32>
    %20 = arith.subf %4, %19 : vector<32x128xf32>
    %21 = arith.mulf %20, %20 : vector<32x128xf32>
    %cst_19 = arith.constant dense<0.000000e+00> : vector<32xf32>
    %22 = vector.multi_reduction <add>, %21, %cst_19 [1] : vector<32x128xf32> to vector<32xf32>
    %23 = vector.shape_cast %22 : vector<32xf32> to vector<32x1xf32>
    %cst_20 = arith.constant 1.280000e+02 : f32
    %24 = vector.broadcast %cst_20 : f32 to vector<32x1xf32>
    %25 = arith.divf %23, %24 : vector<32x1xf32>
    %26 = vector.broadcast %18 : vector<32x1xf32> to vector<32x128xf32>
    %27 = arith.subf %4, %26 : vector<32x128xf32>
    %cst_21 = arith.constant 9.99999974E-6 : f32
    %28 = vector.broadcast %cst_21 : f32 to vector<32x1xf32>
    %29 = arith.addf %25, %28 : vector<32x1xf32>
    %30 = math.rsqrt %29 : vector<32x1xf32>
    %31 = vector.broadcast %30 : vector<32x1xf32> to vector<32x128xf32>
    %32 = arith.mulf %27, %31 : vector<32x128xf32>
    %33 = vector.extract_strided_slice %14 {offsets = [0, 0], sizes = [1, 128], strides = [1, 1]} : vector<6x128xf32> to vector<1x128xf32>
    %34 = vector.shape_cast %33 : vector<1x128xf32> to vector<128xf32>
    %35 = vector.shape_cast %34 : vector<128xf32> to vector<1x128xf32>
    %36 = vector.broadcast %35 : vector<1x128xf32> to vector<32x128xf32>
    %37 = arith.mulf %32, %36 : vector<32x128xf32>
    %38 = vector.extract_strided_slice %14 {offsets = [1, 0], sizes = [1, 128], strides = [1, 1]} : vector<6x128xf32> to vector<1x128xf32>
    %39 = vector.shape_cast %38 : vector<1x128xf32> to vector<128xf32>
    %40 = vector.shape_cast %39 : vector<128xf32> to vector<1x128xf32>
    %41 = vector.broadcast %40 : vector<1x128xf32> to vector<32x128xf32>
    %42 = arith.addf %37, %41 : vector<32x128xf32>
    %43 = arith.truncf %42 : vector<32x128xf32> to vector<32x128xbf16>
    %44 = vector.extract_strided_slice %12 {offsets = [0, 0], sizes = [128, 384], strides = [1, 1]} : vector<128x1024xbf16> to vector<128x384xbf16>
    %cst_22 = arith.constant dense<0.000000e+00> : vector<32x384xf32>
    %45 = tpu.matmul %43, %44, %cst_22 {dimension_numbers = #tpu.dot_dimension_numbers<[1], [0], [0], [1], [0, 0, 1, 1], [], []>} : vector<32x128xbf16>, vector<128x384xbf16>, vector<32x384xf32> -> vector<32x384xf32>
    %46 = vector.extract_strided_slice %45 {offsets = [0, 0], sizes = [32, 128], strides = [1, 1]} : vector<32x384xf32> to vector<32x128xf32>
    %cst_23 = arith.constant 0.176776692 : f32
    %47 = vector.broadcast %cst_23 : f32 to vector<32x128xf32>
    %48 = arith.mulf %46, %47 : vector<32x128xf32>
    %49 = vector.extract_strided_slice %45 {offsets = [0, 128], sizes = [32, 128], strides = [1, 1]} : vector<32x384xf32> to vector<32x128xf32>
    %50 = vector.extract_strided_slice %45 {offsets = [0, 256], sizes = [32, 128], strides = [1, 1]} : vector<32x384xf32> to vector<32x128xf32>
    %51 = vector.extract_strided_slice %12 {offsets = [0, 384], sizes = [128, 128], strides = [1, 1]} : vector<128x1024xbf16> to vector<128x128xbf16>
    %cst_24 = arith.constant 0.000000e+00 : f32
    %52 = vector.broadcast %cst_24 : f32 to vector<32x128xf32>
    %53 = vector.extract_strided_slice %48 {offsets = [0, 0], sizes = [32, 32], strides = [1, 1]} : vector<32x128xf32> to vector<32x32xf32>
    %54 = arith.truncf %53 : vector<32x32xf32> to vector<32x32xbf16>
    %55 = vector.shape_cast %54 : vector<32x32xbf16> to vector<2x16x32xbf16>
    %56 = vector.extract_strided_slice %49 {offsets = [0, 0], sizes = [32, 32], strides = [1, 1]} : vector<32x128xf32> to vector<32x32xf32>
    %57 = arith.truncf %56 : vector<32x32xf32> to vector<32x32xbf16>
    %58 = vector.shape_cast %57 : vector<32x32xbf16> to vector<2x16x32xbf16>
    %59 = vector.extract_strided_slice %50 {offsets = [0, 0], sizes = [32, 32], strides = [1, 1]} : vector<32x128xf32> to vector<32x32xf32>
    %60 = arith.truncf %59 : vector<32x32xf32> to vector<32x32xbf16>
    %61 = vector.shape_cast %60 : vector<32x32xbf16> to vector<2x16x32xbf16>
    "tpu.trace_start"() <{level = 10 : i32, message = "bqd,bkd->bqk"}> : () -> ()
    %cst_25 = arith.constant dense<0.000000e+00> : vector<2x16x16xf32>
    %62 = tpu.matmul %55, %58, %cst_25 {dimension_numbers = #tpu.dot_dimension_numbers<[2], [2], [1], [1], [0, 0, 0, 1, 1, 1], [0], [0]>} : vector<2x16x32xbf16>, vector<2x16x32xbf16>, vector<2x16x16xf32> -> vector<2x16x16xf32>
    "tpu.trace_stop"() : () -> ()
    %63 = arith.addf %62, %8 : vector<2x16x16xf32>
    %cst_26 = arith.constant dense<0xFF800000> : vector<2x16xf32>
    %64 = vector.multi_reduction <maximumf>, %63, %cst_26 [2] : vector<2x16x16xf32> to vector<2x16xf32>
    %65 = vector.shape_cast %64 : vector<2x16xf32> to vector<2x16x1xf32>
    %66 = vector.broadcast %65 : vector<2x16x1xf32> to vector<2x16x16xf32>
    %67 = arith.subf %63, %66 : vector<2x16x16xf32>
    %68 = math.exp %67 : vector<2x16x16xf32>
    %cst_27 = arith.constant dense<0.000000e+00> : vector<2x16xf32>
    %69 = vector.multi_reduction <add>, %68, %cst_27 [2] : vector<2x16x16xf32> to vector<2x16xf32>
    %70 = vector.shape_cast %69 : vector<2x16xf32> to vector<2x16x1xf32>
    %71 = tpu.reciprocal %70 {approx = true} : vector<2x16x1xf32> -> vector<2x16x1xf32>
    %72 = vector.broadcast %71 : vector<2x16x1xf32> to vector<2x16x16xf32>
    %73 = arith.mulf %68, %72 : vector<2x16x16xf32>
    %74 = arith.truncf %73 : vector<2x16x16xf32> to vector<2x16x16xbf16>
    "tpu.trace_start"() <{level = 10 : i32, message = "bqk,bkd->bqd"}> : () -> ()
    %cst_28 = arith.constant dense<0.000000e+00> : vector<2x16x32xf32>
    %75 = tpu.matmul %74, %61, %cst_28 {dimension_numbers = #tpu.dot_dimension_numbers<[2], [1], [1], [2], [0, 0, 0, 1, 1, 2], [0], [0]>} : vector<2x16x16xbf16>, vector<2x16x32xbf16>, vector<2x16x32xf32> -> vector<2x16x32xf32>
    "tpu.trace_stop"() : () -> ()
    %76 = vector.shape_cast %75 : vector<2x16x32xf32> to vector<32x32xf32>
    %77 = arith.truncf %76 : vector<32x32xf32> to vector<32x32xbf16>
    %78 = vector.extract_strided_slice %51 {offsets = [0, 0], sizes = [32, 128], strides = [1, 1]} : vector<128x128xbf16> to vector<32x128xbf16>
    %cst_29 = arith.constant dense<0.000000e+00> : vector<32x128xf32>
    %79 = tpu.matmul %77, %78, %cst_29 {dimension_numbers = #tpu.dot_dimension_numbers<[1], [0], [0], [1], [0, 0, 1, 1], [], []>} : vector<32x32xbf16>, vector<32x128xbf16>, vector<32x128xf32> -> vector<32x128xf32>
    %80 = arith.addf %52, %79 : vector<32x128xf32>
    %81 = vector.extract_strided_slice %48 {offsets = [0, 32], sizes = [32, 32], strides = [1, 1]} : vector<32x128xf32> to vector<32x32xf32>
    %82 = arith.truncf %81 : vector<32x32xf32> to vector<32x32xbf16>
    %83 = vector.shape_cast %82 : vector<32x32xbf16> to vector<2x16x32xbf16>
    %84 = vector.extract_strided_slice %49 {offsets = [0, 32], sizes = [32, 32], strides = [1, 1]} : vector<32x128xf32> to vector<32x32xf32>
    %85 = arith.truncf %84 : vector<32x32xf32> to vector<32x32xbf16>
    %86 = vector.shape_cast %85 : vector<32x32xbf16> to vector<2x16x32xbf16>
    %87 = vector.extract_strided_slice %50 {offsets = [0, 32], sizes = [32, 32], strides = [1, 1]} : vector<32x128xf32> to vector<32x32xf32>
    %88 = arith.truncf %87 : vector<32x32xf32> to vector<32x32xbf16>
    %89 = vector.shape_cast %88 : vector<32x32xbf16> to vector<2x16x32xbf16>
    "tpu.trace_start"() <{level = 10 : i32, message = "bqd,bkd->bqk"}> : () -> ()
    %cst_30 = arith.constant dense<0.000000e+00> : vector<2x16x16xf32>
    %90 = tpu.matmul %83, %86, %cst_30 {dimension_numbers = #tpu.dot_dimension_numbers<[2], [2], [1], [1], [0, 0, 0, 1, 1, 1], [0], [0]>} : vector<2x16x32xbf16>, vector<2x16x32xbf16>, vector<2x16x16xf32> -> vector<2x16x16xf32>
    "tpu.trace_stop"() : () -> ()
    %91 = arith.addf %90, %8 : vector<2x16x16xf32>
    %cst_31 = arith.constant dense<0xFF800000> : vector<2x16xf32>
    %92 = vector.multi_reduction <maximumf>, %91, %cst_31 [2] : vector<2x16x16xf32> to vector<2x16xf32>
    %93 = vector.shape_cast %92 : vector<2x16xf32> to vector<2x16x1xf32>
    %94 = vector.broadcast %93 : vector<2x16x1xf32> to vector<2x16x16xf32>
    %95 = arith.subf %91, %94 : vector<2x16x16xf32>
    %96 = math.exp %95 : vector<2x16x16xf32>
    %cst_32 = arith.constant dense<0.000000e+00> : vector<2x16xf32>
    %97 = vector.multi_reduction <add>, %96, %cst_32 [2] : vector<2x16x16xf32> to vector<2x16xf32>
    %98 = vector.shape_cast %97 : vector<2x16xf32> to vector<2x16x1xf32>
    %99 = tpu.reciprocal %98 {approx = true} : vector<2x16x1xf32> -> vector<2x16x1xf32>
    %100 = vector.broadcast %99 : vector<2x16x1xf32> to vector<2x16x16xf32>
    %101 = arith.mulf %96, %100 : vector<2x16x16xf32>
    %102 = arith.truncf %101 : vector<2x16x16xf32> to vector<2x16x16xbf16>
    "tpu.trace_start"() <{level = 10 : i32, message = "bqk,bkd->bqd"}> : () -> ()
    %cst_33 = arith.constant dense<0.000000e+00> : vector<2x16x32xf32>
    %103 = tpu.matmul %102, %89, %cst_33 {dimension_numbers = #tpu.dot_dimension_numbers<[2], [1], [1], [2], [0, 0, 0, 1, 1, 2], [0], [0]>} : vector<2x16x16xbf16>, vector<2x16x32xbf16>, vector<2x16x32xf32> -> vector<2x16x32xf32>
    "tpu.trace_stop"() : () -> ()
    %104 = vector.shape_cast %103 : vector<2x16x32xf32> to vector<32x32xf32>
    %105 = arith.truncf %104 : vector<32x32xf32> to vector<32x32xbf16>
    %106 = vector.extract_strided_slice %51 {offsets = [32, 0], sizes = [32, 128], strides = [1, 1]} : vector<128x128xbf16> to vector<32x128xbf16>
    %cst_34 = arith.constant dense<0.000000e+00> : vector<32x128xf32>
    %107 = tpu.matmul %105, %106, %cst_34 {dimension_numbers = #tpu.dot_dimension_numbers<[1], [0], [0], [1], [0, 0, 1, 1], [], []>} : vector<32x32xbf16>, vector<32x128xbf16>, vector<32x128xf32> -> vector<32x128xf32>
    %108 = arith.addf %80, %107 : vector<32x128xf32>
    %109 = vector.extract_strided_slice %48 {offsets = [0, 64], sizes = [32, 32], strides = [1, 1]} : vector<32x128xf32> to vector<32x32xf32>
    %110 = arith.truncf %109 : vector<32x32xf32> to vector<32x32xbf16>
    %111 = vector.shape_cast %110 : vector<32x32xbf16> to vector<2x16x32xbf16>
    %112 = vector.extract_strided_slice %49 {offsets = [0, 64], sizes = [32, 32], strides = [1, 1]} : vector<32x128xf32> to vector<32x32xf32>
    %113 = arith.truncf %112 : vector<32x32xf32> to vector<32x32xbf16>
    %114 = vector.shape_cast %113 : vector<32x32xbf16> to vector<2x16x32xbf16>
    %115 = vector.extract_strided_slice %50 {offsets = [0, 64], sizes = [32, 32], strides = [1, 1]} : vector<32x128xf32> to vector<32x32xf32>
    %116 = arith.truncf %115 : vector<32x32xf32> to vector<32x32xbf16>
    %117 = vector.shape_cast %116 : vector<32x32xbf16> to vector<2x16x32xbf16>
    "tpu.trace_start"() <{level = 10 : i32, message = "bqd,bkd->bqk"}> : () -> ()
    %cst_35 = arith.constant dense<0.000000e+00> : vector<2x16x16xf32>
    %118 = tpu.matmul %111, %114, %cst_35 {dimension_numbers = #tpu.dot_dimension_numbers<[2], [2], [1], [1], [0, 0, 0, 1, 1, 1], [0], [0]>} : vector<2x16x32xbf16>, vector<2x16x32xbf16>, vector<2x16x16xf32> -> vector<2x16x16xf32>
    "tpu.trace_stop"() : () -> ()
    %119 = arith.addf %118, %8 : vector<2x16x16xf32>
    %cst_36 = arith.constant dense<0xFF800000> : vector<2x16xf32>
    %120 = vector.multi_reduction <maximumf>, %119, %cst_36 [2] : vector<2x16x16xf32> to vector<2x16xf32>
    %121 = vector.shape_cast %120 : vector<2x16xf32> to vector<2x16x1xf32>
    %122 = vector.broadcast %121 : vector<2x16x1xf32> to vector<2x16x16xf32>
    %123 = arith.subf %119, %122 : vector<2x16x16xf32>
    %124 = math.exp %123 : vector<2x16x16xf32>
    %cst_37 = arith.constant dense<0.000000e+00> : vector<2x16xf32>
    %125 = vector.multi_reduction <add>, %124, %cst_37 [2] : vector<2x16x16xf32> to vector<2x16xf32>
    %126 = vector.shape_cast %125 : vector<2x16xf32> to vector<2x16x1xf32>
    %127 = tpu.reciprocal %126 {approx = true} : vector<2x16x1xf32> -> vector<2x16x1xf32>
    %128 = vector.broadcast %127 : vector<2x16x1xf32> to vector<2x16x16xf32>
    %129 = arith.mulf %124, %128 : vector<2x16x16xf32>
    %130 = arith.truncf %129 : vector<2x16x16xf32> to vector<2x16x16xbf16>
    "tpu.trace_start"() <{level = 10 : i32, message = "bqk,bkd->bqd"}> : () -> ()
    %cst_38 = arith.constant dense<0.000000e+00> : vector<2x16x32xf32>
    %131 = tpu.matmul %130, %117, %cst_38 {dimension_numbers = #tpu.dot_dimension_numbers<[2], [1], [1], [2], [0, 0, 0, 1, 1, 2], [0], [0]>} : vector<2x16x16xbf16>, vector<2x16x32xbf16>, vector<2x16x32xf32> -> vector<2x16x32xf32>
    "tpu.trace_stop"() : () -> ()
    %132 = vector.shape_cast %131 : vector<2x16x32xf32> to vector<32x32xf32>
    %133 = arith.truncf %132 : vector<32x32xf32> to vector<32x32xbf16>
    %134 = vector.extract_strided_slice %51 {offsets = [64, 0], sizes = [32, 128], strides = [1, 1]} : vector<128x128xbf16> to vector<32x128xbf16>
    %cst_39 = arith.constant dense<0.000000e+00> : vector<32x128xf32>
    %135 = tpu.matmul %133, %134, %cst_39 {dimension_numbers = #tpu.dot_dimension_numbers<[1], [0], [0], [1], [0, 0, 1, 1], [], []>} : vector<32x32xbf16>, vector<32x128xbf16>, vector<32x128xf32> -> vector<32x128xf32>
    %136 = arith.addf %108, %135 : vector<32x128xf32>
    %137 = vector.extract_strided_slice %48 {offsets = [0, 96], sizes = [32, 32], strides = [1, 1]} : vector<32x128xf32> to vector<32x32xf32>
    %138 = arith.truncf %137 : vector<32x32xf32> to vector<32x32xbf16>
    %139 = vector.shape_cast %138 : vector<32x32xbf16> to vector<2x16x32xbf16>
    %140 = vector.extract_strided_slice %49 {offsets = [0, 96], sizes = [32, 32], strides = [1, 1]} : vector<32x128xf32> to vector<32x32xf32>
    %141 = arith.truncf %140 : vector<32x32xf32> to vector<32x32xbf16>
    %142 = vector.shape_cast %141 : vector<32x32xbf16> to vector<2x16x32xbf16>
    %143 = vector.extract_strided_slice %50 {offsets = [0, 96], sizes = [32, 32], strides = [1, 1]} : vector<32x128xf32> to vector<32x32xf32>
    %144 = arith.truncf %143 : vector<32x32xf32> to vector<32x32xbf16>
    %145 = vector.shape_cast %144 : vector<32x32xbf16> to vector<2x16x32xbf16>
    "tpu.trace_start"() <{level = 10 : i32, message = "bqd,bkd->bqk"}> : () -> ()
    %cst_40 = arith.constant dense<0.000000e+00> : vector<2x16x16xf32>
    %146 = tpu.matmul %139, %142, %cst_40 {dimension_numbers = #tpu.dot_dimension_numbers<[2], [2], [1], [1], [0, 0, 0, 1, 1, 1], [0], [0]>} : vector<2x16x32xbf16>, vector<2x16x32xbf16>, vector<2x16x16xf32> -> vector<2x16x16xf32>
    "tpu.trace_stop"() : () -> ()
    %147 = arith.addf %146, %8 : vector<2x16x16xf32>
    %cst_41 = arith.constant dense<0xFF800000> : vector<2x16xf32>
    %148 = vector.multi_reduction <maximumf>, %147, %cst_41 [2] : vector<2x16x16xf32> to vector<2x16xf32>
    %149 = vector.shape_cast %148 : vector<2x16xf32> to vector<2x16x1xf32>
    %150 = vector.broadcast %149 : vector<2x16x1xf32> to vector<2x16x16xf32>
    %151 = arith.subf %147, %150 : vector<2x16x16xf32>
    %152 = math.exp %151 : vector<2x16x16xf32>
    %cst_42 = arith.constant dense<0.000000e+00> : vector<2x16xf32>
    %153 = vector.multi_reduction <add>, %152, %cst_42 [2] : vector<2x16x16xf32> to vector<2x16xf32>
    %154 = vector.shape_cast %153 : vector<2x16xf32> to vector<2x16x1xf32>
    %155 = tpu.reciprocal %154 {approx = true} : vector<2x16x1xf32> -> vector<2x16x1xf32>
    %156 = vector.broadcast %155 : vector<2x16x1xf32> to vector<2x16x16xf32>
    %157 = arith.mulf %152, %156 : vector<2x16x16xf32>
    %158 = arith.truncf %157 : vector<2x16x16xf32> to vector<2x16x16xbf16>
    "tpu.trace_start"() <{level = 10 : i32, message = "bqk,bkd->bqd"}> : () -> ()
    %cst_43 = arith.constant dense<0.000000e+00> : vector<2x16x32xf32>
    %159 = tpu.matmul %158, %145, %cst_43 {dimension_numbers = #tpu.dot_dimension_numbers<[2], [1], [1], [2], [0, 0, 0, 1, 1, 2], [0], [0]>} : vector<2x16x16xbf16>, vector<2x16x32xbf16>, vector<2x16x32xf32> -> vector<2x16x32xf32>
    "tpu.trace_stop"() : () -> ()
    %160 = vector.shape_cast %159 : vector<2x16x32xf32> to vector<32x32xf32>
    %161 = arith.truncf %160 : vector<32x32xf32> to vector<32x32xbf16>
    %162 = vector.extract_strided_slice %51 {offsets = [96, 0], sizes = [32, 128], strides = [1, 1]} : vector<128x128xbf16> to vector<32x128xbf16>
    %cst_44 = arith.constant dense<0.000000e+00> : vector<32x128xf32>
    %163 = tpu.matmul %161, %162, %cst_44 {dimension_numbers = #tpu.dot_dimension_numbers<[1], [0], [0], [1], [0, 0, 1, 1], [], []>} : vector<32x32xbf16>, vector<32x128xbf16>, vector<32x128xf32> -> vector<32x128xf32>
    %164 = arith.addf %136, %163 : vector<32x128xf32>
    %165 = arith.addf %164, %4 : vector<32x128xf32>
    %cst_45 = arith.constant dense<0.000000e+00> : vector<32xf32>
    %166 = vector.multi_reduction <add>, %165, %cst_45 [1] : vector<32x128xf32> to vector<32xf32>
    %167 = vector.shape_cast %166 : vector<32xf32> to vector<32x1xf32>
    %cst_46 = arith.constant 1.280000e+02 : f32
    %168 = vector.broadcast %cst_46 : f32 to vector<32x1xf32>
    %169 = arith.divf %167, %168 : vector<32x1xf32>
    %170 = vector.broadcast %169 : vector<32x1xf32> to vector<32x128xf32>
    %171 = arith.subf %165, %170 : vector<32x128xf32>
    %172 = arith.mulf %171, %171 : vector<32x128xf32>
    %cst_47 = arith.constant dense<0.000000e+00> : vector<32xf32>
    %173 = vector.multi_reduction <add>, %172, %cst_47 [1] : vector<32x128xf32> to vector<32xf32>
    %174 = vector.shape_cast %173 : vector<32xf32> to vector<32x1xf32>
    %cst_48 = arith.constant 1.280000e+02 : f32
    %175 = vector.broadcast %cst_48 : f32 to vector<32x1xf32>
    %176 = arith.divf %174, %175 : vector<32x1xf32>
    %177 = vector.broadcast %169 : vector<32x1xf32> to vector<32x128xf32>
    %178 = arith.subf %165, %177 : vector<32x128xf32>
    %cst_49 = arith.constant 9.99999974E-6 : f32
    %179 = vector.broadcast %cst_49 : f32 to vector<32x1xf32>
    %180 = arith.addf %176, %179 : vector<32x1xf32>
    %181 = math.rsqrt %180 : vector<32x1xf32>
    %182 = vector.broadcast %181 : vector<32x1xf32> to vector<32x128xf32>
    %183 = arith.mulf %178, %182 : vector<32x128xf32>
    %184 = vector.extract_strided_slice %14 {offsets = [2, 0], sizes = [1, 128], strides = [1, 1]} : vector<6x128xf32> to vector<1x128xf32>
    %185 = vector.shape_cast %184 : vector<1x128xf32> to vector<128xf32>
    %186 = vector.shape_cast %185 : vector<128xf32> to vector<1x128xf32>
    %187 = vector.broadcast %186 : vector<1x128xf32> to vector<32x128xf32>
    %188 = arith.mulf %183, %187 : vector<32x128xf32>
    %189 = vector.extract_strided_slice %14 {offsets = [3, 0], sizes = [1, 128], strides = [1, 1]} : vector<6x128xf32> to vector<1x128xf32>
    %190 = vector.shape_cast %189 : vector<1x128xf32> to vector<128xf32>
    %191 = vector.shape_cast %190 : vector<128xf32> to vector<1x128xf32>
    %192 = vector.broadcast %191 : vector<1x128xf32> to vector<32x128xf32>
    %193 = arith.addf %188, %192 : vector<32x128xf32>
    %194 = arith.truncf %193 : vector<32x128xf32> to vector<32x128xbf16>
    %195 = vector.extract_strided_slice %12 {offsets = [0, 512], sizes = [128, 128], strides = [1, 1]} : vector<128x1024xbf16> to vector<128x128xbf16>
    %cst_50 = arith.constant dense<0.000000e+00> : vector<32x128xf32>
    %196 = tpu.matmul %194, %195, %cst_50 {dimension_numbers = #tpu.dot_dimension_numbers<[1], [0], [0], [1], [0, 0, 1, 1], [], []>} : vector<32x128xbf16>, vector<128x128xbf16>, vector<32x128xf32> -> vector<32x128xf32>
    %cst_51 = arith.constant 0.176776692 : f32
    %197 = vector.broadcast %cst_51 : f32 to vector<32x128xf32>
    %198 = arith.mulf %196, %197 : vector<32x128xf32>
    %199 = vector.extract_strided_slice %12 {offsets = [0, 640], sizes = [128, 256], strides = [1, 1]} : vector<128x1024xbf16> to vector<128x256xbf16>
    %cst_52 = arith.constant dense<0.000000e+00> : vector<32x256xf32>
    %200 = tpu.matmul %6, %199, %cst_52 {dimension_numbers = #tpu.dot_dimension_numbers<[1], [0], [0], [1], [0, 0, 1, 1], [], []>} : vector<32x128xbf16>, vector<128x256xbf16>, vector<32x256xf32> -> vector<32x256xf32>
    %201 = vector.extract_strided_slice %200 {offsets = [0, 0], sizes = [32, 128], strides = [1, 1]} : vector<32x256xf32> to vector<32x128xf32>
    %202 = vector.extract_strided_slice %200 {offsets = [0, 128], sizes = [32, 128], strides = [1, 1]} : vector<32x256xf32> to vector<32x128xf32>
    %203 = vector.extract_strided_slice %12 {offsets = [0, 896], sizes = [128, 128], strides = [1, 1]} : vector<128x1024xbf16> to vector<128x128xbf16>
    %cst_53 = arith.constant 0.000000e+00 : f32
    %204 = vector.broadcast %cst_53 : f32 to vector<32x128xf32>
    %205 = vector.extract_strided_slice %198 {offsets = [0, 0], sizes = [32, 32], strides = [1, 1]} : vector<32x128xf32> to vector<32x32xf32>
    %206 = arith.truncf %205 : vector<32x32xf32> to vector<32x32xbf16>
    %207 = vector.shape_cast %206 : vector<32x32xbf16> to vector<2x16x32xbf16>
    %208 = vector.extract_strided_slice %201 {offsets = [0, 0], sizes = [32, 32], strides = [1, 1]} : vector<32x128xf32> to vector<32x32xf32>
    %209 = arith.truncf %208 : vector<32x32xf32> to vector<32x32xbf16>
    %210 = vector.shape_cast %209 : vector<32x32xbf16> to vector<2x16x32xbf16>
    %211 = vector.extract_strided_slice %202 {offsets = [0, 0], sizes = [32, 32], strides = [1, 1]} : vector<32x128xf32> to vector<32x32xf32>
    %212 = arith.truncf %211 : vector<32x32xf32> to vector<32x32xbf16>
    %213 = vector.shape_cast %212 : vector<32x32xbf16> to vector<2x16x32xbf16>
    "tpu.trace_start"() <{level = 10 : i32, message = "bqd,bkd->bqk"}> : () -> ()
    %cst_54 = arith.constant dense<0.000000e+00> : vector<2x16x16xf32>
    %214 = tpu.matmul %207, %210, %cst_54 {dimension_numbers = #tpu.dot_dimension_numbers<[2], [2], [1], [1], [0, 0, 0, 1, 1, 1], [0], [0]>} : vector<2x16x32xbf16>, vector<2x16x32xbf16>, vector<2x16x16xf32> -> vector<2x16x16xf32>
    "tpu.trace_stop"() : () -> ()
    %215 = arith.addf %214, %10 : vector<2x16x16xf32>
    %cst_55 = arith.constant dense<0xFF800000> : vector<2x16xf32>
    %216 = vector.multi_reduction <maximumf>, %215, %cst_55 [2] : vector<2x16x16xf32> to vector<2x16xf32>
    %217 = vector.shape_cast %216 : vector<2x16xf32> to vector<2x16x1xf32>
    %218 = vector.broadcast %217 : vector<2x16x1xf32> to vector<2x16x16xf32>
    %219 = arith.subf %215, %218 : vector<2x16x16xf32>
    %220 = math.exp %219 : vector<2x16x16xf32>
    %cst_56 = arith.constant dense<0.000000e+00> : vector<2x16xf32>
    %221 = vector.multi_reduction <add>, %220, %cst_56 [2] : vector<2x16x16xf32> to vector<2x16xf32>
    %222 = vector.shape_cast %221 : vector<2x16xf32> to vector<2x16x1xf32>
    %223 = tpu.reciprocal %222 {approx = true} : vector<2x16x1xf32> -> vector<2x16x1xf32>
    %224 = vector.broadcast %223 : vector<2x16x1xf32> to vector<2x16x16xf32>
    %225 = arith.mulf %220, %224 : vector<2x16x16xf32>
    %226 = arith.truncf %225 : vector<2x16x16xf32> to vector<2x16x16xbf16>
    "tpu.trace_start"() <{level = 10 : i32, message = "bqk,bkd->bqd"}> : () -> ()
    %cst_57 = arith.constant dense<0.000000e+00> : vector<2x16x32xf32>
    %227 = tpu.matmul %226, %213, %cst_57 {dimension_numbers = #tpu.dot_dimension_numbers<[2], [1], [1], [2], [0, 0, 0, 1, 1, 2], [0], [0]>} : vector<2x16x16xbf16>, vector<2x16x32xbf16>, vector<2x16x32xf32> -> vector<2x16x32xf32>
    "tpu.trace_stop"() : () -> ()
    %228 = vector.shape_cast %227 : vector<2x16x32xf32> to vector<32x32xf32>
    %229 = arith.truncf %228 : vector<32x32xf32> to vector<32x32xbf16>
    %230 = vector.extract_strided_slice %203 {offsets = [0, 0], sizes = [32, 128], strides = [1, 1]} : vector<128x128xbf16> to vector<32x128xbf16>
    %cst_58 = arith.constant dense<0.000000e+00> : vector<32x128xf32>
    %231 = tpu.matmul %229, %230, %cst_58 {dimension_numbers = #tpu.dot_dimension_numbers<[1], [0], [0], [1], [0, 0, 1, 1], [], []>} : vector<32x32xbf16>, vector<32x128xbf16>, vector<32x128xf32> -> vector<32x128xf32>
    %232 = arith.addf %204, %231 : vector<32x128xf32>
    %233 = vector.extract_strided_slice %198 {offsets = [0, 32], sizes = [32, 32], strides = [1, 1]} : vector<32x128xf32> to vector<32x32xf32>
    %234 = arith.truncf %233 : vector<32x32xf32> to vector<32x32xbf16>
    %235 = vector.shape_cast %234 : vector<32x32xbf16> to vector<2x16x32xbf16>
    %236 = vector.extract_strided_slice %201 {offsets = [0, 32], sizes = [32, 32], strides = [1, 1]} : vector<32x128xf32> to vector<32x32xf32>
    %237 = arith.truncf %236 : vector<32x32xf32> to vector<32x32xbf16>
    %238 = vector.shape_cast %237 : vector<32x32xbf16> to vector<2x16x32xbf16>
    %239 = vector.extract_strided_slice %202 {offsets = [0, 32], sizes = [32, 32], strides = [1, 1]} : vector<32x128xf32> to vector<32x32xf32>
    %240 = arith.truncf %239 : vector<32x32xf32> to vector<32x32xbf16>
    %241 = vector.shape_cast %240 : vector<32x32xbf16> to vector<2x16x32xbf16>
    "tpu.trace_start"() <{level = 10 : i32, message = "bqd,bkd->bqk"}> : () -> ()
    %cst_59 = arith.constant dense<0.000000e+00> : vector<2x16x16xf32>
    %242 = tpu.matmul %235, %238, %cst_59 {dimension_numbers = #tpu.dot_dimension_numbers<[2], [2], [1], [1], [0, 0, 0, 1, 1, 1], [0], [0]>} : vector<2x16x32xbf16>, vector<2x16x32xbf16>, vector<2x16x16xf32> -> vector<2x16x16xf32>
    "tpu.trace_stop"() : () -> ()
    %243 = arith.addf %242, %10 : vector<2x16x16xf32>
    %cst_60 = arith.constant dense<0xFF800000> : vector<2x16xf32>
    %244 = vector.multi_reduction <maximumf>, %243, %cst_60 [2] : vector<2x16x16xf32> to vector<2x16xf32>
    %245 = vector.shape_cast %244 : vector<2x16xf32> to vector<2x16x1xf32>
    %246 = vector.broadcast %245 : vector<2x16x1xf32> to vector<2x16x16xf32>
    %247 = arith.subf %243, %246 : vector<2x16x16xf32>
    %248 = math.exp %247 : vector<2x16x16xf32>
    %cst_61 = arith.constant dense<0.000000e+00> : vector<2x16xf32>
    %249 = vector.multi_reduction <add>, %248, %cst_61 [2] : vector<2x16x16xf32> to vector<2x16xf32>
    %250 = vector.shape_cast %249 : vector<2x16xf32> to vector<2x16x1xf32>
    %251 = tpu.reciprocal %250 {approx = true} : vector<2x16x1xf32> -> vector<2x16x1xf32>
    %252 = vector.broadcast %251 : vector<2x16x1xf32> to vector<2x16x16xf32>
    %253 = arith.mulf %248, %252 : vector<2x16x16xf32>
    %254 = arith.truncf %253 : vector<2x16x16xf32> to vector<2x16x16xbf16>
    "tpu.trace_start"() <{level = 10 : i32, message = "bqk,bkd->bqd"}> : () -> ()
    %cst_62 = arith.constant dense<0.000000e+00> : vector<2x16x32xf32>
    %255 = tpu.matmul %254, %241, %cst_62 {dimension_numbers = #tpu.dot_dimension_numbers<[2], [1], [1], [2], [0, 0, 0, 1, 1, 2], [0], [0]>} : vector<2x16x16xbf16>, vector<2x16x32xbf16>, vector<2x16x32xf32> -> vector<2x16x32xf32>
    "tpu.trace_stop"() : () -> ()
    %256 = vector.shape_cast %255 : vector<2x16x32xf32> to vector<32x32xf32>
    %257 = arith.truncf %256 : vector<32x32xf32> to vector<32x32xbf16>
    %258 = vector.extract_strided_slice %203 {offsets = [32, 0], sizes = [32, 128], strides = [1, 1]} : vector<128x128xbf16> to vector<32x128xbf16>
    %cst_63 = arith.constant dense<0.000000e+00> : vector<32x128xf32>
    %259 = tpu.matmul %257, %258, %cst_63 {dimension_numbers = #tpu.dot_dimension_numbers<[1], [0], [0], [1], [0, 0, 1, 1], [], []>} : vector<32x32xbf16>, vector<32x128xbf16>, vector<32x128xf32> -> vector<32x128xf32>
    %260 = arith.addf %232, %259 : vector<32x128xf32>
    %261 = vector.extract_strided_slice %198 {offsets = [0, 64], sizes = [32, 32], strides = [1, 1]} : vector<32x128xf32> to vector<32x32xf32>
    %262 = arith.truncf %261 : vector<32x32xf32> to vector<32x32xbf16>
    %263 = vector.shape_cast %262 : vector<32x32xbf16> to vector<2x16x32xbf16>
    %264 = vector.extract_strided_slice %201 {offsets = [0, 64], sizes = [32, 32], strides = [1, 1]} : vector<32x128xf32> to vector<32x32xf32>
    %265 = arith.truncf %264 : vector<32x32xf32> to vector<32x32xbf16>
    %266 = vector.shape_cast %265 : vector<32x32xbf16> to vector<2x16x32xbf16>
    %267 = vector.extract_strided_slice %202 {offsets = [0, 64], sizes = [32, 32], strides = [1, 1]} : vector<32x128xf32> to vector<32x32xf32>
    %268 = arith.truncf %267 : vector<32x32xf32> to vector<32x32xbf16>
    %269 = vector.shape_cast %268 : vector<32x32xbf16> to vector<2x16x32xbf16>
    "tpu.trace_start"() <{level = 10 : i32, message = "bqd,bkd->bqk"}> : () -> ()
    %cst_64 = arith.constant dense<0.000000e+00> : vector<2x16x16xf32>
    %270 = tpu.matmul %263, %266, %cst_64 {dimension_numbers = #tpu.dot_dimension_numbers<[2], [2], [1], [1], [0, 0, 0, 1, 1, 1], [0], [0]>} : vector<2x16x32xbf16>, vector<2x16x32xbf16>, vector<2x16x16xf32> -> vector<2x16x16xf32>
    "tpu.trace_stop"() : () -> ()
    %271 = arith.addf %270, %10 : vector<2x16x16xf32>
    %cst_65 = arith.constant dense<0xFF800000> : vector<2x16xf32>
    %272 = vector.multi_reduction <maximumf>, %271, %cst_65 [2] : vector<2x16x16xf32> to vector<2x16xf32>
    %273 = vector.shape_cast %272 : vector<2x16xf32> to vector<2x16x1xf32>
    %274 = vector.broadcast %273 : vector<2x16x1xf32> to vector<2x16x16xf32>
    %275 = arith.subf %271, %274 : vector<2x16x16xf32>
    %276 = math.exp %275 : vector<2x16x16xf32>
    %cst_66 = arith.constant dense<0.000000e+00> : vector<2x16xf32>
    %277 = vector.multi_reduction <add>, %276, %cst_66 [2] : vector<2x16x16xf32> to vector<2x16xf32>
    %278 = vector.shape_cast %277 : vector<2x16xf32> to vector<2x16x1xf32>
    %279 = tpu.reciprocal %278 {approx = true} : vector<2x16x1xf32> -> vector<2x16x1xf32>
    %280 = vector.broadcast %279 : vector<2x16x1xf32> to vector<2x16x16xf32>
    %281 = arith.mulf %276, %280 : vector<2x16x16xf32>
    %282 = arith.truncf %281 : vector<2x16x16xf32> to vector<2x16x16xbf16>
    "tpu.trace_start"() <{level = 10 : i32, message = "bqk,bkd->bqd"}> : () -> ()
    %cst_67 = arith.constant dense<0.000000e+00> : vector<2x16x32xf32>
    %283 = tpu.matmul %282, %269, %cst_67 {dimension_numbers = #tpu.dot_dimension_numbers<[2], [1], [1], [2], [0, 0, 0, 1, 1, 2], [0], [0]>} : vector<2x16x16xbf16>, vector<2x16x32xbf16>, vector<2x16x32xf32> -> vector<2x16x32xf32>
    "tpu.trace_stop"() : () -> ()
    %284 = vector.shape_cast %283 : vector<2x16x32xf32> to vector<32x32xf32>
    %285 = arith.truncf %284 : vector<32x32xf32> to vector<32x32xbf16>
    %286 = vector.extract_strided_slice %203 {offsets = [64, 0], sizes = [32, 128], strides = [1, 1]} : vector<128x128xbf16> to vector<32x128xbf16>
    %cst_68 = arith.constant dense<0.000000e+00> : vector<32x128xf32>
    %287 = tpu.matmul %285, %286, %cst_68 {dimension_numbers = #tpu.dot_dimension_numbers<[1], [0], [0], [1], [0, 0, 1, 1], [], []>} : vector<32x32xbf16>, vector<32x128xbf16>, vector<32x128xf32> -> vector<32x128xf32>
    %288 = arith.addf %260, %287 : vector<32x128xf32>
    %289 = vector.extract_strided_slice %198 {offsets = [0, 96], sizes = [32, 32], strides = [1, 1]} : vector<32x128xf32> to vector<32x32xf32>
    %290 = arith.truncf %289 : vector<32x32xf32> to vector<32x32xbf16>
    %291 = vector.shape_cast %290 : vector<32x32xbf16> to vector<2x16x32xbf16>
    %292 = vector.extract_strided_slice %201 {offsets = [0, 96], sizes = [32, 32], strides = [1, 1]} : vector<32x128xf32> to vector<32x32xf32>
    %293 = arith.truncf %292 : vector<32x32xf32> to vector<32x32xbf16>
    %294 = vector.shape_cast %293 : vector<32x32xbf16> to vector<2x16x32xbf16>
    %295 = vector.extract_strided_slice %202 {offsets = [0, 96], sizes = [32, 32], strides = [1, 1]} : vector<32x128xf32> to vector<32x32xf32>
    %296 = arith.truncf %295 : vector<32x32xf32> to vector<32x32xbf16>
    %297 = vector.shape_cast %296 : vector<32x32xbf16> to vector<2x16x32xbf16>
    "tpu.trace_start"() <{level = 10 : i32, message = "bqd,bkd->bqk"}> : () -> ()
    %cst_69 = arith.constant dense<0.000000e+00> : vector<2x16x16xf32>
    %298 = tpu.matmul %291, %294, %cst_69 {dimension_numbers = #tpu.dot_dimension_numbers<[2], [2], [1], [1], [0, 0, 0, 1, 1, 1], [0], [0]>} : vector<2x16x32xbf16>, vector<2x16x32xbf16>, vector<2x16x16xf32> -> vector<2x16x16xf32>
    "tpu.trace_stop"() : () -> ()
    %299 = arith.addf %298, %10 : vector<2x16x16xf32>
    %cst_70 = arith.constant dense<0xFF800000> : vector<2x16xf32>
    %300 = vector.multi_reduction <maximumf>, %299, %cst_70 [2] : vector<2x16x16xf32> to vector<2x16xf32>
    %301 = vector.shape_cast %300 : vector<2x16xf32> to vector<2x16x1xf32>
    %302 = vector.broadcast %301 : vector<2x16x1xf32> to vector<2x16x16xf32>
    %303 = arith.subf %299, %302 : vector<2x16x16xf32>
    %304 = math.exp %303 : vector<2x16x16xf32>
    %cst_71 = arith.constant dense<0.000000e+00> : vector<2x16xf32>
    %305 = vector.multi_reduction <add>, %304, %cst_71 [2] : vector<2x16x16xf32> to vector<2x16xf32>
    %306 = vector.shape_cast %305 : vector<2x16xf32> to vector<2x16x1xf32>
    %307 = tpu.reciprocal %306 {approx = true} : vector<2x16x1xf32> -> vector<2x16x1xf32>
    %308 = vector.broadcast %307 : vector<2x16x1xf32> to vector<2x16x16xf32>
    %309 = arith.mulf %304, %308 : vector<2x16x16xf32>
    %310 = arith.truncf %309 : vector<2x16x16xf32> to vector<2x16x16xbf16>
    "tpu.trace_start"() <{level = 10 : i32, message = "bqk,bkd->bqd"}> : () -> ()
    %cst_72 = arith.constant dense<0.000000e+00> : vector<2x16x32xf32>
    %311 = tpu.matmul %310, %297, %cst_72 {dimension_numbers = #tpu.dot_dimension_numbers<[2], [1], [1], [2], [0, 0, 0, 1, 1, 2], [0], [0]>} : vector<2x16x16xbf16>, vector<2x16x32xbf16>, vector<2x16x32xf32> -> vector<2x16x32xf32>
    "tpu.trace_stop"() : () -> ()
    %312 = vector.shape_cast %311 : vector<2x16x32xf32> to vector<32x32xf32>
    %313 = arith.truncf %312 : vector<32x32xf32> to vector<32x32xbf16>
    %314 = vector.extract_strided_slice %203 {offsets = [96, 0], sizes = [32, 128], strides = [1, 1]} : vector<128x128xbf16> to vector<32x128xbf16>
    %cst_73 = arith.constant dense<0.000000e+00> : vector<32x128xf32>
    %315 = tpu.matmul %313, %314, %cst_73 {dimension_numbers = #tpu.dot_dimension_numbers<[1], [0], [0], [1], [0, 0, 1, 1], [], []>} : vector<32x32xbf16>, vector<32x128xbf16>, vector<32x128xf32> -> vector<32x128xf32>
    %316 = arith.addf %288, %315 : vector<32x128xf32>
    %317 = arith.addf %316, %165 : vector<32x128xf32>
    %cst_74 = arith.constant dense<0.000000e+00> : vector<32xf32>
    %318 = vector.multi_reduction <add>, %317, %cst_74 [1] : vector<32x128xf32> to vector<32xf32>
    %319 = vector.shape_cast %318 : vector<32xf32> to vector<32x1xf32>
    %cst_75 = arith.constant 1.280000e+02 : f32
    %320 = vector.broadcast %cst_75 : f32 to vector<32x1xf32>
    %321 = arith.divf %319, %320 : vector<32x1xf32>
    %322 = vector.broadcast %321 : vector<32x1xf32> to vector<32x128xf32>
    %323 = arith.subf %317, %322 : vector<32x128xf32>
    %324 = arith.mulf %323, %323 : vector<32x128xf32>
    %cst_76 = arith.constant dense<0.000000e+00> : vector<32xf32>
    %325 = vector.multi_reduction <add>, %324, %cst_76 [1] : vector<32x128xf32> to vector<32xf32>
    %326 = vector.shape_cast %325 : vector<32xf32> to vector<32x1xf32>
    %cst_77 = arith.constant 1.280000e+02 : f32
    %327 = vector.broadcast %cst_77 : f32 to vector<32x1xf32>
    %328 = arith.divf %326, %327 : vector<32x1xf32>
    %329 = vector.broadcast %321 : vector<32x1xf32> to vector<32x128xf32>
    %330 = arith.subf %317, %329 : vector<32x128xf32>
    %cst_78 = arith.constant 9.99999974E-6 : f32
    %331 = vector.broadcast %cst_78 : f32 to vector<32x1xf32>
    %332 = arith.addf %328, %331 : vector<32x1xf32>
    %333 = math.rsqrt %332 : vector<32x1xf32>
    %334 = vector.broadcast %333 : vector<32x1xf32> to vector<32x128xf32>
    %335 = arith.mulf %330, %334 : vector<32x128xf32>
    %336 = vector.extract_strided_slice %14 {offsets = [4, 0], sizes = [1, 128], strides = [1, 1]} : vector<6x128xf32> to vector<1x128xf32>
    %337 = vector.shape_cast %336 : vector<1x128xf32> to vector<128xf32>
    %338 = vector.shape_cast %337 : vector<128xf32> to vector<1x128xf32>
    %339 = vector.broadcast %338 : vector<1x128xf32> to vector<32x128xf32>
    %340 = arith.mulf %335, %339 : vector<32x128xf32>
    %341 = vector.extract_strided_slice %14 {offsets = [5, 0], sizes = [1, 128], strides = [1, 1]} : vector<6x128xf32> to vector<1x128xf32>
    %342 = vector.shape_cast %341 : vector<1x128xf32> to vector<128xf32>
    %343 = vector.shape_cast %342 : vector<128xf32> to vector<1x128xf32>
    %344 = vector.broadcast %343 : vector<1x128xf32> to vector<32x128xf32>
    %345 = arith.addf %340, %344 : vector<32x128xf32>
    %346 = arith.truncf %345 : vector<32x128xf32> to vector<32x128xbf16>
    %c0_79 = arith.constant 0 : index
    %c0_80 = arith.constant 0 : index
    %c0_81 = arith.constant 0 : index
    %347 = vector.load %arg8[%c0_79, %c0_80, %c0_81] : memref<1x128x256xbf16, #tpu.memory_space<vmem>>, vector<1x128x256xbf16>
    %348 = vector.shape_cast %347 : vector<1x128x256xbf16> to vector<128x256xbf16>
    %cst_82 = arith.constant dense<0.000000e+00> : vector<32x256xf32>
    %349 = tpu.matmul %346, %348, %cst_82 {dimension_numbers = #tpu.dot_dimension_numbers<[1], [0], [0], [1], [0, 0, 1, 1], [], []>} : vector<32x128xbf16>, vector<128x256xbf16>, vector<32x256xf32> -> vector<32x256xf32>
    %c0_83 = arith.constant 0 : index
    %c0_84 = arith.constant 0 : index
    %c0_85 = arith.constant 0 : index
    %350 = vector.load %arg9[%c0_83, %c0_84, %c0_85] : memref<1x1x256xf32, #tpu.memory_space<vmem>>, vector<1x1x256xf32>
    %351 = vector.shape_cast %350 : vector<1x1x256xf32> to vector<256xf32>
    %352 = vector.shape_cast %351 : vector<256xf32> to vector<1x256xf32>
    %353 = vector.broadcast %352 : vector<1x256xf32> to vector<32x256xf32>
    %354 = arith.addf %349, %353 : vector<32x256xf32>
    %355 = arith.truncf %354 : vector<32x256xf32> to vector<32x256xbf16>
    %c0_86 = arith.constant 0 : index
    %c0_87 = arith.constant 0 : index
    %c0_88 = arith.constant 0 : index
    %356 = vector.load %arg10[%c0_86, %c0_87, %c0_88] : memref<1x256x128xbf16, #tpu.memory_space<vmem>>, vector<1x256x128xbf16>
    %357 = vector.shape_cast %356 : vector<1x256x128xbf16> to vector<256x128xbf16>
    %cst_89 = arith.constant dense<0.000000e+00> : vector<32x128xf32>
    %358 = tpu.matmul %355, %357, %cst_89 {dimension_numbers = #tpu.dot_dimension_numbers<[1], [0], [0], [1], [0, 0, 1, 1], [], []>} : vector<32x256xbf16>, vector<256x128xbf16>, vector<32x128xf32> -> vector<32x128xf32>
    %c0_90 = arith.constant 0 : index
    %c0_91 = arith.constant 0 : index
    %c0_92 = arith.constant 0 : index
    %359 = vector.load %arg11[%c0_90, %c0_91, %c0_92] : memref<1x1x128xf32, #tpu.memory_space<vmem>>, vector<1x1x128xf32>
    %360 = vector.shape_cast %359 : vector<1x1x128xf32> to vector<128xf32>
    %361 = vector.shape_cast %360 : vector<128xf32> to vector<1x128xf32>
    %362 = vector.broadcast %361 : vector<1x128xf32> to vector<32x128xf32>
    %363 = arith.addf %358, %362 : vector<32x128xf32>
    %cst_93 = arith.constant 0.000000e+00 : f32
    %364 = vector.broadcast %cst_93 : f32 to vector<32x128xf32>
    %365 = arith.maximumf %363, %364 : vector<32x128xf32>
    %366 = arith.addf %365, %317 : vector<32x128xf32>
    %367 = vector.shape_cast %366 : vector<32x128xf32> to vector<2x16x128xf32>
    %c0_94 = arith.constant 0 : index
    %c0_95 = arith.constant 0 : index
    %c0_96 = arith.constant 0 : index
    %368 = vector.load %arg12[%c0_94, %c0_95, %c0_96] : memref<2x16x128xf32, #tpu.memory_space<vmem>>, vector<2x16x128xf32>
    tpu.vector_store %arg12[%c0_94, %c0_95, %c0_96], %367 {strides = array<i32>} : memref<2x16x128xf32, #tpu.memory_space<vmem>>, vector<2x16x128xf32>,
    return
  }
  func.func @transform_0(%arg0: i32, %arg1: i32) -> (i32, i32, i32) {
    %c0_i32 = arith.constant 0 : i32
    %c0_i32_0 = arith.constant 0 : i32
    %c0_i32_1 = arith.constant 0 : i32
    return %arg0, %c0_i32, %c0_i32_0 : i32, i32, i32
  }
  func.func @transform_1(%arg0: i32, %arg1: i32) -> (i32, i32, i32) {
    %c0_i32 = arith.constant 0 : i32
    %c0_i32_0 = arith.constant 0 : i32
    %c0_i32_1 = arith.constant 0 : i32
    return %arg0, %c0_i32, %c0_i32_0 : i32, i32, i32
  }
  func.func @transform_2(%arg0: i32, %arg1: i32) -> (i32, i32, i32) {
    %c0_i32 = arith.constant 0 : i32
    %c0_i32_0 = arith.constant 0 : i32
    %c0_i32_1 = arith.constant 0 : i32
    return %arg0, %c0_i32, %c0_i32_0 : i32, i32, i32
  }
  func.func @transform_3(%arg0: i32, %arg1: i32) -> (i32, i32, i32) {
    %c0_i32 = arith.constant 0 : i32
    %c0_i32_0 = arith.constant 0 : i32
    %c0_i32_1 = arith.constant 0 : i32
    return %arg0, %c0_i32, %c0_i32_0 : i32, i32, i32
  }
  func.func @transform_4(%arg0: i32, %arg1: i32) -> (i32, i32, i32) {
    %c0_i32 = arith.constant 0 : i32
    %c0_i32_0 = arith.constant 0 : i32
    %c0_i32_1 = arith.constant 0 : i32
    return %arg1, %c0_i32, %c0_i32_0 : i32, i32, i32
  }
  func.func @transform_5(%arg0: i32, %arg1: i32) -> (i32, i32, i32) {
    %c0_i32 = arith.constant 0 : i32
    %c0_i32_0 = arith.constant 0 : i32
    %c0_i32_1 = arith.constant 0 : i32
    return %arg1, %c0_i32, %c0_i32_0 : i32, i32, i32
  }
  func.func @transform_6(%arg0: i32, %arg1: i32) -> (i32, i32, i32) {
    %c0_i32 = arith.constant 0 : i32
    %c0_i32_0 = arith.constant 0 : i32
    %c0_i32_1 = arith.constant 0 : i32
    return %arg1, %c0_i32, %c0_i32_0 : i32, i32, i32
  }
  func.func @transform_7(%arg0: i32, %arg1: i32) -> (i32, i32, i32) {
    %c0_i32 = arith.constant 0 : i32
    %c0_i32_0 = arith.constant 0 : i32
    %c0_i32_1 = arith.constant 0 : i32
    return %arg1, %c0_i32, %c0_i32_0 : i32, i32, i32
  }
  func.func @transform_8(%arg0: i32, %arg1: i32) -> (i32, i32, i32) {
    %c0_i32 = arith.constant 0 : i32
    %c0_i32_0 = arith.constant 0 : i32
    %c0_i32_1 = arith.constant 0 : i32
    return %arg1, %c0_i32, %c0_i32_0 : i32, i32, i32
  }
  func.func @transform_9(%arg0: i32, %arg1: i32) -> (i32, i32, i32) {
    %c0_i32 = arith.constant 0 : i32
    %c0_i32_0 = arith.constant 0 : i32
    %c0_i32_1 = arith.constant 0 : i32
    return %arg1, %c0_i32, %c0_i32_0 : i32, i32, i32
  }
  func.func @transform_10(%arg0: i32, %arg1: i32) -> (i32, i32, i32) {
    %c0_i32 = arith.constant 0 : i32
    %c0_i32_0 = arith.constant 0 : i32
    %c0_i32_1 = arith.constant 0 : i32
    return %arg0, %c0_i32, %c0_i32_0 : i32, i32, i32
  }
}

</mosaic_0001>

<bundles_post_ra>
// kernel: tpu_custom_call.1
= control target key start
LH: loop header
LB: loop body
LE: loop exit
PB: predicated region body
PF: predicated region fallthrough
CT: control target
= control target key end

     0   :  { %s5522_s0 = inlined_call_operand.hbm [shape: f32[2,16,128], index: 0, kind: input, shape index: {}]   ;;  %s5523_s1 = inlined_call_operand.vmem [shape: bf16[2,16,128], index: 1, kind: input, shape index: {}]   ;;  %s5524_s2 = inlined_call_operand.hbm [shape: bf16[2,16,16], index: 2, kind: input, shape index: {}]   ;;  %s5525_s3 = inlined_call_operand.hbm [shape: bf16[2,16,16], index: 3, kind: input, shape index: {}]   ;;  %s5526_s4 = inlined_call_operand.hbm [shape: bf16[2,128,1024], index: 4, kind: input, shape index: {}]   ;;  %s5527_s5 = inlined_call_operand.vmem [shape: f32[2,6,128], index: 5, kind: input, shape index: {}]   ;;  %s5528_s6 = inlined_call_operand.hbm [shape: bf16[2,128,256], index: 6, kind: input, shape index: {}]   ;;  %s5529_s7 = inlined_call_operand.vmem [shape: f32[2,1,256], index: 7, kind: input, shape index: {}]   ;;  %s5530_s8 = inlined_call_operand.hbm [shape: bf16[2,256,128], index: 8, kind: input, shape index: {}]   ;;  %s5531_s9 = inlined_call_operand.vmem [shape: f32[2,1,128], index: 9, kind: input, shape index: {}]   ;;  %s5532_s10 = inlined_call_operand.hbm [shape: f32[2,16,128], index: 10, kind: output, shape index: {}]  }
   0x1   :  { %5541 = sst [smem:[#allocation23_spill]] %s5522_s0 }
   0x2   :  { %5542 = sst [smem:[#allocation24_spill]] %s5523_s1 }
   0x3   :  { %5543 = sst [smem:[#allocation25_spill]] %s5524_s2 }
   0x4   :  { %5544 = sst [smem:[#allocation26_spill]] %s5525_s3 }
   0x5   :  { %5545 = sst [smem:[#allocation27_spill]] %s5526_s4 }
   0x6   :  { %5546 = sst [smem:[#allocation28_spill]] %s5529_s7 }
   0x7   :  { %5547 = sst [smem:[#allocation29_spill]] %s5531_s9 }
   0x8   :  { %5548 = sst [smem:[#allocation30_spill]] %s5532_s10 }
   0x9   :  { %15 = vsyncpa [#allocation3], 0 }
   0xa   :  { %16 = vsyncpa [#allocation6], 0 }
   0xb   :  { %17 = vsyncpa [#allocation9], 0 }
   0xc   :  { %19 = vsyncpa [#allocation9 + $0x1], 0 }
   0xd   :  { %20 = vsyncpa [#allocation12], 0 }
   0xe   :  { %22 = vsyncpa [#allocation12 + $0x1], 0 }
   0xf   :  { %23 = vsyncpa [#allocation4], 0  ;;  %s4671_s13 = smov 0   ;;  %s4673_s14 = smov 0  }
  0x10   :  { %s4675_s15 = smov 0   ;;  %s4677_s16 = smov 0  }
  0x11   :  { %s4679_s17 = smov 0   ;;  %s4681_s18 = smov 0  }
  0x12 LB: > { %5549 = sst [smem:[#allocation19_spill]] %s4586_s15  ;;  %s4700_s19 = sadd.s32 4294967295, %s4598_s18   ;;  %s4598_s18 = sphi %s4681_s18, %s29_s18   ;;  %s4594_s17 = sphi %s4679_s17, %s5576_s17   ;;  %s4590_s16 = sphi %s4677_s16, %s5575_s16   ;;  %s4586_s15 = sphi %s4675_s15, %s5571_s15   ;;  %s4582_s14 = sphi %s4673_s14, %s5574_s14   ;;  %s4578_s13 = sphi %s4671_s13, %s5573_s13  }
  0x13   : > { %5550 = sst [smem:[#allocation20_spill]] %s4598_s18  ;;  %p165_p0 = scmp.ne.s32.totalorder %s4582_s14, %s4578_s13 }
  0x14   : > { %p166_p1 = scmp.eq.s32.totalorder %s4700_s19, 0  ;;  %p3460_p2 = scmp.ge.s32.totalorder %s4598_s18, 1 }
  0x15   : > { %p332_p3 = scmp.lt.s32.totalorder %s4598_s18, 3  ;;  %s5552_s2 = sld [smem:[#allocation25_spill]] }
  0x16   : > { %p4708_p4 = por %p166_p1, %p165_p0  ;;  %s4600_s25 = smov [#allocation5]  }
  0x17   : > { %p4715_p5 = pnand %p3460_p2, %p332_p3  ;;  %s377_s26 = sshll.u32 %s4600_s25, 4  ;;  %s378_s26 = int_to_ptr.vmem [resolvable:$true] %s377_s26 }
  0x18   : > { %s5533_s28 = smov 64   ;;  %s5535_s29 = smov 4  }
  0x19   : > { %p4070_p6 = pneg %p4715_p5  ;;  %s38_s30 = sadd.s32 1, %s4594_s17 }
  0x1a   : > { %p39_p8 = scmp.ge.s32.totalorder %s38_s30, 2  ;;  %s152_s11 = sadd.s32 1, %s4586_s15 }
  0x1b   : > { %s375_s23 = sshll.u32 %s5552_s2, 4  ;;  %p4723_p7 = pnand %p4070_p6, %p166_p1  ;;  %s376_s23 = int_to_ptr.hbm [resolvable:$true] %s375_s23 }
  0x1c   : > { %p159_p9 = scmp.ne.s32.totalorder %s4586_s15, %s4582_s14  ;;  %p160_p10 = scmp.eq.s32.totalorder %s4598_s18, 0 }
  0x1d   : > { %4076 = dma.hbm_to_vmem [thread:$0]  (!%p4723_p7), %s376_s23, 256, %s378_s26, [#allocation6], %s5533_s28, %s5533_s28, %s5535_s29  }
  0x1e   : > { %s5578_s30 = smov (%p39_p8, %s38_s30), 0  ;;  %p4739_p11 = por %p160_p10, %p159_p9 }
  0x1f   : > { %5555 = sst [smem:[#allocation21_spill]] %s5578_s30  ;;  %p4093_p12 = scmp.lt.s32.totalorder %s4598_s18, 2 }
  0x20   : > { %s149_s13 = ssub.s32 %s4594_s17, %s5578_s30  ;;  %s409_s21 = sand.u32 1, %s4598_s18  }
  0x21   : > { %p150_p13 = scmp.eq.s32.totalorder %s149_s13, 0  ;;  %s4748_s22 = sand.u32 1, %s4586_s15  }
  0x22   : > { %s3929_s23 = sshll.u32 %s4594_s17, 9  ;;  %s3466_s26 = sshll.u32 %s4748_s22, 9 }
  0x23   : > { %s4752_s25 = scalar_select %p150_p13, %s4586_s15, %s152_s11  }
  0x24   : > { %s5558_s4 = sld [smem:[#allocation27_spill]]  ;;  %s413_s1 = scalar_lea.vmem [#allocation8], %s3466_s26 }
  0x25   : > { %5557 = sst [smem:[#allocation22_spill]] %s4752_s25  ;;  %s421_s9 = sshll.u32 %s413_s1, 4  ;;  %s422_s9 = int_to_ptr.vmem [resolvable:$true] %s421_s9 }
  0x26   : > { %p4762_p0 = pnand %p4093_p12, %p4739_p11  ;;  %s4766_s11 = scalar_lea.sflag [#allocation9], %s409_s21 }
  0x27   : > { %s4603_s30 = smov 512   ;;  %s4604_s28 = smov 32  }
  0x28   : > { %s5560_s0 = sld [smem:[#allocation23_spill]]  ;;  %s4605_s12 = smov [#allocation2]  }
  0x29   : > { %s4606_s26 = smov 128   ;;  %s5561_s3 = sld [smem:[#allocation26_spill]] }
  0x2a   : > { %s418_s2 = scalar_lea.hbm %s5558_s4, %s3929_s23  ;;  %s349_s23 = sshll.u32 %s4605_s12, 4  ;;  %s350_s23 = int_to_ptr.vmem [resolvable:$true] %s349_s23 }
  0x2b   : > { %s419_s10 = sshll.u32 %s418_s2, 4  ;;  %s4607_s4 = smov 8   ;;  %s420_s10 = int_to_ptr.hbm [resolvable:$true] %s419_s10 }
  0x2c   : > { %4083 = dma.hbm_to_vmem [thread:$0]  (!%p4762_p0), %s420_s10, 8192, %s422_s9, %s4766_s11, %s4603_s30, %s4603_s30, %s4604_s28  }
  0x2d   : > { %s4608_s9 = smov [#allocation7]   ;;  %s3469_s30 = sshll.u32 %s4748_s22, 7 }
  0x2e   : > { %s347_s1 = sshll.u32 %s5560_s0, 4  ;;  %s395_s10 = sshll.u32 %s4608_s9, 4  ;;  %s348_s1 = int_to_ptr.hbm [resolvable:$true] %s347_s1  ;;  %s396_s10 = int_to_ptr.vmem [resolvable:$true] %s395_s10 }
  0x2f   : > { %4073 = dma.hbm_to_vmem [thread:$0]  (!%p4723_p7), %s348_s1, 512, %s350_s23, [#allocation3], %s4606_s26, %s4606_s26, %s4607_s4  }
  0x30   : > { %s393_s15 = sshll.u32 %s5561_s3, 4  ;;  %s5562_s28 = smov 4   ;;  %s394_s15 = int_to_ptr.hbm [resolvable:$true] %s393_s15 }
  0x31   : > { %s5563_s2 = smov 64   ;;  %s3930_s29 = sshll.u32 %s4594_s17, 7 }
  0x32   : > { %4079 = dma.hbm_to_vmem [thread:$0]  (!%p4723_p7), %s394_s15, 256, %s396_s10, [#allocation6], %s5563_s2, %s5563_s2, %s5562_s28  }
  0x33   : > { %s447_s1 = scalar_lea.hbm %s5528_s6, %s3930_s29  ;;  %s442_s23 = scalar_lea.vmem [#allocation10], %s3469_s30 }
  0x34   : > { %s450_s25 = sshll.u32 %s442_s23, 4  ;;  %s448_s21 = sshll.u32 %s447_s1, 4  ;;  %s451_s25 = int_to_ptr.vmem [resolvable:$true] %s450_s25  ;;  %s449_s21 = int_to_ptr.hbm [resolvable:$true] %s448_s21 }
  0x35   : > { %4086 = dma.hbm_to_vmem [thread:$0]  (!%p4762_p0), %s449_s21, 2048, %s451_s25, %s4766_s11, %s4606_s26, %s4606_s26, %s4607_s4  }
  0x36   : > { %s476_s3 = scalar_lea.hbm %s5530_s8, %s3930_s29  ;;  %s471_s7 = scalar_lea.vmem [#allocation11], %s3469_s30 }
  0x37   : > { %s477_s18 = sshll.u32 %s476_s3, 4  ;;  %s479_s15 = sshll.u32 %s471_s7, 4  ;;  %s478_s18 = int_to_ptr.hbm [resolvable:$true] %s477_s18  ;;  %s480_s15 = int_to_ptr.vmem [resolvable:$true] %s479_s15 }
  0x38   : > { %s468_s10 = scalar_lea.sflag [#allocation12], %s4748_s22  ;;  %497 = sbr.rel (%p4715_p5) target bundleno = 4712 (0x1268), region = 60 }
  0x39   : > { %4089 = dma.hbm_to_vmem [thread:$0]  (!%p4762_p0), %s478_s18, 2048, %s480_s15, %s468_s10, %s5563_s2, %s5563_s2, %s5562_s28  }
  0x3d   : > { %4557 = dma.done.wait (%p166_p1), [#allocation3], 512  }
  0x3e   : > { %4559 = vsyncadd (%p166_p1), [#allocation3], 4294966784 }
  0x3f   : > { %4561 = dma.done.wait (%p166_p1), [#allocation6], 512  }
  0x40   : > { %4563 = vsyncadd (%p166_p1), [#allocation6], 4294966784  ;;  %s514_s0 = sand.u32 1, %s4700_s19   ;;  %s516_s3 = sand.u32 1, %s4582_s14  }
  0x41   : > { %s3479_s4 = sshll.u32 %s516_s3, 9  ;;  %s515_s7 = scalar_lea.sflag [#allocation9], %s514_s0 }
  0x42   : > { %s4813_s18 = scalar_lea.vmem [#allocation8], %s3479_s4 }
  0x43   : > { %4565 = dma.done.wait (%p4708_p4), %s515_s7, 10240  }
  0x44   : > { %4567 = vsyncadd (%p4708_p4), %s515_s7, 4294957056  ;;  %s3480_s24 = sshll.u32 %s516_s3, 7  ;;  %s535_s13 = scalar_lea.sflag [#allocation12], %s516_s3 }
  0x45   : > { %s4819_s22 = scalar_lea.vmem [#allocation10], %s3480_s24  ;;  %s4821_s11 = scalar_lea.vmem [#allocation11], %s3480_s24 }
  0x46   : > { %4569 = dma.done.wait (%p4708_p4), %s535_s13, 2048  }
  0x47   : > { %4571 = vsyncadd (%p4708_p4), %s535_s13, 4294965248  ;;  %p608_p1 = scmp.lt.s32.totalorder %s4590_s16, 1  ;;  %s5564_s25 = sld [smem:[#allocation28_spill]] }
  0x48   : > { %s5565_s27 = sld [smem:[#allocation29_spill]]  ;;  %p3484_p2 = scmp.ne.s32.totalorder %s4590_s16, 0 }
  0x49   : > { %s4829_s26 = scalar_select %p608_p1, %s4590_s16, 1 }
  0x4a   : > { %624 = sbr.rel (%p3484_p2) target bundleno = 84 (0x54), region = 88 }
  0x4b   : > { %s3482_s30 = sshll.u32 %s4829_s26, 3  ;;  %s3483_s28 = sshll.u32 %s4829_s26, 1 }
  0x4c   : > { %s4836_s12 = scalar_lea.vmem %s5527_s5, %s3482_s30 }
  0x4d   : > { %s4841_s20 = scalar_lea.vmem %s5564_s25, %s3483_s28 }
  0x4e   : > { %s618_s15 = scalar_lea.vmem %s5565_s27, %s4829_s26 }
  0x4f   : > { %v625_v0 = vld [vmem:[#allocation2] sm:$0xff]  ;;  %v626_v1 = vld [vmem:[#allocation2 + $0x8] sm:$0xff]  ;;  %v627_v2 = vld [vmem:[#allocation2 + $0x10] sm:$0xff] }
  0x50   : > { %629 = vst [vmem:[#allocation13] sm:$0xff] %v625_v0  ;;  %v628_v3 = vld [vmem:[#allocation2 + $0x18] sm:$0xff] }
  0x51   : > { %630 = vst [vmem:[#allocation13 + $0x8] sm:$0xff] %v626_v1 }
  0x52   : > { %631 = vst [vmem:[#allocation13 + $0x10] sm:$0xff] %v627_v2 }
  0x53   : > { %632 = vst [vmem:[#allocation13 + $0x18] sm:$0xff] %v628_v3 }
  0x54 PF: > { %v4609_v8 = vmov 128.0   ;;  %v3571_v31 = vld [vmem:[%s4813_s18 + $0x1c0] sm:$0xf]  ;;  %v3990_v33 = vld [vmem:[%s4813_s18 + $0x1c4] sm:$0xf]  ;;  %vm1032_vm13 = vcmask 261120  }
  0x55   : > { %4164 = vrcp.f32 %v4609_v8  ;;  %v3994_v32 = vld [vmem:[%s4813_s18 + $0x1dc] sm:$0xf0]  ;;  %v3573_v35 = vld [vmem:[%s4813_s18 + $0x1e0] sm:$0xf0]  ;;  %v3579_v36 = vld [vmem:[%s4813_s18 + $0x1c8] sm:$0xf] }
  0x56   : > { %v3572_v34 = vor.u32 %v3994_v32, %v3571_v31  ;;  %v3995_v37 = vld [vmem:[%s4813_s18 + $0x1e4] sm:$0xf0]  ;;  %v3576_v38 = vor.u32 %v3990_v33, %v3573_v35  ;;  %v3559_v40 = vld [vmem:[%s4813_s18 + $0x180] sm:$0xf]  ;;  %v3982_v42 = vld [vmem:[%s4813_s18 + $0x184] sm:$0xf] }
  0x57   : > { %v633_v4 = vld [vmem:[#allocation13] sm:$0xff]  ;;  %v3580_v39 = vor.u32 %v3995_v37, %v3579_v36  ;;  %v3567_v45 = vld [vmem:[%s4813_s18 + $0x188] sm:$0xf]  ;;  %s4610_s16 = smov 96   ;;  %vm1083_vm14 = vcmask 130048   ;;  %s4611_s10 = smov 64  }
  0x58   : > { %722 = vadd.xlane.f32.xlu0 %v633_v4  ;;  %v634_v6 = vld [vmem:[#allocation13 + $0x8] sm:$0xff]  ;;  %949 = vmatpush.bf16.msra.mxu0 %v3572_v34  ;;  %v3986_v41 = vld [vmem:[%s4813_s18 + $0x19c] sm:$0xf0]  ;;  %v3561_v44 = vld [vmem:[%s4813_s18 + $0x1a0] sm:$0xf0]  ;;  %s4612_s0 = smov 32  }
  0x59   : > { %v635_v5 = vld [vmem:[#allocation13 + $0x10] sm:$0xff]  ;;  %968 = vmatpush.bf16.msra.mxu1 %v3576_v38  ;;  %987 = vmatpush.bf16.msra.mxu2 %v3580_v39  ;;  %v3560_v43 = vor.u32 %v3986_v41, %v3559_v40  ;;  %v3987_v46 = vld [vmem:[%s4813_s18 + $0x1a4] sm:$0xf0]  ;;  %v3564_v47 = vor.u32 %v3982_v42, %v3561_v44  ;;  %v3547_v49 = vld [vmem:[%s4813_s18 + $0x140] sm:$0xf]  ;;  %s5566_s7 = sld [smem:[#allocation24_spill]] }
  0x5a   : > { %726 = vadd.xlane.f32.xlu2 %v635_v5  ;;  %v636_v7 = vld [vmem:[#allocation13 + $0x18] sm:$0xff]  ;;  %v3568_v48 = vor.u32 %v3987_v46, %v3567_v45  ;;  %v3978_v50 = vld [vmem:[%s4813_s18 + $0x15c] sm:$0xf0]  ;;  %v3974_v51 = vld [vmem:[%s4813_s18 + $0x144] sm:$0xf]  ;;  %s4613_s26 = smov [#allocation13]  }
  0x5b   : > { %v4165_v9 = vpop.eup %4164  ;;  %v3548_v52 = vor.u32 %v3978_v50, %v3547_v49  ;;  %v3549_v53 = vld [vmem:[%s4813_s18 + $0x160] sm:$0xf0]  ;;  %v3555_v54 = vld [vmem:[%s4813_s18 + $0x148] sm:$0xf]  ;;  %v3535_v58 = vld [vmem:[%s4813_s18 + $0x100] sm:$0xf] }
  0x5c   : > { %v731_v10 = vmul.f32 128.0, %v4165_v9  ;;  %vm735_vm0 = vweird.f32 %v4165_v9  ;;  %950 = vmatpush.bf16.msra.mxu0 %v3560_v43  ;;  %v3979_v55 = vld [vmem:[%s4813_s18 + $0x164] sm:$0xf0]  ;;  %v3552_v56 = vor.u32 %v3974_v51, %v3549_v53  ;;  %v3970_v59 = vld [vmem:[%s4813_s18 + $0x11c] sm:$0xf0]  ;;  %s3264_s30 = sshll.u32 %s4613_s26, 4  ;;  %s3265_s30 = int_to_ptr.vmem [resolvable:$true] %s3264_s30 }
  0x5d   : > { %969 = vmatpush.bf16.msra.mxu1 %v3564_v47  ;;  %988 = vmatpush.bf16.msra.mxu2 %v3568_v48  ;;  %v3556_v57 = vor.u32 %v3979_v55, %v3555_v54  ;;  %v3966_v60 = vld [vmem:[%s4813_s18 + $0x104] sm:$0xf]  ;;  %v3536_v61 = vor.u32 %v3970_v59, %v3535_v58  ;;  %v3543_v63 = vld [vmem:[%s4813_s18 + $0x108] sm:$0xf]  ;;  %v3523_v3 = vld [vmem:[%s4813_s18 + $0xc0] sm:$0xf] }
  0x5e   : > { %v732_v11 = vsub.f32 1.0, %v731_v10  ;;  %v3537_v62 = vld [vmem:[%s4813_s18 + $0x120] sm:$0xf0]  ;;  %v3971_v0 = vld [vmem:[%s4813_s18 + $0x124] sm:$0xf0]  ;;  %s5568_s29 = sld [smem:[#allocation30_spill]] }
  0x5f   : > { %v3540_v1 = vor.u32 %v3966_v60, %v3537_v62  ;;  %v3544_v2 = vor.u32 %v3971_v0, %v3543_v63  ;;  %v3531_v8 = vld [vmem:[%s4813_s18 + $0xc8] sm:$0xf]  ;;  %v3487_v39 = vld [vmem:[%s4813_s18] sm:$0xf]  ;;  %v3934_v41 = vld [vmem:[%s4813_s18 + $0x4] sm:$0xf] }
  0x60   : > { %724 = vadd.xlane.f32.xlu0 %v634_v6  ;;  %v733_v12 = vmul.f32 %v4165_v9, %v732_v11  ;;  %951 = vmatpush.bf16.msra.mxu0 %v3548_v52  ;;  %v3507_v31 = vld [vmem:[%s4813_s18 + $0x48] sm:$0xf]  ;;  %v3938_v40 = vld [vmem:[%s4813_s18 + $0x1c] sm:$0xf0]  ;;  %v3489_v43 = vld [vmem:[%s4813_s18 + $0x20] sm:$0xf0] }
  0x61   : > { %970 = vmatpush.bf16.msra.mxu1 %v3552_v56  ;;  %989 = vmatpush.bf16.msra.mxu2 %v3556_v57  ;;  %v3947_v32 = vld [vmem:[%s4813_s18 + $0x64] sm:$0xf0]  ;;  %v3488_v42 = vor.u32 %v3938_v40, %v3487_v39  ;;  %v3492_v48 = vor.u32 %v3934_v41, %v3489_v43  ;;  %p4097_p3 = scmp.eq.s32.totalorder %s4700_s19, 1  ;;  %s4614_s1 = smov 128  }
  0x62   : > { %728 = vadd.xlane.f32.xlu2 %v636_v7  ;;  %v734_v13 = vadd.f32 %v4165_v9, %v733_v12  ;;  %v3511_v12 = vld [vmem:[%s4813_s18 + $0x80] sm:$0xf]  ;;  %v3508_v34 = vor.u32 %v3947_v32, %v3507_v31  ;;  %v3495_v44 = vld [vmem:[%s4813_s18 + $0x8] sm:$0xf]  ;;  %s4615_s23 = smov 8  }
  0x63   : > { %v3939_v45 = vld [vmem:[%s4813_s18 + $0x24] sm:$0xf0] }
  0x64   : > { %v4848_v14 = vsel %vm735_vm0, %v4165_v9, %v734_v13  ;;  %952 = vmatpush.bf16.msra.mxu0 %v3536_v61  ;;  %v3963_v9 = vld [vmem:[%s4813_s18 + $0xe4] sm:$0xf0]  ;;  %v3954_v13 = vld [vmem:[%s4813_s18 + $0x9c] sm:$0xf0]  ;;  %v3496_v49 = vor.u32 %v3939_v45, %v3495_v44 }
  0x65   : > { %971 = vmatpush.bf16.msra.mxu1 %v3540_v1  ;;  %990 = vmatpush.bf16.msra.mxu2 %v3544_v2  ;;  %v3532_v11 = vor.u32 %v3963_v9, %v3531_v8 }
  0x69   : > { %991 = vmatpush.bf16.msra.mxu2 %v3532_v11 }
  0xcb   : > { %v723_v15 = vpop.xlane.xlu0 %722 }
  0xcc   : > { %v737_v17 = vmul.f32 %v4848_v14, %v723_v15  ;;  %v3950_v15 = vld [vmem:[%s4813_s18 + $0x84] sm:$0xf] }
  0xcd   : > { %v727_v16 = vpop.xlane.xlu2 %726 }
  0xce   : > { %v739_v18 = vmul.f32 %v4848_v14, %v727_v16  ;;  %v4852_v19 = vsub.f32 %v633_v4, %v737_v17  ;;  %v3962_v4 = vld [vmem:[%s4813_s18 + $0xdc] sm:$0xf0]  ;;  %v3512_v16 = vor.u32 %v3954_v13, %v3511_v12  ;;  %v3513_v17 = vld [vmem:[%s4813_s18 + $0xa0] sm:$0xf0] }
  0xd0   : > { %v4854_v20 = vsub.f32 %v635_v5, %v739_v18  ;;  %v745_v21 = vmul.f32 %v4852_v19, %v4852_v19  ;;  %v3958_v5 = vld [vmem:[%s4813_s18 + $0xc4] sm:$0xf]  ;;  %v3519_v18 = vld [vmem:[%s4813_s18 + $0x88] sm:$0xf] }
  0xd2   : > { %v747_v22 = vmul.f32 %v4854_v20, %v4854_v20  ;;  %749 = vadd.xlane.f32.xlu1 %v745_v21  ;;  %v3955_v21 = vld [vmem:[%s4813_s18 + $0xa4] sm:$0xf0] }
  0xd3   : > { %v725_v23 = vpop.xlane.xlu0 %724 }
  0xd4   : > { %753 = vadd.xlane.f32.xlu0 %v747_v22  ;;  %v738_v25 = vmul.f32 %v4848_v14, %v725_v23  ;;  %v3516_v22 = vor.u32 %v3950_v15, %v3513_v17  ;;  %v3520_v23 = vor.u32 %v3955_v21, %v3519_v18 }
  0xd5   : > { %v729_v24 = vpop.xlane.xlu2 %728 }
  0xd6   : > { %v4861_v26 = vsub.f32 %v634_v6, %v738_v25  ;;  %v740_v27 = vmul.f32 %v4848_v14, %v729_v24  ;;  %v3524_v6 = vor.u32 %v3962_v4, %v3523_v3  ;;  %992 = vmatpush.bf16.msra.mxu2 %v3520_v23  ;;  %v3499_v24 = vld [vmem:[%s4813_s18 + $0x40] sm:$0xf] }
  0xd7   : > { %v3946_v25 = vld [vmem:[%s4813_s18 + $0x5c] sm:$0xf0] }
  0xd8   : > { %v746_v28 = vmul.f32 %v4861_v26, %v4861_v26  ;;  %v4866_v29 = vsub.f32 %v636_v7, %v740_v27  ;;  %v3525_v7 = vld [vmem:[%s4813_s18 + $0xe0] sm:$0xf0]  ;;  %953 = vmatpush.bf16.msra.mxu0 %v3524_v6 }
  0xd9   : > { %v3528_v10 = vor.u32 %v3958_v5, %v3525_v7  ;;  %v3942_v27 = vld [vmem:[%s4813_s18 + $0x44] sm:$0xf] }
  0xda   : > { %751 = vadd.xlane.f32.xlu1 %v746_v28  ;;  %v748_v30 = vmul.f32 %v4866_v29, %v4866_v29  ;;  %v3500_v28 = vor.u32 %v3946_v25, %v3499_v24  ;;  %993 = vmatpush.bf16.msra.mxu2 %v3508_v34  ;;  %v721_v7 = vld [vmem:[%s4836_s12] sm:$0x3f] }
  0xdb   : > { %972 = vmatpush.bf16.msra.mxu1 %v3528_v10  ;;  %v809_v11 = vperm.slane %v721_v7, 0 }
  0xdc   : > { %954 = vmatpush.bf16.msra.mxu0 %v3512_v16 }
  0xde   : > { %994 = vmatpush.bf16.msra.mxu2 %v3496_v49 }
  0xdf   : > { %973 = vmatpush.bf16.msra.mxu1 %v3516_v22  ;;  %v814_v22 = vperm.slane %v721_v7, 1 }
  0xe0   : > { %955 = vmatpush.bf16.msra.mxu0 %v3500_v28 }
  0xe2   : > { %755 = vadd.xlane.f32.xlu1 %v748_v30  ;;  %v3501_v30 = vld [vmem:[%s4813_s18 + $0x60] sm:$0xf0] }
  0xe3   : > { %v3504_v33 = vor.u32 %v3942_v27, %v3501_v30 }
  0xe4   : > { %956 = vmatpush.bf16.msra.mxu0 %v3488_v42 }
  0xe5   : > { %974 = vmatpush.bf16.msra.mxu1 %v3504_v33 }
  0xe9   : > { %975 = vmatpush.bf16.msra.mxu1 %v3492_v48 }
 0x145   : > { %v750_v35 = vpop.xlane.xlu1 %749 }
 0x146   : > { %v757_v37 = vmul.f32 %v750_v35, %v4848_v14 }
 0x147   : > { %v754_v36 = vpop.xlane.xlu0 %753 }
 0x148   : > { %v759_v38 = vmul.f32 %v754_v36, %v4848_v14  ;;  %v761_v46 = vadd.f32 1e-05, %v757_v37 }
 0x14a   : > { %v763_v47 = vadd.f32 1e-05, %v759_v38  ;;  %4166 = vrsqrt.f32 %v761_v46  ;;  %vm771_vm2 = vweird.f32 %v761_v46 }
 0x14c   : > { %4168 = vrsqrt.f32 %v763_v47  ;;  %vm791_vm7 = vweird.f32 %v763_v47 }
 0x14d   : > { %v752_v50 = vpop.xlane.xlu1 %751 }
 0x14e   : > { %v758_v51 = vmul.f32 %v752_v50, %v4848_v14 }
 0x150   : > { %v4167_v52 = vpop.eup %4166  ;;  %v762_v53 = vadd.f32 1e-05, %v758_v51 }
 0x151   : > { %v766_v54 = vmul.f32 %v4167_v52, %v761_v46  ;;  %vm772_vm1 = vweird.f32 %v4167_v52 }
 0x152   : > { %v4169_v55 = vpop.eup %4168  ;;  %4170 = vrsqrt.f32 %v762_v53  ;;  %vm773_vm3 = vmor %vm771_vm2, %vm772_vm1  ;;  %vm781_vm5 = vweird.f32 %v762_v53 }
 0x153   : > { %v767_v56 = vmul.f32 %v4167_v52, %v766_v54  ;;  %v786_v59 = vmul.f32 %v4169_v55, %v763_v47  ;;  %vm792_vm8 = vweird.f32 %v4169_v55 }
 0x154   : > { %vm793_vm11 = vmor %vm791_vm7, %vm792_vm8 }
 0x155   : > { %v768_v57 = vmul.f32 0.5, %v767_v56  ;;  %v756_v58 = vpop.xlane.xlu1 %755  ;;  %v787_v2 = vmul.f32 %v4169_v55, %v786_v59 }
 0x156   : > { %v760_v60 = vmul.f32 %v756_v58, %v4848_v14 }
 0x157   : > { %v769_v61 = vsub.f32 1.5, %v768_v57  ;;  %v788_v6 = vmul.f32 0.5, %v787_v2 }
 0x158   : > { %v4171_v62 = vpop.eup %4170  ;;  %v764_v63 = vadd.f32 1e-05, %v760_v60 }
 0x159   : > { %v770_v0 = vmul.f32 %v4167_v52, %v769_v61  ;;  %v776_v1 = vmul.f32 %v4171_v62, %v762_v53  ;;  %vm782_vm4 = vweird.f32 %v4171_v62  ;;  %v789_v15 = vsub.f32 1.5, %v788_v6 }
 0x15a   : > { %4172 = vrsqrt.f32 %v764_v63  ;;  %vm783_vm6 = vmor %vm781_vm5, %vm782_vm4  ;;  %vm801_vm9 = vweird.f32 %v764_v63 }
 0x15b   : > { %v777_v3 = vmul.f32 %v4171_v62, %v776_v1  ;;  %v774_v4 = vsel %vm773_vm3, %v4167_v52, %v770_v0  ;;  %v790_v24 = vmul.f32 %v4169_v55, %v789_v15 }
 0x15c   : > { %v805_v10 = vmul.f32 %v774_v4, %v4852_v19 }
 0x15d   : > { %v778_v5 = vmul.f32 0.5, %v777_v3  ;;  %v794_v31 = vsel %vm793_vm11, %v4169_v55, %v790_v24 }
 0x15e   : > { %v810_v21 = vmul.f32 %v809_v11, %v805_v10 }
 0x15f   : > { %v779_v8 = vsub.f32 1.5, %v778_v5 }
 0x160   : > { %v4173_v9 = vpop.eup %4172  ;;  %v815_v27 = vadd.f32 %v814_v22, %v810_v21 }
 0x161   : > { %v780_v12 = vmul.f32 %v4171_v62, %v779_v8  ;;  %v796_v13 = vmul.f32 %v4173_v9, %v764_v63  ;;  %vm802_vm10 = vweird.f32 %v4173_v9 }
 0x162   : > { %vm803_vm12 = vmor %vm801_vm9, %vm802_vm10 }
 0x163   : > { %v784_v16 = vsel %vm783_vm6, %v4171_v62, %v780_v12  ;;  %v797_v17 = vmul.f32 %v4173_v9, %v796_v13 }
 0x164   : > { %v806_v18 = vmul.f32 %v784_v16, %v4861_v26  ;;  %v807_v26 = vmul.f32 %v794_v31, %v4854_v20 }
 0x165   : > { %v798_v23 = vmul.f32 0.5, %v797_v17 }
 0x166   : > { %v811_v19 = vmul.f32 %v809_v11, %v806_v18  ;;  %v812_v35 = vmul.f32 %v809_v11, %v807_v26 }
 0x167   : > { %v799_v25 = vsub.f32 1.5, %v798_v23 }
 0x168   : > { %v816_v28 = vadd.f32 %v814_v22, %v811_v19  ;;  %v817_v37 = vadd.f32 %v814_v22, %v812_v35 }
 0x169   : > { %v800_v30 = vmul.f32 %v4173_v9, %v799_v25 }
 0x16a   : > { %v819_v32 = vpack.c.bf16 %v816_v28, %v815_v27  ;;  %v4031_v28 = vld [vmem:[#allocation5] sm:$0xff]  }
 0x16b   : > { %v804_v33 = vsel %vm803_vm12, %v4173_v9, %v800_v30  ;;  %v4957_v30 = vunpack.c.l.bf16 %v4031_v28 }
 0x16c   : > { %v808_v34 = vmul.f32 %v804_v33, %v4866_v29  ;;  %957 = vmatmul.bf16.vlgmr.msra.gmra.mxu0 %v819_v32  ;;  %976 = vmatmul.bf16.vlgmr.msra.gmra.mxu1 %v819_v32 }
 0x16d   : > { %995 = vmatmul.bf16.vlgmr.msra.gmra.mxu2 %v819_v32 }
 0x16e   : > { %v813_v36 = vmul.f32 %v809_v11, %v808_v34  ;;  %v4961_v34 = vunpack.c.h.bf16 %v4031_v28 }
 0x170   : > { %v818_v38 = vadd.f32 %v814_v22, %v813_v36 }
 0x172   : > { %v820_v39 = vpack.c.bf16 %v818_v38, %v817_v37 }
 0x17c   : > { %981 = vmatmul.bf16.gmra.mxu1 %v820_v39  ;;  %962 = vmatmul.bf16.gmra.mxu0 %v820_v39 }
 0x17d   : > { %1000 = vmatmul.bf16.gmra.mxu2 %v820_v39 }
 0x1e9   : > { %v958_v40 = vpop.f32.mrf.mxu0  ;;  %v977_v41 = vpop.f32.mrf.mxu1 }
 0x1ea   : > { %v1006_v42 = vmul.f32 0.17677669, %v958_v40  ;;  %v1014_v43 = vpack.c.bf16 %v977_v41, %v977_v41 }
 0x1ec   : > { %v1010_v46 = vpack.c.bf16 %v1006_v42, %v1006_v42  ;;  %v1029_v48 = vunpack.c.l.b16 %v1014_v43 }
 0x1ee   : > { %v1024_v51 = vunpack.c.l.b16 %v1010_v46 }
 0x1f0   : > { %v996_v44 = vpop.f32.mrf.mxu2 }
 0x1f1   : > { %v960_v45 = vpop.f32.mrf.mxu0  ;;  %v979_v29 = vpop.f32.mrf.mxu1  ;;  %v1018_v2 = vpack.c.bf16 %v996_v44, %v996_v44 }
 0x1f2   : > { %v1007_v20 = vmul.f32 0.17677669, %v960_v45  ;;  %v1015_v47 = vpack.c.bf16 %v979_v29, %v979_v29 }
 0x1f3   : > { %v1139_v11 = vunpack.c.l.b16 %v1018_v2 }
 0x1f4   : > { %v1011_v49 = vpack.c.bf16 %v1007_v20, %v1007_v20  ;;  %v1030_v50 = vunpack.c.l.b16 %v1015_v47 }
 0x1f6   : > { %v1025_v52 = vunpack.c.l.b16 %v1011_v49  ;;  %v4927_v53 = vpack.c.b16 %v1030_v50, %v1029_v48  ;;  %v4046_v49 = vld [vmem:[#allocation5 + $0x8] sm:$0xff]  }
 0x1f8   : > { %v4929_v54 = vpack.c.b16 %v1025_v52, %v1024_v51  ;;  %v998_v55 = vpop.f32.mrf.mxu2  ;;  %1192 = vrot.lane.b32.xlu2 %v4927_v53, %s4610_s16  ;;  %v1037_v56 = vsel %vm1032_vm13, %v4927_v53, 0  ;;  %v4977_v51 = vunpack.c.l.bf16 %v4046_v49  ;;  %v4979_v52 = vunpack.c.h.bf16 %v4046_v49  ;;  %v3959_v49 = vld [vmem:[%s4813_s18 + $0xcc] sm:$0xf] }
 0x1f9   : > { %v982_v57 = vpop.f32.mrf.mxu1  ;;  %1046 = vmatpush.bf16.xpose.msra.mxu3 %v1037_v56  ;;  %v963_v58 = vpop.f32.mrf.mxu0  ;;  %v1019_v61 = vpack.c.bf16 %v998_v55, %v998_v55 }
 0x1fa   : > { %1190 = vrot.lane.b32.xlu0 %v4929_v54, %s4610_s16  ;;  %v1008_v59 = vmul.f32 0.17677669, %v963_v58  ;;  %v1016_v60 = vpack.c.bf16 %v982_v57, %v982_v57 }
 0x1fb   : > { %v1140_v6 = vunpack.c.l.b16 %v1019_v61 }
 0x1fc   : > { %v1012_v62 = vpack.c.bf16 %v1008_v59, %v1008_v59  ;;  %v1060_v3 = vunpack.c.l.b16 %v1016_v60 }
 0x1fd   : > { %v4941_v15 = vpack.c.b16 %v1140_v6, %v1139_v11 }
 0x1fe   : > { %v1055_v8 = vunpack.c.l.b16 %v1012_v62 }
 0x200   : > { %3581 = vmatmul.msk.bf16.vlgmr.msra.gmra.mxu3 %vm1032_vm13, %v4929_v54  ;;  %v1001_v63 = vpop.f32.mrf.mxu2 }
 0x201   : > { %v984_v0 = vpop.f32.mrf.mxu1  ;;  %v965_v1 = vpop.f32.mrf.mxu0  ;;  %v1020_v10 = vpack.c.bf16 %v1001_v63, %v1001_v63 }
 0x202   : > { %v1017_v4 = vpack.c.bf16 %v984_v0, %v984_v0  ;;  %v1009_v5 = vmul.f32 0.17677669, %v965_v1 }
 0x203   : > { %v1167_v21 = vunpack.c.l.b16 %v1020_v10 }
 0x204   : > { %v1061_v7 = vunpack.c.l.b16 %v1017_v4  ;;  %v1013_v9 = vpack.c.bf16 %v1009_v5, %v1009_v5 }
 0x206   : > { %v4939_v12 = vpack.c.b16 %v1061_v7, %v1060_v3  ;;  %v1056_v13 = vunpack.c.l.b16 %v1013_v9 }
 0x208   : > { %v1067_v16 = vsel %vm1032_vm13, %v4939_v12, 0  ;;  %v4945_v17 = vpack.c.b16 %v1056_v13, %v1055_v8  ;;  %v1003_v18 = vpop.f32.mrf.mxu2 }
 0x209   : > { %1076 = vmatpush.bf16.xpose.msrb.mxu3 %v1067_v16  ;;  %v1021_v22 = vpack.c.bf16 %v1003_v18, %v1003_v18 }
 0x20a   : > { %1214 = vrot.lane.b32.xlu2 %v4945_v17, %s4610_s16 }
 0x20b   : > { %v1168_v23 = vunpack.c.l.b16 %v1021_v22 }
 0x20d   : > { %v4950_v24 = vpack.c.b16 %v1168_v23, %v1167_v21 }
 0x210   : > { %3582 = vmatmul.msk.bf16.vlgmr.msrb.gmra.mxu3 %vm1032_vm13, %v4945_v17 }
 0x211   : > { %1153 = vmatpush.bf16.msra.mxu3 %v4941_v15 }
 0x215   : > { %1181 = vmatpush.bf16.msrb.mxu3 %v4950_v24 }
 0x252   : > { %v1193_v19 = vpop.permute.xlu2 %1192 }
 0x253   : > { %v1198_v25 = vsel %vm1032_vm13, %v1193_v19, 0 }
 0x254   : > { %1207 = vmatpush.bf16.xpose.msrb.mxu0 %v1198_v25 }
 0x264   : > { %v1215_v0 = vpop.permute.xlu2 %1214 }
 0x26c   : > { %v1191_v27 = vpop.permute.xlu0 %1190 }
 0x26d   : > { %3585 = vmatmul.msk.bf16.vlgmr.msrb.gmra.mxu0 %vm1032_vm13, %v1191_v27 }
 0x283   : > { %v1048_v37 = vpop.f32.mrf.mxu3 }
 0x284   : > { %v1049_v48 = vadd.f32 %v4957_v30, %v1048_v37 }
 0x286   : > { %v1084_v55 = vsel %vm1083_vm14, %v1049_v48, -inf }
 0x28b   : > { %v1050_v38 = vpop.f32.mrf.mxu3 }
 0x28c   : > { %v1051_v39 = vadd.f32 %v4961_v34, %v1050_v38 }
 0x28e   : > { %v1087_v40 = vsel %vm1083_vm14, %v1051_v39, -inf }
 0x293   : > { %v1078_v46 = vpop.f32.mrf.mxu3 }
 0x294   : > { %v1079_v58 = vadd.f32 %v4977_v51, %v1078_v46 }
 0x296   : > { %v1090_v61 = vsel %vm1083_vm14, %v1079_v58, -inf }
 0x29b   : > { %v1080_v57 = vpop.f32.mrf.mxu3 }
 0x29c   : > { %v1081_v59 = vadd.f32 %v4979_v52, %v1080_v57  ;;  %v3951_v57 = vld [vmem:[%s4813_s18 + $0x8c] sm:$0xf] }
 0x29e   : > { %v1093_v60 = vsel %vm1083_vm14, %v1081_v59, -inf }
 0x2ea   : > { %v1209_v31 = vpop.f32.mrf.mxu0 }
 0x2eb   : > { %v1210_v32 = vadd.f32 %v4957_v30, %v1209_v31 }
 0x2ed   : > { %v1238_v33 = vsel %vm1083_vm14, %v1210_v32, -inf }
 0x2ee   : > { %1239 = vmax.xlane.f32.xlu1 %v1238_v33 }
 0x2f2   : > { %v1211_v26 = vpop.f32.mrf.mxu0 }
 0x2f3   : > { %v1212_v35 = vadd.f32 %v4961_v34, %v1211_v26 }
 0x2f5   : > { %v1241_v36 = vsel %vm1083_vm14, %v1212_v35, -inf }
 0x2f6   : > { %1242 = vmax.xlane.f32.xlu1 %v1241_v36 }
 0x30f   : > { %1216 = vrot.lane.b32.xlu1 %v4939_v12, %s4610_s16 }
 0x317   : > { %1291 = vrot.lane.b32.xlu1 %v4941_v15, %s4610_s16 }
 0x31f   : > { %1406 = vrot.lane.b32.xlu1 %v4927_v53, %s4611_s10 }
 0x327   : > { %1404 = vrot.lane.b32.xlu1 %v4929_v54, %s4611_s10 }
 0x351   : > { %1088 = vmax.xlane.f32.xlu1 %v1087_v40 }
 0x361   : > { %v1240_v41 = vpop.xlane.xlu1 %1239 }
 0x362   : > { %v1250_v42 = vsub.f32 %v1210_v32, %v1240_v41 }
 0x364   : > { %v1254_v43 = vmul.f32 1.442695, %v1250_v42 }
 0x366   : > { %4174 = vpow2.f32 %v1254_v43 }
 0x369   : > { %v1243_v44 = vpop.xlane.xlu1 %1242 }
 0x36a   : > { %v1251_v45 = vsub.f32 %v1212_v35, %v1243_v44 }
 0x36c   : > { %v4175_v29 = vpop.eup %4174  ;;  %v1256_v20 = vmul.f32 1.442695, %v1251_v45 }
 0x36d   : > { %v1262_v47 = vsel %vm1083_vm14, %v4175_v29, 0.0 }
 0x36e   : > { %4176 = vpow2.f32 %v1256_v20  ;;  %1263 = vadd.xlane.f32.xlu0 %v1262_v47 }
 0x374   : > { %v4177_v50 = vpop.eup %4176 }
 0x375   : > { %v1265_v56 = vsel %vm1083_vm14, %v4177_v50, 0.0 }
 0x376   : > { %1085 = vmax.xlane.f32.xlu0 %v1084_v55  ;;  %1266 = vadd.xlane.f32.xlu2 %v1265_v56 }
 0x37e   : > { %1094 = vmax.xlane.f32.xlu0 %v1093_v60  ;;  %1091 = vmax.xlane.f32.xlu2 %v1090_v61 }
 0x381   : > { %v1217_v62 = vpop.permute.xlu1 %1216 }
 0x382   : > { %v1222_v63 = vsel %vm1032_vm13, %v1217_v62, 0 }
 0x383   : > { %1231 = vmatpush.bf16.xpose.msrb.mxu1 %v1222_v63 }
 0x389   : > { %v1292_v1 = vpop.permute.xlu1 %1291 }
 0x38a   : > { %3586 = vmatmul.msk.bf16.vlgmr.msrb.gmra.mxu1 %vm1032_vm13, %v1215_v0  ;;  %1304 = vmatpush.bf16.msrb.mxu2 %v1292_v1 }
 0x391   : > { %v1407_v2 = vpop.permute.xlu1 %1406 }
 0x392   : > { %v1412_v3 = vsel %vm1032_vm13, %v1407_v2, 0 }
 0x393   : > { %1421 = vmatpush.bf16.xpose.msra.mxu2 %v1412_v3 }
 0x399   : > { %v1405_v4 = vpop.permute.xlu1 %1404 }
 0x3c4   : > { %v1089_v5 = vpop.xlane.xlu1 %1088 }
 0x3c5   : > { %v1097_v6 = vsub.f32 %v1051_v39, %v1089_v5 }
 0x3c7   : > { %v1102_v7 = vmul.f32 1.442695, %v1097_v6 }
 0x3c9   : > { %4178 = vpow2.f32 %v1102_v7 }
 0x3cf   : > { %v4179_v8 = vpop.eup %4178 }
 0x3d0   : > { %v1111_v9 = vsel %vm1083_vm14, %v4179_v8, 0.0 }
 0x3d1   : > { %1112 = vadd.xlane.f32.xlu0 %v1111_v9 }
 0x3e1   : > { %v1264_v10 = vpop.xlane.xlu0 %1263 }
 0x3e2   : > { %4180 = vrcp.f32 %v1264_v10 }
 0x3e8   : > { %v4181_v16 = vpop.eup %4180 }
 0x3e9   : > { %v1086_v11 = vpop.xlane.xlu0 %1085  ;;  %v1267_v13 = vpop.xlane.xlu2 %1266  ;;  %v1278_v22 = vmul.f32 %v4181_v16, %v4175_v29 }
 0x3ea   : > { %v1096_v18 = vsub.f32 %v1049_v48, %v1086_v11  ;;  %4182 = vrcp.f32 %v1267_v13 }
 0x3eb   : > { %v1282_v19 = vpack.c.bf16 %v1278_v22, %v1278_v22 }
 0x3ec   : > { %v1100_v21 = vmul.f32 1.442695, %v1096_v18 }
 0x3ed   : > { %v1288_v37 = vunpack.c.l.b16 %v1282_v19 }
 0x3ee   : > { %4184 = vpow2.f32 %v1100_v21 }
 0x3f0   : > { %v4183_v23 = vpop.eup %4182 }
 0x3f1   : > { %v1279_v25 = vmul.f32 %v4183_v23, %v4177_v50  ;;  %v1095_v27 = vpop.xlane.xlu0 %1094  ;;  %v1092_v28 = vpop.xlane.xlu2 %1091  ;;  %v3593_v50 = vld [vmem:[%s4813_s18 + $0xe8] sm:$0xf0] }
 0x3f2   : > { %v1099_v31 = vsub.f32 %v1081_v59, %v1095_v27  ;;  %v1098_v32 = vsub.f32 %v1079_v58, %v1092_v28  ;;  %v3596_v55 = vor.u32 %v3959_v49, %v3593_v50  ;;  %v3589_v58 = vld [vmem:[%s4813_s18 + $0xa8] sm:$0xf0] }
 0x3f3   : > { %v1283_v33 = vpack.c.bf16 %v1279_v25, %v1279_v25  ;;  %v3592_v59 = vor.u32 %v3951_v57, %v3589_v58 }
 0x3f4   : > { %v4185_v26 = vpop.eup %4184  ;;  %v1106_v35 = vmul.f32 1.442695, %v1099_v31  ;;  %v1104_v36 = vmul.f32 1.442695, %v1098_v32  ;;  %1358 = vmatpush.bf16.msra.mxu0 %v3596_v55 }
 0x3f5   : > { %v1289_v38 = vunpack.c.l.b16 %v1283_v33  ;;  %v1108_v39 = vsel %vm1083_vm14, %v4185_v26, 0.0 }
 0x3f6   : > { %4186 = vpow2.f32 %v1106_v35  ;;  %1109 = vadd.xlane.f32.xlu2 %v1108_v39 }
 0x3f7   : > { %4188 = vpow2.f32 %v1104_v36  ;;  %v1290_v40 = vpack.c.b16 %v1289_v38, %v1288_v37 }
 0x3f8   : > { %1359 = vmatpush.bf16.msra.mxu0 %v3592_v59 }
 0x3f9   : > { %3587 = vmatmul.msk.bf16.vlgmr.msrb.gmra.mxu2 %vm1083_vm14, %v1290_v40 }
 0x3fc   : > { %v4187_v41 = vpop.eup %4186 }
 0x3fd   : > { %v4189_v42 = vpop.eup %4188  ;;  %v1117_v43 = vsel %vm1083_vm14, %v4187_v41, 0.0 }
 0x3fe   : > { %v1114_v44 = vsel %vm1083_vm14, %v4189_v42, 0.0  ;;  %1118 = vadd.xlane.f32.xlu0 %v1117_v43 }
 0x3ff   : > { %1115 = vadd.xlane.f32.xlu2 %v1114_v44 }
 0x407   : > { %v1233_v45 = vpop.f32.mrf.mxu1 }
 0x408   : > { %v1234_v29 = vadd.f32 %v4977_v51, %v1233_v45  ;;  %v3943_v45 = vld [vmem:[%s4813_s18 + $0x4c] sm:$0xf] }
 0x409   : > { %3609 = vmatmul.msk.bf16.vlgmr.msra.gmra.mxu2 %vm1032_vm13, %v1405_v4 }
 0x40a   : > { %v1244_v46 = vsel %vm1083_vm14, %v1234_v29, -inf }
 0x40b   : > { %1245 = vmax.xlane.f32.xlu2 %v1244_v46 }
 0x40f   : > { %v1235_v20 = vpop.f32.mrf.mxu1 }
 0x410   : > { %v1236_v47 = vadd.f32 %v4979_v52, %v1235_v20  ;;  %v3935_v20 = vld [vmem:[%s4813_s18 + $0xc] sm:$0xf] }
 0x412   : > { %v1247_v48 = vsel %vm1083_vm14, %v1236_v47, -inf }
 0x413   : > { %1248 = vmax.xlane.f32.xlu0 %v1247_v48 }
 0x444   : > { %v1113_v56 = vpop.xlane.xlu0 %1112 }
 0x445   : > { %4190 = vrcp.f32 %v1113_v56 }
 0x44b   : > { %v4191_v61 = vpop.eup %4190 }
 0x44c   : > { %v1125_v62 = vmul.f32 %v4191_v61, %v4179_v8 }
 0x44e   : > { %v1129_v0 = vpack.c.bf16 %v1125_v62, %v1125_v62 }
 0x450   : > { %v1135_v5 = vunpack.c.l.b16 %v1129_v0 }
 0x469   : > { %v1110_v60 = vpop.xlane.xlu2 %1109 }
 0x46a   : > { %4192 = vrcp.f32 %v1110_v60 }
 0x470   : > { %v4193_v63 = vpop.eup %4192 }
 0x471   : > { %v1124_v1 = vmul.f32 %v4193_v63, %v4185_v26  ;;  %v1119_v2 = vpop.xlane.xlu0 %1118 }
 0x472   : > { %v1116_v3 = vpop.xlane.xlu2 %1115  ;;  %4194 = vrcp.f32 %v1119_v2 }
 0x473   : > { %v1128_v4 = vpack.c.bf16 %v1124_v1, %v1124_v1  ;;  %4196 = vrcp.f32 %v1116_v3 }
 0x475   : > { %v1134_v6 = vunpack.c.l.b16 %v1128_v4 }
 0x477   : > { %v1136_v7 = vpack.c.b16 %v1135_v5, %v1134_v6 }
 0x478   : > { %v4195_v9 = vpop.eup %4194 }
 0x479   : > { %v4197_v10 = vpop.eup %4196  ;;  %3583 = vmatmul.msk.bf16.vlgmr.msra.gmra.mxu3 %vm1083_vm14, %v1136_v7  ;;  %v1127_v13 = vmul.f32 %v4195_v9, %v4187_v41 }
 0x47a   : > { %v1126_v11 = vmul.f32 %v4197_v10, %v4189_v42 }
 0x47b   : > { %v1131_v21 = vpack.c.bf16 %v1127_v13, %v1127_v13 }
 0x47c   : > { %v1306_v16 = vpop.f32.mrf.mxu2  ;;  %v1130_v8 = vpack.c.bf16 %v1126_v11, %v1126_v11 }
 0x47d   : > { %v1163_v25 = vunpack.c.l.b16 %v1131_v21 }
 0x47e   : > { %v1246_v18 = vpop.xlane.xlu2 %1245  ;;  %v1162_v19 = vunpack.c.l.b16 %v1130_v8 }
 0x47f   : > { %v1252_v22 = vsub.f32 %v1234_v29, %v1246_v18  ;;  %v3603_v29 = vld [vmem:[%s4813_s18 + $0x68] sm:$0xf0] }
 0x480   : > { %v1164_v32 = vpack.c.b16 %v1163_v25, %v1162_v19  ;;  %v3606_v46 = vor.u32 %v3943_v45, %v3603_v29 }
 0x481   : > { %v1258_v23 = vmul.f32 1.442695, %v1252_v22 }
 0x482   : > { %1391 = vmatpush.bf16.msra.mxu1 %v3606_v46 }
 0x483   : > { %4198 = vpow2.f32 %v1258_v23 }
 0x484   : > { %v1308_v27 = vpop.f32.mrf.mxu2 }
 0x485   : > { %v1336_v28 = vpack.c.bf16 %v1308_v27, %v1306_v16 }
 0x486   : > { %v1249_v31 = vpop.xlane.xlu0 %1248 }
 0x487   : > { %v1253_v33 = vsub.f32 %v1236_v47, %v1249_v31  ;;  %3597 = vmatmul.msk.bf16.vlgmr.msra.gmra.mxu0 %vm1032_vm13, %v1336_v28  ;;  %v3599_v47 = vld [vmem:[%s4813_s18 + $0x28] sm:$0xf0] }
 0x488   : > { %v3602_v48 = vor.u32 %v3935_v20, %v3599_v47 }
 0x489   : > { %v4199_v26 = vpop.eup %4198  ;;  %v1260_v35 = vmul.f32 1.442695, %v1253_v33  ;;  %3584 = vmatmul.msk.bf16.vlgmr.msrb.gmra.mxu3 %vm1083_vm14, %v1164_v32 }
 0x48a   : > { %v1268_v36 = vsel %vm1083_vm14, %v4199_v26, 0.0  ;;  %1392 = vmatpush.bf16.msra.mxu1 %v3602_v48 }
 0x48b   : > { %4200 = vpow2.f32 %v1260_v35  ;;  %1269 = vadd.xlane.f32.xlu2 %v1268_v36 }
 0x48c   : > { %v1423_v37 = vpop.f32.mrf.mxu2 }
 0x48d   : > { %v1424_v38 = vadd.f32 %v4957_v30, %v1423_v37 }
 0x48f   : > { %v1452_v40 = vsel %vm1083_vm14, %v1424_v38, -inf }
 0x491   : > { %v4201_v39 = vpop.eup %4200 }
 0x492   : > { %v1271_v41 = vsel %vm1083_vm14, %v4201_v39, 0.0 }
 0x493   : > { %1453 = vmax.xlane.f32.xlu2 %v1452_v40  ;;  %1272 = vadd.xlane.f32.xlu1 %v1271_v41 }
 0x494   : > { %v1425_v42 = vpop.f32.mrf.mxu2 }
 0x495   : > { %v1426_v43 = vadd.f32 %v4961_v34, %v1425_v42 }
 0x497   : > { %v1455_v44 = vsel %vm1083_vm14, %v1426_v43, -inf }
 0x498   : > { %1456 = vmax.xlane.f32.xlu0 %v1455_v44 }
 0x4ab   : > { %1430 = vrot.lane.b32.xlu2 %v4939_v12, %s4611_s10 }
 0x4ac   : > { %1316 = vrot.lane.b32.xlu0 %v4950_v24, %s4610_s16  ;;  %1428 = vrot.lane.b32.xlu1 %v4945_v17, %s4611_s10 }
 0x4b4   : > { %1591 = vrot.lane.b32.xlu1 %v4927_v53, %s4612_s0 }
 0x4bc   : > { %1589 = vrot.lane.b32.xlu1 %v4929_v54, %s4612_s0 }
 0x4c4   : > { %1505 = vrot.lane.b32.xlu1 %v4941_v15, %s4611_s10 }
 0x4cc   : > { %1615 = vrot.lane.b32.xlu1 %v4939_v12, %s4612_s0 }
 0x4fc   : > { %v1155_v49 = vpop.f32.mrf.mxu3 }
 0x4fe   : > { %v1270_v50 = vpop.xlane.xlu2 %1269 }
 0x504   : > { %v1157_v53 = vpop.f32.mrf.mxu3 }
 0x505   : > { %v1188_v55 = vpack.c.bf16 %v1157_v53, %v1155_v49 }
 0x506   : > { %v1454_v56 = vpop.xlane.xlu2 %1453  ;;  %v1273_v57 = vpop.xlane.xlu1 %1272 }
 0x507   : > { %v1464_v54 = vsub.f32 %v1424_v38, %v1454_v56  ;;  %3607 = vmatmul.msk.bf16.vlgmr.msra.gmra.mxu1 %vm1032_vm13, %v1188_v55  ;;  %4202 = vrcp.f32 %v1273_v57 }
 0x509   : > { %v1468_v58 = vmul.f32 1.442695, %v1464_v54 }
 0x50b   : > { %4204 = vpow2.f32 %v1468_v58  ;;  %v1457_v12 = vpop.xlane.xlu0 %1456 }
 0x50c   : > { %v1465_v59 = vsub.f32 %v1426_v43, %v1457_v12  ;;  %v1183_v60 = vpop.f32.mrf.mxu3  ;;  %4206 = vrcp.f32 %v1270_v50 }
 0x50d   : > { %v4203_v62 = vpop.eup %4202 }
 0x50e   : > { %v1470_v61 = vmul.f32 1.442695, %v1465_v59  ;;  %v1281_v2 = vmul.f32 %v4203_v62, %v4201_v39  ;;  %v1431_v13 = vpop.permute.xlu2 %1430 }
 0x50f   : > { %v1436_v21 = vsel %vm1032_vm13, %v1431_v13, 0 }
 0x510   : > { %4208 = vpow2.f32 %v1470_v61  ;;  %v1285_v9 = vpack.c.bf16 %v1281_v2, %v1281_v2  ;;  %v3617_v61 = vld [vmem:[%s4813_s18 + $0x168] sm:$0xf0] }
 0x511   : > { %v4205_v63 = vpop.eup %4204 }
 0x512   : > { %v1476_v0 = vsel %vm1083_vm14, %v4205_v63, 0.0  ;;  %v4207_v1 = vpop.eup %4206  ;;  %v1314_v11 = vunpack.c.l.b16 %v1285_v9 }
 0x513   : > { %1477 = vadd.xlane.f32.xlu0 %v1476_v0  ;;  %v1280_v6 = vmul.f32 %v4207_v1, %v4199_v26  ;;  %v3613_v0 = vld [vmem:[%s4813_s18 + $0x128] sm:$0xf0] }
 0x514   : > { %v1185_v3 = vpop.f32.mrf.mxu3 }
 0x515   : > { %v1189_v4 = vpack.c.bf16 %v1185_v3, %v1183_v60  ;;  %v1284_v10 = vpack.c.bf16 %v1280_v6, %v1280_v6  ;;  %v3975_v60 = vld [vmem:[%s4813_s18 + $0x14c] sm:$0xf] }
 0x516   : > { %v4209_v5 = vpop.eup %4208  ;;  %v3620_v62 = vor.u32 %v3975_v60, %v3617_v61 }
 0x517   : > { %3608 = vmatmul.msk.bf16.gmra.mxu1 %vm1032_vm13, %v1189_v4  ;;  %v1479_v7 = vsel %vm1083_vm14, %v4209_v5, 0.0  ;;  %v1313_v16 = vunpack.c.l.b16 %v1284_v10 }
 0x518   : > { %1480 = vadd.xlane.f32.xlu2 %v1479_v7  ;;  %1572 = vmatpush.bf16.msrb.mxu0 %v3620_v62 }
 0x519   : > { %v1315_v22 = vpack.c.b16 %v1314_v11, %v1313_v16 }
 0x51e   : > { %v1429_v18 = vpop.permute.xlu1 %1428  ;;  %v1317_v8 = vpop.permute.xlu0 %1316 }
 0x51f   : > { %1329 = vmatpush.bf16.msra.mxu3 %v1317_v8 }
 0x522   : > { %3588 = vmatmul.msk.bf16.vlgmr.msra.gmra.mxu3 %vm1083_vm14, %v1315_v22 }
 0x523   : > { %1445 = vmatpush.bf16.xpose.msrb.mxu3 %v1436_v21 }
 0x526   : > { %v1592_v23 = vpop.permute.xlu1 %1591 }
 0x527   : > { %v1597_v19 = vsel %vm1032_vm13, %v1592_v23, 0  ;;  %1613 = vrot.lane.b32.xlu0 %v4945_v17, %s4612_s0 }
 0x528   : > { %1606 = vmatpush.bf16.xpose.msrb.mxu1 %v1597_v19 }
 0x52e   : > { %v1590_v25 = vpop.permute.xlu1 %1589 }
 0x52f   : > { %3623 = vmatmul.msk.bf16.vlgmr.msrb.gmra.mxu1 %vm1032_vm13, %v1590_v25 }
 0x532   : > { %3610 = vmatmul.msk.bf16.vlgmr.msrb.gmra.mxu3 %vm1032_vm13, %v1429_v18 }
 0x536   : > { %v1506_v27 = vpop.permute.xlu1 %1505 }
 0x537   : > { %1518 = vmatpush.bf16.msrb.mxu2 %v1506_v27 }
 0x53e   : > { %v1616_v28 = vpop.permute.xlu1 %1615 }
 0x53f   : > { %v1621_v31 = vsel %vm1032_vm13, %v1616_v28, 0 }
 0x540   : > { %1630 = vmatpush.bf16.xpose.msra.mxu2 %v1621_v31 }
 0x584   : > { %v5043_v32 = vpop.f32.mrf.mxu1 }
 0x586   : > { %v1478_v33 = vpop.xlane.xlu0 %1477 }
 0x587   : > { %4210 = vrcp.f32 %v1478_v33 }
 0x58b   : > { %v1481_v26 = vpop.xlane.xlu2 %1480 }
 0x58c   : > { %4212 = vrcp.f32 %v1481_v26  ;;  %v5045_v36 = vpop.f32.mrf.mxu1 }
 0x58d   : > { %v4211_v35 = vpop.eup %4210 }
 0x58e   : > { %v1492_v17 = vmul.f32 %v4211_v35, %v4205_v63  ;;  %v3967_v63 = vld [vmem:[%s4813_s18 + $0x10c] sm:$0xf] }
 0x58f   : > { %v3616_v1 = vor.u32 %v3967_v63, %v3613_v0 }
 0x590   : > { %v1496_v38 = vpack.c.bf16 %v1492_v17, %v1492_v17 }
 0x591   : > { %1573 = vmatpush.bf16.msrb.mxu0 %v3616_v1 }
 0x592   : > { %v4213_v37 = vpop.eup %4212  ;;  %v1502_v41 = vunpack.c.l.b16 %v1496_v38 }
 0x593   : > { %v1493_v39 = vmul.f32 %v4213_v37, %v4209_v5 }
 0x594   : > { %v5047_v44 = vpop.f32.mrf.mxu1 }
 0x595   : > { %v1497_v40 = vpack.c.bf16 %v1493_v39, %v1493_v39 }
 0x597   : > { %v1503_v42 = vunpack.c.l.b16 %v1497_v40 }
 0x599   : > { %v1504_v43 = vpack.c.b16 %v1503_v42, %v1502_v41  ;;  %v1614_v46 = vpop.permute.xlu0 %1613 }
 0x59b   : > { %3611 = vmatmul.msk.bf16.vlgmr.msrb.gmra.mxu2 %vm1083_vm14, %v1504_v43 }
 0x59c   : > { %v5050_v45 = vpop.f32.mrf.mxu1 }
 0x5a5   : > { %v1331_v29 = vpop.f32.mrf.mxu3 }
 0x5ab   : > { %3624 = vmatmul.msk.bf16.vlgmr.msra.gmra.mxu2 %vm1032_vm13, %v1614_v46 }
 0x5ac   : > { %v1608_v20 = vpop.f32.mrf.mxu1 }
 0x5ad   : > { %v1333_v47 = vpop.f32.mrf.mxu3 }
 0x5ae   : > { %v1337_v48 = vpack.c.bf16 %v1333_v47, %v1331_v29 }
 0x5b0   : > { %3598 = vmatmul.msk.bf16.gmra.mxu0 %vm1032_vm13, %v1337_v48 }
 0x5b4   : > { %v1610_v49 = vpop.f32.mrf.mxu1 }
 0x5b5   : > { %v1611_v50 = vadd.f32 %v4961_v34, %v1610_v49  ;;  %v1447_v53 = vpop.f32.mrf.mxu3  ;;  %v1609_v34 = vadd.f32 %v4957_v30, %v1608_v20 }
 0x5b6   : > { %v1448_v55 = vadd.f32 %v4977_v51, %v1447_v53 }
 0x5b7   : > { %v1640_v56 = vsel %vm1083_vm14, %v1611_v50, -inf  ;;  %v1637_v59 = vsel %vm1083_vm14, %v1609_v34, -inf }
 0x5b8   : > { %1641 = vmax.xlane.f32.xlu0 %v1640_v56  ;;  %v1458_v54 = vsel %vm1083_vm14, %v1448_v55, -inf }
 0x5b9   : > { %1459 = vmax.xlane.f32.xlu1 %v1458_v54 }
 0x5bd   : > { %v1449_v57 = vpop.f32.mrf.mxu3 }
 0x5be   : > { %v1450_v58 = vadd.f32 %v4979_v52, %v1449_v57 }
 0x5c0   : > { %v1461_v12 = vsel %vm1083_vm14, %v1450_v58, -inf }
 0x5c1   : > { %1462 = vmax.xlane.f32.xlu2 %v1461_v12 }
 0x5c9   : > { %1638 = vmax.xlane.f32.xlu2 %v1637_v59 }
 0x5cc   : > { %1690 = vrot.lane.b32.xlu0 %v4941_v15, %s4612_s0 }
 0x61e   : > { %v1520_v2 = vpop.f32.mrf.mxu2 }
 0x626   : > { %v1522_v3 = vpop.f32.mrf.mxu2 }
 0x627   : > { %v1550_v4 = vpack.c.bf16 %v1522_v3, %v1520_v2 }
 0x629   : > { %3621 = vmatmul.msk.bf16.vlgmr.msrb.gmra.mxu0 %vm1032_vm13, %v1550_v4 }
 0x62b   : > { %v1642_v16 = vpop.xlane.xlu0 %1641 }
 0x62c   : > { %v1460_v30 = vpop.xlane.xlu1 %1459  ;;  %v1650_v23 = vsub.f32 %v1611_v50, %v1642_v16  ;;  %v3627_v16 = vld [vmem:[%s4813_s18 + $0x1a8] sm:$0xf0] }
 0x62d   : > { %v1466_v5 = vsub.f32 %v1448_v55, %v1460_v30 }
 0x62e   : > { %v1632_v10 = vpop.f32.mrf.mxu2  ;;  %v1655_v31 = vmul.f32 1.442695, %v1650_v23 }
 0x62f   : > { %v1472_v6 = vmul.f32 1.442695, %v1466_v5  ;;  %v1633_v18 = vadd.f32 %v4977_v51, %v1632_v10 }
 0x631   : > { %4214 = vpow2.f32 %v1472_v6  ;;  %v1643_v27 = vsel %vm1083_vm14, %v1633_v18, -inf }
 0x634   : > { %v1463_v7 = vpop.xlane.xlu2 %1462 }
 0x635   : > { %v1467_v9 = vsub.f32 %v1450_v58, %v1463_v7  ;;  %v3991_v7 = vld [vmem:[%s4813_s18 + $0x1cc] sm:$0xf] }
 0x636   : > { %v1634_v28 = vpop.f32.mrf.mxu2 }
 0x637   : > { %v4215_v15 = vpop.eup %4214  ;;  %v1474_v11 = vmul.f32 1.442695, %v1467_v9  ;;  %v1635_v33 = vadd.f32 %v4979_v52, %v1634_v28  ;;  %v3631_v9 = vld [vmem:[%s4813_s18 + $0x1e8] sm:$0xf0] }
 0x638   : > { %v1482_v13 = vsel %vm1083_vm14, %v4215_v15, 0.0  ;;  %v3634_v10 = vor.u32 %v3991_v7, %v3631_v9 }
 0x639   : > { %4216 = vpow2.f32 %v1474_v11  ;;  %1483 = vadd.xlane.f32.xlu2 %v1482_v13  ;;  %v1646_v35 = vsel %vm1083_vm14, %v1635_v33, -inf  ;;  %v3983_v13 = vld [vmem:[%s4813_s18 + $0x18c] sm:$0xf] }
 0x63a   : > { %1757 = vmatpush.bf16.msrb.mxu2 %v3634_v10  ;;  %v3992_v10 = vld [vmem:[%s4813_s18 + $0x1d4] sm:$0xf] }
 0x63c   : > { %v1639_v8 = vpop.xlane.xlu2 %1638 }
 0x63d   : > { %v1649_v21 = vsub.f32 %v1609_v34, %v1639_v8 }
 0x63e   : > { %v1691_v34 = vpop.permute.xlu0 %1690 }
 0x63f   : > { %v4217_v22 = vpop.eup %4216  ;;  %v1653_v19 = vmul.f32 1.442695, %v1649_v21 }
 0x640   : > { %v1485_v25 = vsel %vm1083_vm14, %v4217_v22, 0.0 }
 0x641   : > { %4218 = vpow2.f32 %v1653_v19  ;;  %1486 = vadd.xlane.f32.xlu1 %v1485_v25  ;;  %1644 = vmax.xlane.f32.xlu2 %v1643_v27 }
 0x642   : > { %4220 = vpow2.f32 %v1655_v31 }
 0x647   : > { %v4219_v26 = vpop.eup %4218 }
 0x648   : > { %v1661_v51 = vsel %vm1083_vm14, %v4219_v26, 0.0  ;;  %v4221_v17 = vpop.eup %4220 }
 0x649   : > { %1662 = vadd.xlane.f32.xlu1 %v1661_v51  ;;  %1647 = vmax.xlane.f32.xlu2 %v1646_v35  ;;  %v1664_v37 = vsel %vm1083_vm14, %v4221_v17, 0.0 }
 0x651   : > { %1665 = vadd.xlane.f32.xlu1 %v1664_v37  ;;  %v1361_v37 = vpop.f32.mrf.mxu0 }
 0x661   : > { %1530 = vrot.lane.b32.xlu2 %v4950_v24, %s4611_s10 }
 0x6ac   : > { %v1484_v38 = vpop.xlane.xlu2 %1483 }
 0x6ad   : > { %4222 = vrcp.f32 %v1484_v38  ;;  %v1363_v38 = vpop.f32.mrf.mxu0 }
 0x6b3   : > { %v4223_v42 = vpop.eup %4222 }
 0x6b4   : > { %v1487_v39 = vpop.xlane.xlu1 %1486  ;;  %v1645_v40 = vpop.xlane.xlu2 %1644  ;;  %v1494_v29 = vmul.f32 %v4223_v42, %v4215_v15 }
 0x6b5   : > { %4224 = vrcp.f32 %v1487_v39  ;;  %v1651_v52 = vsub.f32 %v1633_v18, %v1645_v40  ;;  %v3630_v18 = vor.u32 %v3983_v13, %v3627_v16  ;;  %v1366_v40 = vpop.f32.mrf.mxu0  ;;  %v3984_v16 = vld [vmem:[%s4813_s18 + $0x194] sm:$0xf] }
 0x6b6   : > { %v1498_v55 = vpack.c.bf16 %v1494_v29, %v1494_v29  ;;  %v1395_v29 = vadd.f32 %v5043_v32, %v1361_v37 }
 0x6b7   : > { %v1657_v41 = vmul.f32 1.442695, %v1651_v52  ;;  %1758 = vmatpush.bf16.msrb.mxu2 %v3630_v18  ;;  %v3725_v18 = vld [vmem:[%s4813_s18 + $0x1b0] sm:$0xf0] }
 0x6b8   : > { %v1527_v57 = vunpack.c.l.b16 %v1498_v55 }
 0x6b9   : > { %4226 = vpow2.f32 %v1657_v41 }
 0x6bb   : > { %v4225_v43 = vpop.eup %4224 }
 0x6bc   : > { %v1495_v46 = vmul.f32 %v4225_v43, %v4217_v22  ;;  %v1663_v20 = vpop.xlane.xlu1 %1662  ;;  %v1648_v47 = vpop.xlane.xlu2 %1647 }
 0x6bd   : > { %v1652_v48 = vsub.f32 %v1635_v33, %v1648_v47  ;;  %v1368_v42 = vpop.f32.mrf.mxu0 }
 0x6be   : > { %v1499_v49 = vpack.c.bf16 %v1495_v46, %v1495_v46 }
 0x6bf   : > { %v4227_v50 = vpop.eup %4226  ;;  %v1659_v53 = vmul.f32 1.442695, %v1652_v48  ;;  %v4318_v48 = vld [vmem:[#allocation13] sm:$0xff] }
 0x6c0   : > { %v1667_v56 = vsel %vm1083_vm14, %v4227_v50, 0.0  ;;  %v1528_v54 = vunpack.c.l.b16 %v1499_v49 }
 0x6c1   : > { %4228 = vpow2.f32 %v1659_v53  ;;  %1668 = vadd.xlane.f32.xlu1 %v1667_v56  ;;  %v1397_v53 = vadd.f32 %v5045_v36, %v1363_v38  ;;  %v3659_v38 = vld [vmem:[%s4813_s18 + $0x150] sm:$0xf] }
 0x6c2   : > { %4230 = vrcp.f32 %v1663_v20  ;;  %v1529_v59 = vpack.c.b16 %v1528_v54, %v1527_v57  ;;  %v4319_v57 = vld [vmem:[#allocation13 + $0x8] sm:$0xff] }
 0x6c4   : > { %v1531_v58 = vpop.permute.xlu2 %1530  ;;  %v1666_v12 = vpop.xlane.xlu1 %1665 }
 0x6c5   : > { %4232 = vrcp.f32 %v1666_v12  ;;  %1543 = vmatpush.bf16.msra.mxu3 %v1531_v58  ;;  %v1575_v43 = vpop.f32.mrf.mxu0  ;;  %v1400_v12 = vadd.f32 %v5047_v44, %v1366_v40  ;;  %v3952_v40 = vld [vmem:[%s4813_s18 + $0x94] sm:$0xf] }
 0x6c6   : > { %v1585_v46 = vadd.f32 %v1575_v43, %v1395_v29  ;;  %v3655_v43 = vld [vmem:[%s4813_s18 + $0x110] sm:$0xf] }
 0x6c7   : > { %v4229_v60 = vpop.eup %4228  ;;  %v3972_v29 = vld [vmem:[%s4813_s18 + $0x12c] sm:$0xf0] }
 0x6c8   : > { %3612 = vmatmul.msk.bf16.vlgmr.msra.gmra.mxu3 %vm1083_vm14, %v1529_v59  ;;  %v1670_v61 = vsel %vm1083_vm14, %v4229_v60, 0.0  ;;  %v4231_v62 = vpop.eup %4230 }
 0x6c9   : > { %1703 = vmatpush.bf16.msrb.mxu3 %v1691_v34  ;;  %1671 = vadd.xlane.f32.xlu2 %v1670_v61  ;;  %v1677_v0 = vmul.f32 %v4231_v62, %v4219_v26  ;;  %v4320_v61 = vld [vmem:[#allocation13 + $0x10] sm:$0xff] }
 0x6cb   : > { %v4233_v63 = vpop.eup %4232  ;;  %v1681_v3 = vpack.c.bf16 %v1677_v0, %v1677_v0 }
 0x6cc   : > { %v1678_v1 = vmul.f32 %v4233_v63, %v4221_v17  ;;  %v1402_v63 = vadd.f32 %v5050_v45, %v1368_v42 }
 0x6cd   : > { %v1687_v30 = vunpack.c.l.b16 %v1681_v3 }
 0x6ce   : > { %v1682_v2 = vpack.c.bf16 %v1678_v1, %v1678_v1 }
 0x6d0   : > { %v1688_v4 = vunpack.c.l.b16 %v1682_v2 }
 0x6d2   : > { %v1689_v5 = vpack.c.b16 %v1688_v4, %v1687_v30  ;;  %v4321_v30 = vld [vmem:[#allocation13 + $0x18] sm:$0xff] }
 0x6d8   : > { %3625 = vmatmul.msk.bf16.vlgmr.msrb.gmra.mxu3 %vm1083_vm14, %v1689_v5 }
 0x6da   : > { %1715 = vrot.lane.b32.xlu1 %v4950_v24, %s4612_s0 }
 0x734   : > { %v1669_v6 = vpop.xlane.xlu1 %1668 }
 0x735   : > { %4234 = vrcp.f32 %v1669_v6 }
 0x73b   : > { %v4235_v11 = vpop.eup %4234 }
 0x73c   : > { %v1672_v15 = vpop.xlane.xlu2 %1671  ;;  %v1679_v21 = vmul.f32 %v4235_v11, %v4227_v50  ;;  %v1577_v50 = vpop.f32.mrf.mxu0  ;;  %v3733_v11 = vld [vmem:[%s4813_s18 + $0x1f0] sm:$0xf0] }
 0x73d   : > { %4236 = vrcp.f32 %v1672_v15  ;;  %v1586_v55 = vadd.f32 %v1577_v50, %v1397_v53  ;;  %v3736_v13 = vor.u32 %v3992_v10, %v3733_v11  ;;  %v3651_v50 = vld [vmem:[%s4813_s18 + $0xd0] sm:$0xf] }
 0x73e   : > { %v1683_v19 = vpack.c.bf16 %v1679_v21, %v1679_v21  ;;  %v3976_v21 = vld [vmem:[%s4813_s18 + $0x154] sm:$0xf]  ;;  %v3964_v53 = vld [vmem:[%s4813_s18 + $0xec] sm:$0xf0] }
 0x73f   : > { %2033 = vmatpush.bf16.msra.mxu3 %v3736_v13 }
 0x740   : > { %v1712_v27 = vunpack.c.l.b16 %v1683_v19  ;;  %v3667_v19 = vld [vmem:[%s4813_s18 + $0x1d0] sm:$0xf] }
 0x743   : > { %v4237_v8 = vpop.eup %4236 }
 0x744   : > { %v1680_v22 = vmul.f32 %v4237_v8, %v4229_v60  ;;  %v3728_v8 = vor.u32 %v3984_v16, %v3725_v18 }
 0x746   : > { %v1684_v23 = vpack.c.bf16 %v1680_v22, %v1680_v22  ;;  %2034 = vmatpush.bf16.msra.mxu3 %v3728_v8  ;;  %v3717_v22 = vld [vmem:[%s4813_s18 + $0x170] sm:$0xf0] }
 0x748   : > { %v1713_v25 = vunpack.c.l.b16 %v1684_v23  ;;  %v3720_v23 = vor.u32 %v3976_v21, %v3717_v22 }
 0x74a   : > { %v1714_v31 = vpack.c.b16 %v1713_v25, %v1712_v27  ;;  %2035 = vmatpush.bf16.msra.mxu3 %v3720_v23  ;;  %v3996_v25 = vld [vmem:[%s4813_s18 + $0x1ec] sm:$0xf0] }
 0x74b   : > { %v1545_v24 = vpop.f32.mrf.mxu3  ;;  %v3668_v27 = vor.u32 %v3996_v25, %v3667_v19 }
 0x74c   : > { %v1716_v28 = vpop.permute.xlu1 %1715 }
 0x74d   : > { %1728 = vmatpush.bf16.msra.mxu1 %v1716_v28  ;;  %v3709_v28 = vld [vmem:[%s4813_s18 + $0x130] sm:$0xf0]  ;;  %1918 = vmatpush.bf16.msra.mxu0 %v3668_v27 }
 0x750   : > { %3626 = vmatmul.msk.bf16.vlgmr.msra.gmra.mxu1 %vm1083_vm14, %v1714_v31 }
 0x753   : > { %v1547_v33 = vpop.f32.mrf.mxu3 }
 0x754   : > { %v1551_v26 = vpack.c.bf16 %v1547_v33, %v1545_v24  ;;  %v3968_v24 = vld [vmem:[%s4813_s18 + $0x114] sm:$0xf]  ;;  %v3663_v33 = vld [vmem:[%s4813_s18 + $0x190] sm:$0xf] }
 0x755   : > { %v3712_v31 = vor.u32 %v3968_v24, %v3709_v28 }
 0x756   : > { %3622 = vmatmul.msk.bf16.gmra.mxu0 %vm1032_vm13, %v1551_v26  ;;  %v3988_v26 = vld [vmem:[%s4813_s18 + $0x1ac] sm:$0xf0] }
 0x757   : > { %2036 = vmatpush.bf16.msra.mxu3 %v3712_v31 }
 0x75b   : > { %v1705_v51 = vpop.f32.mrf.mxu3 }
 0x763   : > { %v1707_v35 = vpop.f32.mrf.mxu3 }
 0x764   : > { %v1735_v17 = vpack.c.bf16 %v1707_v35, %v1705_v51  ;;  %v3960_v51 = vld [vmem:[%s4813_s18 + $0xd4] sm:$0xf]  ;;  %v3664_v35 = vor.u32 %v3988_v26, %v3663_v33 }
 0x766   : > { %3635 = vmatmul.msk.bf16.vlgmr.msrb.gmra.mxu2 %vm1032_vm13, %v1735_v17  ;;  %v3701_v17 = vld [vmem:[%s4813_s18 + $0xf0] sm:$0xf0]  ;;  %1919 = vmatpush.bf16.msra.mxu0 %v3664_v35 }
 0x767   : > { %v3704_v37 = vor.u32 %v3960_v51, %v3701_v17  ;;  %v4322_v17 = vld [vmem:[%s4836_s12] sm:$0x3f] }
 0x769   : > { %2037 = vmatpush.bf16.msra.mxu3 %v3704_v37  ;;  %v1858_v37 = vperm.slane %v4322_v17, 2 }
 0x7cd   : > { %v1730_v39 = vpop.f32.mrf.mxu1 }
 0x7d3   : > { %v1580_v32 = vpop.f32.mrf.mxu0 }
 0x7d4   : > { %v1587_v34 = vadd.f32 %v1580_v32, %v1400_v12 }
 0x7d5   : > { %v1732_v52 = vpop.f32.mrf.mxu1 }
 0x7d6   : > { %v1736_v41 = vpack.c.bf16 %v1732_v52, %v1730_v39  ;;  %v3980_v39 = vld [vmem:[%s4813_s18 + $0x16c] sm:$0xf0] }
 0x7d7   : > { %v3660_v52 = vor.u32 %v3980_v39, %v3659_v38 }
 0x7d8   : > { %3636 = vmatmul.msk.bf16.gmra.mxu2 %vm1032_vm13, %v1736_v41  ;;  %v3693_v41 = vld [vmem:[%s4813_s18 + $0xb0] sm:$0xf0] }
 0x7d9   : > { %v3696_v42 = vor.u32 %v3952_v40, %v3693_v41  ;;  %1920 = vmatpush.bf16.msra.mxu0 %v3660_v52  ;;  %v1863_v41 = vperm.slane %v4322_v17, 3 }
 0x7db   : > { %v1582_v36 = vpop.f32.mrf.mxu0  ;;  %2038 = vmatpush.bf16.msra.mxu3 %v3696_v42 }
 0x7dc   : > { %v1588_v1 = vadd.f32 %v1582_v36, %v1402_v63 }
 0x7e9   : > { %v1760_v20 = vpop.f32.mrf.mxu2 }
 0x7ea   : > { %v1770_v47 = vadd.f32 %v1760_v20, %v1585_v46  ;;  %v3944_v46 = vld [vmem:[%s4813_s18 + $0x54] sm:$0xf]  ;;  %v3656_v20 = vor.u32 %v3972_v29, %v3655_v43 }
 0x7ec   : > { %v5094_v49 = vadd.f32 %v4318_v48, %v1770_v47  ;;  %v3685_v47 = vld [vmem:[%s4813_s18 + $0x70] sm:$0xf0]  ;;  %1921 = vmatpush.bf16.msra.mxu0 %v3656_v20  ;;  %v5179_v20 = vld [vmem:[%s5566_s7 + $0x8] sm:$0xff] }
 0x7ed   : > { %v3688_v48 = vor.u32 %v3944_v46, %v3685_v47 }
 0x7ee   : > { %1778 = vadd.xlane.f32.xlu0 %v5094_v49 }
 0x7ef   : > { %2039 = vmatpush.bf16.msra.mxu3 %v3688_v48 }
 0x7f1   : > { %v1762_v56 = vpop.f32.mrf.mxu2 }
 0x7f2   : > { %v1771_v54 = vadd.f32 %v1762_v56, %v1586_v55  ;;  %v3936_v55 = vld [vmem:[%s4813_s18 + $0x14] sm:$0xf]  ;;  %v3652_v56 = vor.u32 %v3964_v53, %v3651_v50 }
 0x7f4   : > { %v5098_v58 = vadd.f32 %v4319_v57, %v1771_v54  ;;  %v3677_v54 = vld [vmem:[%s4813_s18 + $0x30] sm:$0xf0]  ;;  %1922 = vmatpush.bf16.msra.mxu0 %v3652_v56 }
 0x7f5   : > { %v3680_v32 = vor.u32 %v3936_v55, %v3677_v54 }
 0x7f6   : > { %1780 = vadd.xlane.f32.xlu1 %v5098_v58 }
 0x7f7   : > { %2040 = vmatpush.bf16.msra.mxu3 %v3680_v32 }
 0x85b   : > { %v1765_v59 = vpop.f32.mrf.mxu2 }
 0x85c   : > { %v1772_v60 = vadd.f32 %v1765_v59, %v1587_v34  ;;  %v5151_v34 = vld [vmem:[%s5566_s7] sm:$0xff]  ;;  %v3647_v59 = vld [vmem:[%s4813_s18 + $0x90] sm:$0xf] }
 0x85d   : > { %2041 = vmatmul.bf16.vlgmr.msra.gmra.mxu3 %v5151_v34 }
 0x85e   : > { %v5102_v62 = vadd.f32 %v4320_v61, %v1772_v60  ;;  %v3956_v60 = vld [vmem:[%s4813_s18 + $0xac] sm:$0xf0] }
 0x85f   : > { %v3648_v36 = vor.u32 %v3956_v60, %v3647_v59 }
 0x860   : > { %1782 = vadd.xlane.f32.xlu2 %v5102_v62 }
 0x861   : > { %v1779_v0 = vpop.xlane.xlu0 %1778  ;;  %1923 = vmatpush.bf16.msra.mxu0 %v3648_v36 }
 0x862   : > { %v1786_v2 = vmul.f32 %v1779_v0, %v4848_v14  ;;  %v3643_v0 = vld [vmem:[%s4813_s18 + $0x50] sm:$0xf] }
 0x863   : > { %v1767_v3 = vpop.f32.mrf.mxu2 }
 0x864   : > { %v5108_v44 = vsub.f32 %v5094_v49, %v1786_v2  ;;  %v1773_v4 = vadd.f32 %v1767_v3, %v1588_v1  ;;  %v3948_v1 = vld [vmem:[%s4813_s18 + $0x6c] sm:$0xf0] }
 0x865   : > { %v3644_v2 = vor.u32 %v3948_v1, %v3643_v0  ;;  %v3639_v3 = vld [vmem:[%s4813_s18 + $0x10] sm:$0xf] }
 0x866   : > { %v5110_v5 = vadd.f32 %v4321_v30, %v1773_v4  ;;  %v1794_v45 = vmul.f32 %v5108_v44, %v5108_v44  ;;  %v3940_v4 = vld [vmem:[%s4813_s18 + $0x2c] sm:$0xf0] }
 0x867   : > { %1924 = vmatpush.bf16.msra.mxu0 %v3644_v2 }
 0x868   : > { %1798 = vadd.xlane.f32.xlu0 %v1794_v45  ;;  %1784 = vadd.xlane.f32.xlu2 %v5110_v5 }
 0x869   : > { %v1781_v6 = vpop.xlane.xlu1 %1780 }
 0x86a   : > { %v1787_v7 = vmul.f32 %v1781_v6, %v4848_v14 }
 0x86c   : > { %v5117_v9 = vsub.f32 %v5098_v58, %v1787_v7 }
 0x86d   : > { %2046 = vmatmul.bf16.gmra.mxu3 %v5179_v20 }
 0x86e   : > { %v1795_v15 = vmul.f32 %v5117_v9, %v5117_v9 }
 0x870   : > { %1800 = vadd.xlane.f32.xlu2 %v1795_v15  ;;  %v3640_v15 = vor.u32 %v3940_v4, %v3639_v3 }
 0x872   : > { %1925 = vmatpush.bf16.msra.mxu0 %v3640_v15 }
 0x8d3   : > { %v1783_v57 = vpop.xlane.xlu2 %1782 }
 0x8d4   : > { %v1788_v12 = vmul.f32 %v1783_v57, %v4848_v14 }
 0x8d6   : > { %v5156_v61 = vsub.f32 %v5102_v62, %v1788_v12 }
 0x8d8   : > { %v1796_v63 = vmul.f32 %v5156_v61, %v5156_v61 }
 0x8da   : > { %1802 = vadd.xlane.f32.xlu0 %v1796_v63 }
 0x8db   : > { %v1799_v30 = vpop.xlane.xlu0 %1798  ;;  %v1785_v45 = vpop.xlane.xlu2 %1784 }
 0x8dc   : > { %v1806_v6 = vmul.f32 %v1799_v30, %v4848_v14  ;;  %v1789_v7 = vmul.f32 %v1785_v45, %v4848_v14 }
 0x8de   : > { %v1810_v10 = vadd.f32 1e-05, %v1806_v6  ;;  %v5168_v11 = vsub.f32 %v5110_v5, %v1789_v7 }
 0x8e0   : > { %4238 = vrsqrt.f32 %v1810_v10  ;;  %v1797_v13 = vmul.f32 %v5168_v11, %v5168_v11  ;;  %vm1820_vm0 = vweird.f32 %v1810_v10  ;;  %v2042_v57 = vpop.f32.mrf.mxu3 }
 0x8e1   : > { %v2075_v60 = vpack.c.bf16 %v2042_v57, %v2042_v57 }
 0x8e2   : > { %1804 = vadd.xlane.f32.xlu2 %v1797_v13 }
 0x8e3   : > { %v1801_v16 = vpop.xlane.xlu2 %1800  ;;  %v2090_v2 = vunpack.c.l.b16 %v2075_v60 }
 0x8e4   : > { %v1807_v18 = vmul.f32 %v1801_v16, %v4848_v14 }
 0x8e6   : > { %v4239_v8 = vpop.eup %4238  ;;  %v1811_v21 = vadd.f32 1e-05, %v1807_v18 }
 0x8e7   : > { %v1815_v22 = vmul.f32 %v4239_v8, %v1810_v10  ;;  %vm1821_vm15 = vweird.f32 %v4239_v8 }
 0x8e8   : > { %4240 = vrsqrt.f32 %v1811_v21  ;;  %vm1822_vm1 = vmor %vm1820_vm0, %vm1821_vm15  ;;  %vm1830_vm3 = vweird.f32 %v1811_v21  ;;  %v2044_v1 = vpop.f32.mrf.mxu3 }
 0x8e9   : > { %v1816_v23 = vmul.f32 %v4239_v8, %v1815_v22  ;;  %v2076_v3 = vpack.c.bf16 %v2044_v1, %v2044_v1 }
 0x8eb   : > { %v1817_v19 = vmul.f32 0.5, %v1816_v23  ;;  %v2091_v45 = vunpack.c.l.b16 %v2076_v3 }
 0x8ed   : > { %v1818_v25 = vsub.f32 1.5, %v1817_v19  ;;  %v5185_v15 = vpack.c.b16 %v2091_v45, %v2090_v2 }
 0x8ee   : > { %v4241_v24 = vpop.eup %4240 }
 0x8ef   : > { %v1819_v27 = vmul.f32 %v4239_v8, %v1818_v25  ;;  %v1825_v28 = vmul.f32 %v4241_v24, %v1811_v21  ;;  %vm1831_vm2 = vweird.f32 %v4241_v24  ;;  %v2097_v13 = vsel %vm1032_vm13, %v5185_v15, 0  ;;  %2251 = vrot.lane.b32.xlu0 %v5185_v15, %s4610_s16 }
 0x8f0   : > { %vm1832_vm4 = vmor %vm1830_vm3, %vm1831_vm2  ;;  %2106 = vmatpush.bf16.xpose.msra.mxu2 %v2097_v13  ;;  %v3683_v13 = vld [vmem:[%s4813_s18 + $0x18] sm:$0xf] }
 0x8f1   : > { %v1826_v31 = vmul.f32 %v4241_v24, %v1825_v28  ;;  %v1823_v33 = vsel %vm1822_vm1, %v4239_v8, %v1819_v27 }
 0x8f2   : > { %v1854_v35 = vmul.f32 %v1823_v33, %v5108_v44 }
 0x8f3   : > { %v1827_v26 = vmul.f32 0.5, %v1826_v31 }
 0x8f4   : > { %v1859_v52 = vmul.f32 %v1858_v37, %v1854_v35 }
 0x8f5   : > { %v1828_v51 = vsub.f32 1.5, %v1827_v26 }
 0x8f6   : > { %v1864_v43 = vadd.f32 %v1863_v41, %v1859_v52 }
 0x8f7   : > { %v1829_v38 = vmul.f32 %v4241_v24, %v1828_v51 }
 0x8f9   : > { %v1833_v39 = vsel %vm1832_vm4, %v4241_v24, %v1829_v38 }
 0x8fa   : > { %v1855_v40 = vmul.f32 %v1833_v39, %v5117_v9 }
 0x8fc   : > { %v1860_v42 = vmul.f32 %v1858_v37, %v1855_v40 }
 0x8fe   : > { %v1865_v29 = vadd.f32 %v1863_v41, %v1860_v42 }
 0x900   : > { %v1868_v46 = vpack.c.bf16 %v1865_v29, %v1864_v43  ;;  %v3739_v43 = vld [vmem:[%s4813_s18 + $0x1d8] sm:$0xf] }
 0x901   : > { %v3997_v29 = vld [vmem:[%s4813_s18 + $0x1f4] sm:$0xf0] }
 0x902   : > { %1926 = vmatmul.bf16.vlgmr.msra.gmra.mxu0 %v1868_v46  ;;  %v3731_v46 = vld [vmem:[%s4813_s18 + $0x198] sm:$0xf] }
 0x94d   : > { %v1803_v44 = vpop.xlane.xlu0 %1802 }
 0x94e   : > { %v1808_v47 = vmul.f32 %v1803_v44, %v4848_v14  ;;  %v3740_v44 = vor.u32 %v3997_v29, %v3739_v43 }
 0x950   : > { %v1812_v48 = vadd.f32 1e-05, %v1808_v47  ;;  %v3989_v47 = vld [vmem:[%s4813_s18 + $0x1b4] sm:$0xf0]  ;;  %2052 = vmatpush.bf16.msrb.mxu1 %v3740_v44 }
 0x952   : > { %4242 = vrsqrt.f32 %v1812_v48  ;;  %vm1840_vm6 = vweird.f32 %v1812_v48 }
 0x955   : > { %v1805_v9 = vpop.xlane.xlu2 %1804 }
 0x956   : > { %v1809_v50 = vmul.f32 %v1805_v9, %v4848_v14  ;;  %v3723_v9 = vld [vmem:[%s4813_s18 + $0x158] sm:$0xf] }
 0x958   : > { %v4243_v53 = vpop.eup %4242  ;;  %v1813_v55 = vadd.f32 1e-05, %v1809_v50  ;;  %v3981_v50 = vld [vmem:[%s4813_s18 + $0x174] sm:$0xf0] }
 0x959   : > { %v1835_v56 = vmul.f32 %v4243_v53, %v1812_v48  ;;  %vm1841_vm5 = vweird.f32 %v4243_v53  ;;  %v3732_v48 = vor.u32 %v3989_v47, %v3731_v46 }
 0x95a   : > { %4244 = vrsqrt.f32 %v1813_v55  ;;  %vm1842_vm7 = vmor %vm1840_vm6, %vm1841_vm5  ;;  %vm1850_vm9 = vweird.f32 %v1813_v55 }
 0x95b   : > { %v1836_v54 = vmul.f32 %v4243_v53, %v1835_v56  ;;  %2053 = vmatpush.bf16.msrb.mxu1 %v3732_v48  ;;  %v3973_v56 = vld [vmem:[%s4813_s18 + $0x134] sm:$0xf0] }
 0x95d   : > { %v1837_v32 = vmul.f32 0.5, %v1836_v54 }
 0x95f   : > { %v1838_v12 = vsub.f32 1.5, %v1837_v32  ;;  %v3707_v32 = vld [vmem:[%s4813_s18 + $0xd8] sm:$0xf] }
 0x960   : > { %v4245_v59 = vpop.eup %4244 }
 0x961   : > { %v1839_v36 = vmul.f32 %v4243_v53, %v1838_v12  ;;  %v1845_v63 = vmul.f32 %v4245_v59, %v1813_v55  ;;  %vm1851_vm8 = vweird.f32 %v4245_v59  ;;  %v3715_v55 = vld [vmem:[%s4813_s18 + $0x118] sm:$0xf] }
 0x962   : > { %vm1852_vm10 = vmor %vm1850_vm9, %vm1851_vm8  ;;  %v3716_v54 = vor.u32 %v3973_v56, %v3715_v55  ;;  %v3965_v12 = vld [vmem:[%s4813_s18 + $0xf4] sm:$0xf0] }
 0x963   : > { %v1846_v0 = vmul.f32 %v4245_v59, %v1845_v63  ;;  %v1843_v30 = vsel %vm1842_vm7, %v4243_v53, %v1839_v36  ;;  %v3724_v53 = vor.u32 %v3981_v50, %v3723_v9  ;;  %v3699_v36 = vld [vmem:[%s4813_s18 + $0x98] sm:$0xf] }
 0x964   : > { %v1856_v7 = vmul.f32 %v1843_v30, %v5156_v61  ;;  %v3957_v63 = vld [vmem:[%s4813_s18 + $0xb4] sm:$0xf0] }
 0x965   : > { %v1847_v4 = vmul.f32 0.5, %v1846_v0  ;;  %2054 = vmatpush.bf16.msrb.mxu1 %v3724_v53  ;;  %v3700_v0 = vor.u32 %v3957_v63, %v3699_v36  ;;  %v3949_v30 = vld [vmem:[%s4813_s18 + $0x74] sm:$0xf0] }
 0x966   : > { %v1861_v8 = vmul.f32 %v1858_v37, %v1856_v7 }
 0x967   : > { %v1848_v6 = vsub.f32 1.5, %v1847_v4  ;;  %v3691_v4 = vld [vmem:[%s4813_s18 + $0x58] sm:$0xf] }
 0x968   : > { %v1866_v22 = vadd.f32 %v1863_v41, %v1861_v8 }
 0x969   : > { %v1849_v10 = vmul.f32 %v4245_v59, %v1848_v6  ;;  %2055 = vmatpush.bf16.msrb.mxu1 %v3716_v54  ;;  %v3692_v6 = vor.u32 %v3949_v30, %v3691_v4 }
 0x96b   : > { %v1853_v16 = vsel %vm1852_vm10, %v4245_v59, %v1849_v10  ;;  %v3708_v59 = vor.u32 %v3965_v12, %v3707_v32 }
 0x96c   : > { %v1857_v18 = vmul.f32 %v1853_v16, %v5168_v11  ;;  %v2047_v11 = vpop.f32.mrf.mxu3  ;;  %v3941_v16 = vld [vmem:[%s4813_s18 + $0x34] sm:$0xf0] }
 0x96d   : > { %v2077_v35 = vpack.c.bf16 %v2047_v11, %v2047_v11  ;;  %2056 = vmatpush.bf16.msrb.mxu1 %v3708_v59  ;;  %v3684_v8 = vor.u32 %v3941_v16, %v3683_v13 }
 0x96e   : > { %v1862_v21 = vmul.f32 %v1858_v37, %v1857_v18 }
 0x96f   : > { %v2120_v37 = vunpack.c.l.b16 %v2077_v35 }
 0x970   : > { %v1867_v23 = vadd.f32 %v1863_v41, %v1862_v21  ;;  %v2252_v41 = vpop.permute.xlu0 %2251  ;;  %v4039_v21 = vld [vmem:[#allocation7] sm:$0xff]  }
 0x971   : > { %v2257_v42 = vsel %vm1032_vm13, %v2252_v41, 0  ;;  %2057 = vmatpush.bf16.msrb.mxu1 %v3700_v0 }
 0x972   : > { %v1869_v61 = vpack.c.bf16 %v1867_v23, %v1866_v22  ;;  %v5224_v22 = vunpack.c.l.bf16 %v4039_v21 }
 0x974   : > { %1931 = vmatmul.bf16.gmra.mxu0 %v1869_v61  ;;  %v2049_v17 = vpop.f32.mrf.mxu3 }
 0x975   : > { %v2078_v38 = vpack.c.bf16 %v2049_v17, %v2049_v17  ;;  %2058 = vmatpush.bf16.msrb.mxu1 %v3692_v6 }
 0x977   : > { %v2121_v39 = vunpack.c.l.b16 %v2078_v38 }
 0x979   : > { %v5198_v40 = vpack.c.b16 %v2121_v39, %v2120_v37  ;;  %2059 = vmatpush.bf16.msrb.mxu1 %v3684_v8 }
 0x97b   : > { %v2127_v52 = vsel %vm1032_vm13, %v5198_v40, 0 }
 0x97c   : > { %2136 = vmatpush.bf16.xpose.msrb.mxu0 %v2127_v52  ;;  %2060 = vmatmul.bf16.vlgmr.msrb.gmra.mxu1 %v5151_v34 }
 0x97f   : > { %v1927_v19 = vpop.f32.mrf.mxu0 }
 0x980   : > { %v1937_v25 = vmul.f32 0.17677669, %v1927_v19 }
 0x982   : > { %v2071_v27 = vpack.c.bf16 %v1937_v25, %v1937_v25 }
 0x984   : > { %v2085_v33 = vunpack.c.l.b16 %v2071_v27  ;;  %2266 = vmatpush.bf16.xpose.msra.mxu0 %v2257_v42 }
 0x987   : > { %v1929_v24 = vpop.f32.mrf.mxu0 }
 0x988   : > { %v1938_v28 = vmul.f32 0.17677669, %v1929_v24  ;;  %v5230_v24 = vunpack.c.h.bf16 %v4039_v21 }
 0x98a   : > { %v2072_v31 = vpack.c.bf16 %v1938_v28, %v1938_v28 }
 0x98c   : > { %v2086_v26 = vunpack.c.l.b16 %v2072_v31  ;;  %2065 = vmatmul.bf16.gmra.mxu1 %v5179_v20 }
 0x98e   : > { %v5192_v51 = vpack.c.b16 %v2086_v26, %v2085_v33 }
 0x990   : > { %2249 = vrot.lane.b32.xlu1 %v5192_v51, %s4610_s16  ;;  %3741 = vmatmul.msk.bf16.vlgmr.msra.gmra.mxu2 %vm1032_vm13, %v5192_v51 }
 0x9f1   : > { %v1932_v57 = vpop.f32.mrf.mxu0 }
 0x9f2   : > { %v1939_v60 = vmul.f32 0.17677669, %v1932_v57  ;;  %v4047_v57 = vld [vmem:[#allocation7 + $0x8] sm:$0xff]  }
 0x9f3   : > { %v5251_v32 = vunpack.c.l.bf16 %v4047_v57 }
 0x9f4   : > { %v2073_v2 = vpack.c.bf16 %v1939_v60, %v1939_v60 }
 0x9f6   : > { %v2115_v7 = vunpack.c.l.b16 %v2073_v2 }
 0x9f9   : > { %v1934_v1 = vpop.f32.mrf.mxu0  ;;  %v2061_v33 = vpop.f32.mrf.mxu1 }
 0x9fa   : > { %v1940_v3 = vmul.f32 0.17677669, %v1934_v1  ;;  %v2079_v11 = vpack.c.bf16 %v2061_v33, %v2061_v33 }
 0x9fc   : > { %v2074_v45 = vpack.c.bf16 %v1940_v3, %v1940_v3  ;;  %v2198_v20 = vunpack.c.l.b16 %v2079_v11 }
 0x9fe   : > { %v2116_v10 = vunpack.c.l.b16 %v2074_v45 }
 0xa00   : > { %v5219_v18 = vpack.c.b16 %v2116_v10, %v2115_v7 }
 0xa01   : > { %v2063_v17 = vpop.f32.mrf.mxu1 }
 0xa02   : > { %3742 = vmatmul.msk.bf16.vlgmr.msrb.gmra.mxu0 %vm1032_vm13, %v5219_v18  ;;  %v2250_v23 = vpop.permute.xlu1 %2249  ;;  %v2080_v38 = vpack.c.bf16 %v2063_v17, %v2063_v17 }
 0xa04   : > { %v2199_v52 = vunpack.c.l.b16 %v2080_v38 }
 0xa06   : > { %v5236_v42 = vpack.c.b16 %v2199_v52, %v2198_v20 }
 0xa08   : > { %2212 = vmatpush.bf16.msrb.mxu2 %v5236_v42 }
 0xa09   : > { %v2066_v52 = vpop.f32.mrf.mxu1 }
 0xa12   : > { %3745 = vmatmul.msk.bf16.vlgmr.msra.gmra.mxu0 %vm1032_vm13, %v2250_v23 }
 0xa13   : > { %v2108_v61 = vpop.f32.mrf.mxu2 }
 0xa14   : > { %v2109_v19 = vadd.f32 %v5224_v22, %v2108_v61 }
 0xa16   : > { %v2143_v25 = vsel %vm1083_vm14, %v2109_v19, -inf }
 0xa17   : > { %2144 = vmax.xlane.f32.xlu2 %v2143_v25 }
 0xa1b   : > { %v2110_v27 = vpop.f32.mrf.mxu2 }
 0xa1c   : > { %v2111_v28 = vadd.f32 %v5230_v24, %v2110_v27 }
 0xa1e   : > { %v2146_v34 = vsel %vm1083_vm14, %v2111_v28, -inf }
 0xa1f   : > { %2147 = vmax.xlane.f32.xlu2 %v2146_v34 }
 0xa7f   : > { %v2138_v31 = vpop.f32.mrf.mxu0 }
 0xa80   : > { %v2139_v12 = vadd.f32 %v5251_v32, %v2138_v31 }
 0xa82   : > { %v2149_v59 = vsel %vm1083_vm14, %v2139_v12, -inf }
 0xa87   : > { %v5234_v26 = vpop.f32.mrf.mxu0 }
 0xa8a   : > { %v2145_v35 = vpop.xlane.xlu2 %2144 }
 0xa8b   : > { %v2155_v37 = vsub.f32 %v2109_v19, %v2145_v35  ;;  %v5264_v35 = vunpack.c.h.bf16 %v4047_v57 }
 0xa8d   : > { %v2159_v39 = vmul.f32 1.442695, %v2155_v37  ;;  %v2141_v37 = vadd.f32 %v5264_v35, %v5234_v26 }
 0xa8f   : > { %4246 = vpow2.f32 %v2159_v39  ;;  %v2268_v41 = vpop.f32.mrf.mxu0  ;;  %v2152_v38 = vsel %vm1083_vm14, %v2141_v37, -inf }
 0xa90   : > { %v2269_v43 = vadd.f32 %v5224_v22, %v2268_v41  ;;  %v2068_v41 = vpop.f32.mrf.mxu1 }
 0xa92   : > { %v2148_v29 = vpop.xlane.xlu2 %2147  ;;  %v2297_v46 = vsel %vm1083_vm14, %v2269_v43, -inf }
 0xa93   : > { %v2156_v44 = vsub.f32 %v2111_v28, %v2148_v29  ;;  %2298 = vmax.xlane.f32.xlu2 %v2297_v46  ;;  %v2082_v29 = vpack.c.bf16 %v2068_v41, %v2068_v41 }
 0xa95   : > { %v4247_v47 = vpop.eup %4246  ;;  %v2161_v48 = vmul.f32 1.442695, %v2156_v44  ;;  %v2227_v44 = vunpack.c.l.b16 %v2082_v29 }
 0xa96   : > { %v2167_v9 = vsel %vm1083_vm14, %v4247_v47, 0.0 }
 0xa97   : > { %4248 = vpow2.f32 %v2161_v48  ;;  %v2270_v50 = vpop.f32.mrf.mxu0  ;;  %2168 = vadd.xlane.f32.xlu1 %v2167_v9  ;;  %v3945_v48 = vld [vmem:[%s4813_s18 + $0x5c] sm:$0xf] }
 0xa98   : > { %v2271_v53 = vadd.f32 %v5230_v24, %v2270_v50  ;;  %v3763_v9 = vld [vmem:[%s4813_s18 + $0x78] sm:$0xf0] }
 0xa99   : > { %v3766_v50 = vor.u32 %v3945_v48, %v3763_v9 }
 0xa9a   : > { %v2300_v55 = vsel %vm1083_vm14, %v2271_v53, -inf }
 0xa9b   : > { %2301 = vmax.xlane.f32.xlu0 %v2300_v55  ;;  %v3759_v55 = vld [vmem:[%s4813_s18 + $0x38] sm:$0xf0] }
 0xa9d   : > { %v4249_v56 = vpop.eup %4248 }
 0xa9e   : > { %v2170_v54 = vsel %vm1083_vm14, %v4249_v56, 0.0 }
 0xa9f   : > { %2171 = vadd.xlane.f32.xlu2 %v2170_v54 }
 0xab0   : > { %2350 = vrot.lane.b32.xlu1 %v5236_v42, %s4610_s16 }
 0xab7   : > { %2275 = vrot.lane.b32.xlu2 %v5198_v40, %s4610_s16 }
 0xabf   : > { %2273 = vrot.lane.b32.xlu2 %v5219_v18, %s4610_s16 }
 0xada   : > { %2150 = vmax.xlane.f32.xlu1 %v2149_v59 }
 0xb06   : > { %v2299_v60 = vpop.xlane.xlu2 %2298 }
 0xb07   : > { %v2309_v36 = vsub.f32 %v2269_v43, %v2299_v60  ;;  %v2081_v43 = vpack.c.bf16 %v2066_v52, %v2066_v52 }
 0xb09   : > { %v2313_v63 = vmul.f32 1.442695, %v2309_v36  ;;  %v2226_v46 = vunpack.c.l.b16 %v2081_v43 }
 0xb0a   : > { %v2169_v0 = vpop.xlane.xlu1 %2168 }
 0xb0b   : > { %4250 = vpow2.f32 %v2313_v63 }
 0xb0c   : > { %4252 = vrcp.f32 %v2169_v0 }
 0xb0e   : > { %v2302_v1 = vpop.xlane.xlu0 %2301 }
 0xb0f   : > { %v2310_v2 = vsub.f32 %v2271_v53, %v2302_v1  ;;  %v3937_v53 = vld [vmem:[%s4813_s18 + $0x1c] sm:$0xf] }
 0xb11   : > { %v4251_v3 = vpop.eup %4250  ;;  %v2315_v4 = vmul.f32 1.442695, %v2310_v2 }
 0xb12   : > { %v2172_v30 = vpop.xlane.xlu2 %2171  ;;  %v2321_v45 = vsel %vm1083_vm14, %v4251_v3, 0.0  ;;  %v4253_v6 = vpop.eup %4252 }
 0xb13   : > { %4254 = vpow2.f32 %v2315_v4  ;;  %2322 = vadd.xlane.f32.xlu0 %v2321_v45  ;;  %v2183_v7 = vmul.f32 %v4253_v6, %v4247_v47  ;;  %v5273_v47 = vpack.c.b16 %v2227_v44, %v2226_v46 }
 0xb14   : > { %4256 = vrcp.f32 %v2172_v30 }
 0xb15   : > { %v2187_v21 = vpack.c.bf16 %v2183_v7, %v2183_v7  ;;  %2240 = vmatpush.bf16.msrb.mxu3 %v5273_v47 }
 0xb17   : > { %v2193_v25 = vunpack.c.l.b16 %v2187_v21 }
 0xb19   : > { %v4255_v10 = vpop.eup %4254 }
 0xb1a   : > { %v4257_v13 = vpop.eup %4256  ;;  %v2276_v16 = vpop.permute.xlu2 %2275  ;;  %v2324_v8 = vsel %vm1083_vm14, %v4255_v10, 0.0 }
 0xb1b   : > { %v2184_v23 = vmul.f32 %v4257_v13, %v4249_v56  ;;  %v2281_v61 = vsel %vm1032_vm13, %v2276_v16, 0  ;;  %2325 = vadd.xlane.f32.xlu2 %v2324_v8  ;;  %v3762_v56 = vor.u32 %v3937_v53, %v3759_v55 }
 0xb1c   : > { %2290 = vmatpush.bf16.xpose.msra.mxu1 %v2281_v61 }
 0xb1d   : > { %v2188_v19 = vpack.c.bf16 %v2184_v23, %v2184_v23 }
 0xb1f   : > { %v2194_v27 = vunpack.c.l.b16 %v2188_v19 }
 0xb21   : > { %v2195_v28 = vpack.c.b16 %v2194_v27, %v2193_v25 }
 0xb22   : > { %v2274_v34 = vpop.permute.xlu2 %2273  ;;  %v2351_v31 = vpop.permute.xlu1 %2350 }
 0xb23   : > { %3743 = vmatmul.msk.bf16.vlgmr.msrb.gmra.mxu2 %vm1083_vm14, %v2195_v28  ;;  %3746 = vmatmul.msk.bf16.vlgmr.msra.gmra.mxu1 %vm1032_vm13, %v2274_v34  ;;  %v3961_v34 = vld [vmem:[%s4813_s18 + $0xdc] sm:$0xf] }
 0xb24   : > { %2363 = vmatpush.bf16.msra.mxu2 %v2351_v31  ;;  %2450 = vmatpush.bf16.msrb.mxu1 %v3766_v50  ;;  %v3753_v31 = vld [vmem:[%s4813_s18 + $0xf8] sm:$0xf0] }
 0xb27   : > { %2465 = vrot.lane.b32.xlu0 %v5185_v15, %s4611_s10 }
 0xb28   : > { %2451 = vmatpush.bf16.msrb.mxu1 %v3762_v56 }
 0xb2f   : > { %2463 = vrot.lane.b32.xlu0 %v5192_v51, %s4611_s10 }
 0xb4d   : > { %v2151_v33 = vpop.xlane.xlu1 %2150 }
 0xb4e   : > { %v2157_v11 = vsub.f32 %v2139_v12, %v2151_v33  ;;  %v3756_v33 = vor.u32 %v3961_v34, %v3753_v31 }
 0xb50   : > { %v2163_v17 = vmul.f32 1.442695, %v2157_v11  ;;  %2417 = vmatpush.bf16.msrb.mxu0 %v3756_v33  ;;  %v3953_v11 = vld [vmem:[%s4813_s18 + $0x9c] sm:$0xf] }
 0xb52   : > { %4258 = vpow2.f32 %v2163_v17  ;;  %v3749_v17 = vld [vmem:[%s4813_s18 + $0xb8] sm:$0xf0] }
 0xb58   : > { %v5268_v20 = vpop.eup %4258 }
 0xb59   : > { %2153 = vmax.xlane.f32.xlu0 %v2152_v38  ;;  %v2173_v39 = vsel %vm1083_vm14, %v5268_v20, 0.0 }
 0xb5a   : > { %2174 = vadd.xlane.f32.xlu2 %v2173_v39 }
 0xb86   : > { %v2323_v26 = vpop.xlane.xlu0 %2322 }
 0xb87   : > { %4260 = vrcp.f32 %v2323_v26 }
 0xb8d   : > { %v4261_v57 = vpop.eup %4260 }
 0xb8e   : > { %v2326_v54 = vpop.xlane.xlu2 %2325  ;;  %v2337_v12 = vmul.f32 %v4261_v57, %v4251_v3 }
 0xb8f   : > { %4262 = vrcp.f32 %v2326_v54 }
 0xb90   : > { %v2341_v60 = vpack.c.bf16 %v2337_v12, %v2337_v12 }
 0xb92   : > { %v2347_v1 = vunpack.c.l.b16 %v2341_v60 }
 0xb95   : > { %v4263_v59 = vpop.eup %4262 }
 0xb96   : > { %v2338_v36 = vmul.f32 %v4263_v59, %v4255_v10 }
 0xb98   : > { %v2342_v63 = vpack.c.bf16 %v2338_v36, %v2338_v36 }
 0xb99   : > { %v2466_v0 = vpop.permute.xlu0 %2465 }
 0xb9a   : > { %v2348_v2 = vunpack.c.l.b16 %v2342_v63  ;;  %v2471_v4 = vsel %vm1032_vm13, %v2466_v0, 0 }
 0xb9b   : > { %2480 = vmatpush.bf16.xpose.msrb.mxu2 %v2471_v4 }
 0xb9c   : > { %v2349_v30 = vpack.c.b16 %v2348_v2, %v2347_v1 }
 0xb9e   : > { %3747 = vmatmul.msk.bf16.vlgmr.msra.gmra.mxu2 %vm1083_vm14, %v2349_v30 }
 0xba0   : > { %v2292_v21 = vpop.f32.mrf.mxu1 }
 0xba1   : > { %v2464_v6 = vpop.permute.xlu0 %2463  ;;  %v2293_v61 = vadd.f32 %v5251_v32, %v2292_v21 }
 0xba3   : > { %v2303_v19 = vsel %vm1083_vm14, %v2293_v61, -inf }
 0xba6   : > { %v2214_v45 = vpop.f32.mrf.mxu2 }
 0xba8   : > { %v2294_v25 = vpop.f32.mrf.mxu1 }
 0xba9   : > { %v2295_v27 = vadd.f32 %v5264_v35, %v2294_v25 }
 0xbab   : > { %v2306_v28 = vsel %vm1083_vm14, %v2295_v27, -inf }
 0xbae   : > { %v2216_v7 = vpop.f32.mrf.mxu2  ;;  %3769 = vmatmul.msk.bf16.vlgmr.msrb.gmra.mxu2 %vm1032_vm13, %v2464_v6 }
 0xbaf   : > { %v2247_v13 = vpack.c.bf16 %v2216_v7, %v2214_v45 }
 0xbb1   : > { %3767 = vmatmul.msk.bf16.vlgmr.msrb.gmra.mxu1 %vm1032_vm13, %v2247_v13 }
 0xbcc   : > { %v2154_v3 = vpop.xlane.xlu0 %2153 }
 0xbcd   : > { %v2158_v10 = vsub.f32 %v2141_v37, %v2154_v3  ;;  %v3752_v37 = vor.u32 %v3953_v11, %v3749_v17  ;;  %v2175_v48 = vpop.xlane.xlu2 %2174 }
 0xbcf   : > { %v2165_v16 = vmul.f32 1.442695, %v2158_v10  ;;  %2418 = vmatpush.bf16.msrb.mxu0 %v3752_v37 }
 0xbd1   : > { %4264 = vpow2.f32 %v2165_v16 }
 0xbd2   : > { %4266 = vrcp.f32 %v2175_v48 }
 0xbd7   : > { %v4265_v8 = vpop.eup %4264 }
 0xbd8   : > { %v2176_v23 = vsel %vm1083_vm14, %v4265_v8, 0.0  ;;  %v4267_v50 = vpop.eup %4266 }
 0xbd9   : > { %2177 = vadd.xlane.f32.xlu2 %v2176_v23  ;;  %v2185_v53 = vmul.f32 %v4267_v50, %v5268_v20 }
 0xbdb   : > { %v2189_v56 = vpack.c.bf16 %v2185_v53, %v2185_v53 }
 0xbdd   : > { %v2221_v36 = vunpack.c.l.b16 %v2189_v56 }
 0xbe1   : > { %2304 = vmax.xlane.f32.xlu2 %v2303_v19 }
 0xbe9   : > { %2307 = vmax.xlane.f32.xlu2 %v2306_v28 }
 0xc21   : > { %v2365_v38 = vpop.f32.mrf.mxu2 }
 0xc29   : > { %v2367_v39 = vpop.f32.mrf.mxu2 }
 0xc2a   : > { %v2395_v52 = vpack.c.bf16 %v2367_v39, %v2365_v38 }
 0xc2c   : > { %3757 = vmatmul.msk.bf16.vlgmr.msrb.gmra.mxu0 %vm1032_vm13, %v2395_v52 }
 0xc31   : > { %v2482_v41 = vpop.f32.mrf.mxu2 }
 0xc32   : > { %v2483_v43 = vadd.f32 %v5224_v22, %v2482_v41 }
 0xc34   : > { %v2511_v29 = vsel %vm1083_vm14, %v2483_v43, -inf }
 0xc35   : > { %2512 = vmax.xlane.f32.xlu1 %v2511_v29 }
 0xc39   : > { %v2484_v46 = vpop.f32.mrf.mxu2 }
 0xc3a   : > { %v2485_v44 = vadd.f32 %v5230_v24, %v2484_v46 }
 0xc3c   : > { %v2514_v26 = vsel %vm1083_vm14, %v2485_v44, -inf }
 0xc3d   : > { %2515 = vmax.xlane.f32.xlu0 %v2514_v26 }
 0xc4c   : > { %v2178_v9 = vpop.xlane.xlu2 %2177 }
 0xc4d   : > { %4268 = vrcp.f32 %v2178_v9 }
 0xc51   : > { %2375 = vrot.lane.b32.xlu0 %v5273_v47, %s4610_s16 }
 0xc53   : > { %v4269_v55 = vpop.eup %4268 }
 0xc54   : > { %v2186_v54 = vmul.f32 %v4269_v55, %v4265_v8  ;;  %v2305_v57 = vpop.xlane.xlu2 %2304 }
 0xc55   : > { %v2311_v12 = vsub.f32 %v2293_v61, %v2305_v57 }
 0xc56   : > { %v2190_v59 = vpack.c.bf16 %v2186_v54, %v2186_v54 }
 0xc57   : > { %v2317_v60 = vmul.f32 1.442695, %v2311_v12 }
 0xc58   : > { %v2222_v63 = vunpack.c.l.b16 %v2190_v59 }
 0xc59   : > { %4270 = vpow2.f32 %v2317_v60 }
 0xc5a   : > { %v2223_v0 = vpack.c.b16 %v2222_v63, %v2221_v36 }
 0xc5c   : > { %3744 = vmatmul.msk.bf16.vlgmr.msrb.gmra.mxu3 %vm1083_vm14, %v2223_v0  ;;  %v2308_v1 = vpop.xlane.xlu2 %2307 }
 0xc5d   : > { %v2312_v2 = vsub.f32 %v2295_v27, %v2308_v1  ;;  %v5329_v1 = vpop.f32.mrf.mxu1 }
 0xc5f   : > { %v4271_v4 = vpop.eup %4270  ;;  %v2319_v20 = vmul.f32 1.442695, %v2312_v2 }
 0xc60   : > { %v2327_v30 = vsel %vm1083_vm14, %v4271_v4, 0.0 }
 0xc61   : > { %4272 = vpow2.f32 %v2319_v20  ;;  %2328 = vadd.xlane.f32.xlu2 %v2327_v30 }
 0xc67   : > { %v4273_v45 = vpop.eup %4272 }
 0xc68   : > { %v2330_v6 = vsel %vm1083_vm14, %v4273_v45, 0.0 }
 0xc69   : > { %2331 = vadd.xlane.f32.xlu1 %v2330_v6 }
 0xc79   : > { %2489 = vrot.lane.b32.xlu2 %v5198_v40, %s4611_s10 }
 0xc82   : > { %2487 = vrot.lane.b32.xlu1 %v5219_v18, %s4611_s10 }
 0xc8a   : > { %2650 = vrot.lane.b32.xlu1 %v5185_v15, %s4612_s0 }
 0xc92   : > { %2564 = vrot.lane.b32.xlu1 %v5236_v42, %s4611_s10 }
 0xc9a   : > { %2648 = vrot.lane.b32.xlu1 %v5192_v51, %s4612_s0 }
 0xca2   : > { %2674 = vrot.lane.b32.xlu1 %v5198_v40, %s4612_s0 }
 0xca8   : > { %v2513_v7 = vpop.xlane.xlu1 %2512 }
 0xca9   : > { %v2523_v13 = vsub.f32 %v2483_v43, %v2513_v7 }
 0xcaa   : > { %2672 = vrot.lane.b32.xlu1 %v5219_v18, %s4612_s0 }
 0xcab   : > { %v2527_v3 = vmul.f32 1.442695, %v2523_v13 }
 0xcad   : > { %4274 = vpow2.f32 %v2527_v3 }
 0xcb0   : > { %v2516_v10 = vpop.xlane.xlu0 %2515 }
 0xcb1   : > { %v2524_v16 = vsub.f32 %v2485_v44, %v2516_v10 }
 0xcb3   : > { %v4275_v8 = vpop.eup %4274  ;;  %v2529_v15 = vmul.f32 1.442695, %v2524_v16 }
 0xcb4   : > { %v2535_v21 = vsel %vm1083_vm14, %v4275_v8, 0.0 }
 0xcb5   : > { %4276 = vpow2.f32 %v2529_v15  ;;  %2536 = vadd.xlane.f32.xlu0 %v2535_v21 }
 0xcbb   : > { %v4277_v23 = vpop.eup %4276 }
 0xcbc   : > { %v2538_v51 = vsel %vm1083_vm14, %v4277_v23, 0.0 }
 0xcbd   : > { %2539 = vadd.xlane.f32.xlu2 %v2538_v51 }
 0xcc3   : > { %v2376_v40 = vpop.permute.xlu0 %2375 }
 0xcc4   : > { %2388 = vmatpush.bf16.msra.mxu3 %v2376_v40 }
 0xcd4   : > { %v2329_v61 = vpop.xlane.xlu2 %2328 }
 0xcd5   : > { %4278 = vrcp.f32 %v2329_v61 }
 0xcdb   : > { %v4279_v25 = vpop.eup %4278 }
 0xcdc   : > { %v2332_v19 = vpop.xlane.xlu1 %2331  ;;  %v2490_v18 = vpop.permute.xlu2 %2489  ;;  %v2339_v34 = vmul.f32 %v4279_v25, %v4271_v4 }
 0xcdd   : > { %4280 = vrcp.f32 %v2332_v19  ;;  %v2495_v27 = vsel %vm1032_vm13, %v2490_v18, 0  ;;  %v5331_v4 = vpop.f32.mrf.mxu1  ;;  %v3977_v19 = vld [vmem:[%s4813_s18 + $0x15c] sm:$0xf] }
 0xcde   : > { %2504 = vmatpush.bf16.xpose.msrb.mxu3 %v2495_v27  ;;  %v2343_v33 = vpack.c.bf16 %v2339_v34, %v2339_v34  ;;  %v3777_v18 = vld [vmem:[%s4813_s18 + $0x178] sm:$0xf0] }
 0xcdf   : > { %v2242_v28 = vpop.f32.mrf.mxu3  ;;  %v3780_v25 = vor.u32 %v3977_v19, %v3777_v18  ;;  %v3969_v27 = vld [vmem:[%s4813_s18 + $0x11c] sm:$0xf] }
 0xce0   : > { %v2372_v38 = vunpack.c.l.b16 %v2343_v33 }
 0xce1   : > { %2631 = vmatpush.bf16.msra.mxu0 %v3780_v25 }
 0xce3   : > { %v4281_v31 = vpop.eup %4280 }
 0xce4   : > { %v2340_v11 = vmul.f32 %v4281_v31, %v4273_v45 }
 0xce6   : > { %v2344_v17 = vpack.c.bf16 %v2340_v11, %v2340_v11 }
 0xce7   : > { %v2244_v37 = vpop.f32.mrf.mxu3 }
 0xce8   : > { %v2373_v39 = vunpack.c.l.b16 %v2344_v17  ;;  %v2248_v52 = vpack.c.bf16 %v2244_v37, %v2242_v28  ;;  %v3773_v28 = vld [vmem:[%s4813_s18 + $0x138] sm:$0xf0] }
 0xce9   : > { %v3776_v34 = vor.u32 %v3969_v27, %v3773_v28 }
 0xcea   : > { %v2374_v41 = vpack.c.b16 %v2373_v39, %v2372_v38  ;;  %3768 = vmatmul.msk.bf16.gmra.mxu1 %vm1032_vm13, %v2248_v52 }
 0xceb   : > { %2632 = vmatpush.bf16.msra.mxu0 %v3776_v34 }
 0xcec   : > { %3748 = vmatmul.msk.bf16.vlgmr.msra.gmra.mxu3 %vm1083_vm14, %v2374_v41 }
 0xcf4   : > { %v2488_v43 = vpop.permute.xlu1 %2487 }
 0xcfc   : > { %v2651_v29 = vpop.permute.xlu1 %2650  ;;  %3770 = vmatmul.msk.bf16.vlgmr.msrb.gmra.mxu3 %vm1032_vm13, %v2488_v43 }
 0xcfd   : > { %v2656_v46 = vsel %vm1032_vm13, %v2651_v29, 0 }
 0xcfe   : > { %2665 = vmatpush.bf16.xpose.msra.mxu1 %v2656_v46 }
 0xd04   : > { %v2565_v44 = vpop.permute.xlu1 %2564 }
 0xd05   : > { %2577 = vmatpush.bf16.msra.mxu2 %v2565_v44 }
 0xd0c   : > { %v2649_v26 = vpop.permute.xlu1 %2648 }
 0xd0d   : > { %3783 = vmatmul.msk.bf16.vlgmr.msra.gmra.mxu1 %vm1032_vm13, %v2649_v26 }
 0xd14   : > { %v2675_v48 = vpop.permute.xlu1 %2674 }
 0xd15   : > { %v2680_v9 = vsel %vm1032_vm13, %v2675_v48, 0 }
 0xd16   : > { %2689 = vmatpush.bf16.xpose.msrb.mxu2 %v2680_v9 }
 0xd1c   : > { %v2673_v0 = vpop.permute.xlu1 %2672 }
 0xd28   : > { %v2537_v50 = vpop.xlane.xlu0 %2536 }
 0xd29   : > { %4282 = vrcp.f32 %v2537_v50 }
 0xd2f   : > { %v4283_v55 = vpop.eup %4282 }
 0xd30   : > { %v2540_v53 = vpop.xlane.xlu2 %2539  ;;  %v2551_v56 = vmul.f32 %v4283_v55, %v4275_v8 }
 0xd31   : > { %4284 = vrcp.f32 %v2540_v53 }
 0xd32   : > { %v2555_v57 = vpack.c.bf16 %v2551_v56, %v2551_v56 }
 0xd34   : > { %v2561_v60 = vunpack.c.l.b16 %v2555_v57 }
 0xd37   : > { %v4285_v54 = vpop.eup %4284 }
 0xd38   : > { %v2552_v12 = vmul.f32 %v4285_v54, %v4277_v23 }
 0xd3a   : > { %v2556_v59 = vpack.c.bf16 %v2552_v12, %v2552_v12 }
 0xd3c   : > { %v2562_v36 = vunpack.c.l.b16 %v2556_v59 }
 0xd3e   : > { %v2563_v63 = vpack.c.b16 %v2562_v36, %v2561_v60 }
 0xd40   : > { %3771 = vmatmul.msk.bf16.vlgmr.msra.gmra.mxu2 %vm1083_vm14, %v2563_v63 }
 0xd50   : > { %3784 = vmatmul.msk.bf16.vlgmr.msrb.gmra.mxu2 %vm1032_vm13, %v2673_v0 }
 0xd67   : > { %v5333_v30 = vpop.f32.mrf.mxu1 }
 0xd6f   : > { %v2390_v2 = vpop.f32.mrf.mxu3  ;;  %v5337_v13 = vpop.f32.mrf.mxu1 }
 0xd77   : > { %v2392_v20 = vpop.f32.mrf.mxu3 }
 0xd78   : > { %v2396_v45 = vpack.c.bf16 %v2392_v20, %v2390_v2 }
 0xd7a   : > { %3758 = vmatmul.msk.bf16.gmra.mxu0 %vm1032_vm13, %v2396_v45 }
 0xd7f   : > { %v2506_v6 = vpop.f32.mrf.mxu3 }
 0xd80   : > { %v2507_v7 = vadd.f32 %v5251_v32, %v2506_v6 }
 0xd82   : > { %v2517_v3 = vsel %vm1083_vm14, %v2507_v7, -inf }
 0xd83   : > { %2518 = vmax.xlane.f32.xlu0 %v2517_v3 }
 0xd87   : > { %v2508_v10 = vpop.f32.mrf.mxu3 }
 0xd88   : > { %v2509_v16 = vadd.f32 %v5264_v35, %v2508_v10 }
 0xd8a   : > { %v2667_v8 = vpop.f32.mrf.mxu1  ;;  %v2520_v15 = vsel %vm1083_vm14, %v2509_v16, -inf }
 0xd8b   : > { %v2668_v21 = vadd.f32 %v5224_v22, %v2667_v8  ;;  %2521 = vmax.xlane.f32.xlu2 %v2520_v15 }
 0xd8d   : > { %v2696_v23 = vsel %vm1083_vm14, %v2668_v21, -inf }
 0xd8e   : > { %2697 = vmax.xlane.f32.xlu1 %v2696_v23 }
 0xd92   : > { %v2669_v51 = vpop.f32.mrf.mxu1 }
 0xd93   : > { %v2670_v40 = vadd.f32 %v5230_v24, %v2669_v51 }
 0xd95   : > { %v2699_v61 = vsel %vm1083_vm14, %v2670_v40, -inf }
 0xd96   : > { %2700 = vmax.xlane.f32.xlu0 %v2699_v61 }
 0xdc3   : > { %v2579_v31 = vpop.f32.mrf.mxu2 }
 0xdcb   : > { %v2581_v22 = vpop.f32.mrf.mxu2 }
 0xdcc   : > { %v2609_v33 = vpack.c.bf16 %v2581_v22, %v2579_v31 }
 0xdce   : > { %3781 = vmatmul.msk.bf16.vlgmr.msra.gmra.mxu0 %vm1032_vm13, %v2609_v33 }
 0xdd3   : > { %v2691_v46 = vpop.f32.mrf.mxu2 }
 0xdd4   : > { %v2692_v26 = vadd.f32 %v5251_v32, %v2691_v46  ;;  %v3791_v46 = vld [vmem:[%s4813_s18 + $0x1f8] sm:$0xf0] }
 0xdd6   : > { %v2702_v9 = vsel %vm1083_vm14, %v2692_v26, -inf }
 0xddb   : > { %v2693_v57 = vpop.f32.mrf.mxu2 }
 0xddc   : > { %v2694_v59 = vadd.f32 %v5264_v35, %v2693_v57 }
 0xdde   : > { %v2705_v32 = vsel %vm1083_vm14, %v2694_v59, -inf }
 0xdf6   : > { %v2519_v11 = vpop.xlane.xlu0 %2518 }
 0xdf7   : > { %v2525_v17 = vsub.f32 %v2507_v7, %v2519_v11 }
 0xdf9   : > { %v2531_v37 = vmul.f32 1.442695, %v2525_v17 }
 0xdfb   : > { %4286 = vpow2.f32 %v2531_v37 }
 0xdfe   : > { %v2522_v24 = vpop.xlane.xlu2 %2521 }
 0xdff   : > { %v2526_v38 = vsub.f32 %v2509_v16, %v2522_v24 }
 0xe01   : > { %v4287_v39 = vpop.eup %4286  ;;  %v2533_v52 = vmul.f32 1.442695, %v2526_v38  ;;  %v2698_v41 = vpop.xlane.xlu1 %2697 }
 0xe02   : > { %v2708_v43 = vsub.f32 %v2668_v21, %v2698_v41  ;;  %v2541_v29 = vsel %vm1083_vm14, %v4287_v39, 0.0 }
 0xe03   : > { %4288 = vpow2.f32 %v2533_v52  ;;  %2542 = vadd.xlane.f32.xlu2 %v2541_v29  ;;  %v3993_v29 = vld [vmem:[%s4813_s18 + $0x1dc] sm:$0xf] }
 0xe04   : > { %v2712_v44 = vmul.f32 1.442695, %v2708_v43 }
 0xe06   : > { %4290 = vpow2.f32 %v2712_v44 }
 0xe09   : > { %v4289_v48 = vpop.eup %4288  ;;  %v2701_v53 = vpop.xlane.xlu0 %2700 }
 0xe0a   : > { %v2544_v50 = vsel %vm1083_vm14, %v4289_v48, 0.0  ;;  %v2709_v56 = vsub.f32 %v2670_v40, %v2701_v53 }
 0xe0b   : > { %2703 = vmax.xlane.f32.xlu2 %v2702_v9  ;;  %2545 = vadd.xlane.f32.xlu0 %v2544_v50 }
 0xe0c   : > { %v4291_v55 = vpop.eup %4290  ;;  %v2714_v12 = vmul.f32 1.442695, %v2709_v56  ;;  %v3787_v56 = vld [vmem:[%s4813_s18 + $0x1b8] sm:$0xf0] }
 0xe0d   : > { %v2720_v54 = vsel %vm1083_vm14, %v4291_v55, 0.0 }
 0xe0e   : > { %4292 = vpow2.f32 %v2714_v12 }
 0xe13   : > { %2721 = vadd.xlane.f32.xlu0 %v2720_v54 }
 0xe14   : > { %v4293_v60 = vpop.eup %4292 }
 0xe15   : > { %v2723_v36 = vsel %vm1083_vm14, %v4293_v60, 0.0 }
 0xe1b   : > { %2706 = vmax.xlane.f32.xlu0 %v2705_v32 }
 0xe23   : > { %2589 = vrot.lane.b32.xlu2 %v5273_v47, %s4611_s10  ;;  %2724 = vadd.xlane.f32.xlu0 %v2723_v36 }
 0xe37   : > { %2749 = vrot.lane.b32.xlu0 %v5236_v42, %s4612_s0 }
 0xe76   : > { %v2543_v63 = vpop.xlane.xlu2 %2542 }
 0xe77   : > { %4294 = vrcp.f32 %v2543_v63 }
 0xe7d   : > { %v4295_v20 = vpop.eup %4294 }
 0xe7e   : > { %v2546_v0 = vpop.xlane.xlu0 %2545  ;;  %v2704_v2 = vpop.xlane.xlu2 %2703  ;;  %v2553_v6 = vmul.f32 %v4295_v20, %v4287_v39 }
 0xe7f   : > { %4296 = vrcp.f32 %v2546_v0  ;;  %v2710_v35 = vsub.f32 %v2692_v26, %v2704_v2  ;;  %v3794_v26 = vor.u32 %v3993_v29, %v3791_v46  ;;  %v2420_v20 = vpop.f32.mrf.mxu0  ;;  %v3857_v46 = vld [vmem:[%s4819_s22 + $0x78] sm:$0xf0] }
 0xe80   : > { %v2557_v3 = vpack.c.bf16 %v2553_v6, %v2553_v6 }
 0xe81   : > { %v2716_v45 = vmul.f32 1.442695, %v2710_v35  ;;  %2816 = vmatpush.bf16.msra.mxu2 %v3794_v26  ;;  %v3847_v26 = vld [vmem:[%s4819_s22 + $0x60] sm:$0xf] }
 0xe82   : > { %v2586_v23 = vunpack.c.l.b16 %v2557_v3 }
 0xe83   : > { %4298 = vpow2.f32 %v2716_v45 }
 0xe85   : > { %v4297_v7 = vpop.eup %4296 }
 0xe86   : > { %v2554_v10 = vmul.f32 %v4297_v7, %v4289_v48  ;;  %v2722_v16 = vpop.xlane.xlu0 %2721  ;;  %v2590_v8 = vpop.permute.xlu2 %2589 }
 0xe87   : > { %2602 = vmatpush.bf16.msra.mxu3 %v2590_v8  ;;  %v2422_v45 = vpop.f32.mrf.mxu0  ;;  %v2454_v8 = vadd.f32 %v5329_v1, %v2420_v20  ;;  %v3833_v20 = vld [vmem:[%s4819_s22 + $0x48] sm:$0xf0] }
 0xe88   : > { %v2558_v15 = vpack.c.bf16 %v2554_v10, %v2554_v10 }
 0xe89   : > { %v4299_v21 = vpop.eup %4298 }
 0xe8a   : > { %v2587_v42 = vunpack.c.l.b16 %v2558_v15  ;;  %v2726_v51 = vsel %vm1083_vm14, %v4299_v21, 0.0 }
 0xe8b   : > { %2727 = vadd.xlane.f32.xlu1 %v2726_v51 }
 0xe8c   : > { %v2588_v40 = vpack.c.b16 %v2587_v42, %v2586_v23 }
 0xe8e   : > { %v2707_v61 = vpop.xlane.xlu0 %2706  ;;  %3772 = vmatmul.msk.bf16.vlgmr.msra.gmra.mxu3 %vm1083_vm14, %v2588_v40  ;;  %v2456_v40 = vadd.f32 %v5331_v4, %v2422_v45 }
 0xe8f   : > { %v2711_v19 = vsub.f32 %v2694_v59, %v2707_v61  ;;  %v2425_v3 = vpop.f32.mrf.mxu0 }
 0xe91   : > { %v2718_v18 = vmul.f32 1.442695, %v2711_v19 }
 0xe93   : > { %4300 = vpow2.f32 %v2718_v18 }
 0xe96   : > { %v2725_v25 = vpop.xlane.xlu0 %2724 }
 0xe97   : > { %4302 = vrcp.f32 %v2725_v25  ;;  %v2427_v10 = vpop.f32.mrf.mxu0 }
 0xe98   : > { %4304 = vrcp.f32 %v2722_v16 }
 0xe99   : > { %v4301_v27 = vpop.eup %4300 }
 0xe9a   : > { %v2729_v28 = vsel %vm1083_vm14, %v4301_v27, 0.0 }
 0xe9b   : > { %2730 = vadd.xlane.f32.xlu2 %v2729_v28 }
 0xe9d   : > { %v4303_v34 = vpop.eup %4302 }
 0xe9e   : > { %v4305_v31 = vpop.eup %4304  ;;  %v2737_v22 = vmul.f32 %v4303_v34, %v4293_v60 }
 0xe9f   : > { %v2736_v33 = vmul.f32 %v4305_v31, %v4291_v55  ;;  %v3985_v55 = vld [vmem:[%s4813_s18 + $0x19c] sm:$0xf]  ;;  %v2634_v16 = vpop.f32.mrf.mxu0 }
 0xea0   : > { %v2741_v11 = vpack.c.bf16 %v2737_v22, %v2737_v22  ;;  %v3790_v54 = vor.u32 %v3985_v55, %v3787_v56  ;;  %v2644_v15 = vadd.f32 %v2634_v16, %v2454_v8  ;;  %v2461_v22 = vadd.f32 %v5337_v13, %v2427_v10  ;;  %v3839_v55 = vld [vmem:[%s4819_s22 + $0x50] sm:$0xf]  ;;  %v4009_v56 = vld [vmem:[%s4819_s22 + $0x54] sm:$0xf0]  ;;  %v4004_v10 = vld [vmem:[%s4819_s22 + $0x34] sm:$0xf] }
 0xea1   : > { %v2740_v17 = vpack.c.bf16 %v2736_v33, %v2736_v33  ;;  %v3825_v8 = vld [vmem:[%s4819_s22 + $0x38] sm:$0xf0] }
 0xea2   : > { %v2747_v37 = vunpack.c.l.b16 %v2741_v11  ;;  %2817 = vmatpush.bf16.msra.mxu2 %v3790_v54  ;;  %v4008_v54 = vld [vmem:[%s4819_s22 + $0x54] sm:$0xf] }
 0xea3   : > { %v2746_v24 = vunpack.c.l.b16 %v2740_v17 }
 0xea4   : > { %2774 = vrot.lane.b32.xlu1 %v5273_v47, %s4612_s0 }
 0xea5   : > { %v2748_v39 = vpack.c.b16 %v2747_v37, %v2746_v24 }
 0xea7   : > { %v2636_v51 = vpop.f32.mrf.mxu0 }
 0xea8   : > { %v2645_v61 = vadd.f32 %v2636_v51, %v2456_v40  ;;  %v3815_v51 = vld [vmem:[%s4819_s22 + $0x20] sm:$0xf]  ;;  %v4003_v40 = vld [vmem:[%s4819_s22 + $0x24] sm:$0xf0] }
 0xea9   : > { %v2750_v38 = vpop.permute.xlu0 %2749 }
 0xeaa   : > { %2762 = vmatpush.bf16.msrb.mxu3 %v2750_v38 }
 0xead   : > { %3785 = vmatmul.msk.bf16.vlgmr.msrb.gmra.mxu3 %vm1083_vm14, %v2748_v39 }
 0xefe   : > { %v2728_v52 = vpop.xlane.xlu1 %2727 }
 0xeff   : > { %4306 = vrcp.f32 %v2728_v52  ;;  %v3855_v52 = vld [vmem:[%s4819_s22 + $0x70] sm:$0xf] }
 0xf05   : > { %v4307_v43 = vpop.eup %4306 }
 0xf06   : > { %v2738_v47 = vmul.f32 %v4307_v43, %v4299_v21  ;;  %v4012_v43 = vld [vmem:[%s4819_s22 + $0x74] sm:$0xf] }
 0xf08   : > { %v2742_v9 = vpack.c.bf16 %v2738_v47, %v2738_v47  ;;  %v4011_v47 = vld [vmem:[%s4819_s22 + $0x64] sm:$0xf0] }
 0xf0a   : > { %v2771_v59 = vunpack.c.l.b16 %v2742_v9  ;;  %v3848_v9 = vor.u32 %v4011_v47, %v3847_v26 }
 0xf0e   : > { %v2731_v41 = vpop.xlane.xlu2 %2730 }
 0xf0f   : > { %4308 = vrcp.f32 %v2731_v41  ;;  %v4013_v41 = vld [vmem:[%s4819_s22 + $0x74] sm:$0xf0] }
 0xf10   : > { %v3856_v29 = vor.u32 %v4013_v41, %v3855_v52 }
 0xf11   : > { %v2604_v44 = vpop.f32.mrf.mxu3 }
 0xf12   : > { %3031 = vmatpush.bf16.msrb.mxu0 %v3856_v29 }
 0xf15   : > { %v4309_v48 = vpop.eup %4308 }
 0xf16   : > { %v2739_v50 = vmul.f32 %v4309_v48, %v4301_v27  ;;  %v2775_v53 = vpop.permute.xlu1 %2774  ;;  %v2459_v27 = vadd.f32 %v5333_v30, %v2425_v3  ;;  %v4010_v48 = vld [vmem:[%s4819_s22 + $0x64] sm:$0xf]  ;;  %3032 = vmatpush.bf16.msrb.mxu0 %v3848_v9  ;;  %v4005_v3 = vld [vmem:[%s4819_s22 + $0x34] sm:$0xf0] }
 0xf17   : > { %2787 = vmatpush.bf16.msrb.mxu1 %v2775_v53 }
 0xf18   : > { %v2743_v57 = vpack.c.bf16 %v2739_v50, %v2739_v50  ;;  %v3849_v50 = vld [vmem:[%s4819_s22 + $0x68] sm:$0xf0] }
 0xf19   : > { %v2606_v12 = vpop.f32.mrf.mxu3  ;;  %v3852_v53 = vor.u32 %v4010_v48, %v3849_v50 }
 0xf1a   : > { %v2772_v32 = vunpack.c.l.b16 %v2743_v57  ;;  %v2610_v60 = vpack.c.bf16 %v2606_v12, %v2604_v44  ;;  %v3860_v44 = vor.u32 %v4012_v43, %v3857_v46  ;;  %v3840_v57 = vor.u32 %v4009_v56, %v3839_v55  ;;  %v3841_v12 = vld [vmem:[%s4819_s22 + $0x58] sm:$0xf0] }
 0xf1c   : > { %v2773_v36 = vpack.c.b16 %v2772_v32, %v2771_v59  ;;  %3782 = vmatmul.msk.bf16.gmra.mxu0 %vm1032_vm13, %v2610_v60  ;;  %3050 = vmatpush.bf16.msra.mxu3 %v3860_v44  ;;  %v3844_v59 = vor.u32 %v4008_v54, %v3841_v12 }
 0xf1d   : > { %3033 = vmatpush.bf16.msrb.mxu0 %v3840_v57 }
 0xf1e   : > { %3786 = vmatmul.msk.bf16.vlgmr.msrb.gmra.mxu1 %vm1083_vm14, %v2773_v36  ;;  %v3831_v36 = vld [vmem:[%s4819_s22 + $0x40] sm:$0xf] }
 0xf20   : > { %3051 = vmatpush.bf16.msra.mxu3 %v3852_v53 }
 0xf24   : > { %3052 = vmatpush.bf16.msra.mxu3 %v3844_v59  ;;  %v4323_v59 = vld [vmem:[%s4836_s12] sm:$0x3f]  ;;  %s3266_s12 = sshll.u32 %s5568_s29, 4  ;;  %s3267_s12 = int_to_ptr.hbm [resolvable:$true] %s3266_s12 }
 0xf30   : > { %v2764_v63 = vpop.f32.mrf.mxu3 }
 0xf38   : > { %v2766_v0 = vpop.f32.mrf.mxu3 }
 0xf39   : > { %v2794_v2 = vpack.c.bf16 %v2766_v0, %v2764_v63  ;;  %v4007_v63 = vld [vmem:[%s4819_s22 + $0x44] sm:$0xf0]  ;;  %v4006_v0 = vld [vmem:[%s4819_s22 + $0x44] sm:$0xf] }
 0xf3a   : > { %v3836_v45 = vor.u32 %v4006_v0, %v3833_v20  ;;  %v5459_v0 = vperm.slane %v4323_v59, 5 }
 0xf3b   : > { %3795 = vmatmul.msk.bf16.vlgmr.msra.gmra.mxu2 %vm1032_vm13, %v2794_v2  ;;  %v3832_v2 = vor.u32 %v4007_v63, %v3831_v36 }
 0xf3c   : > { %3053 = vmatpush.bf16.msra.mxu3 %v3836_v45 }
 0xf3d   : > { %3034 = vmatpush.bf16.msrb.mxu0 %v3832_v2 }
 0xf99   : > { %v2639_v1 = vpop.f32.mrf.mxu0 }
 0xf9a   : > { %v2646_v28 = vadd.f32 %v2639_v1, %v2459_v27 }
 0xf9b   : > { %v2789_v35 = vpop.f32.mrf.mxu1 }
 0xfa1   : > { %v2641_v4 = vpop.f32.mrf.mxu0 }
 0xfa2   : > { %v2647_v33 = vadd.f32 %v2641_v4, %v2461_v22  ;;  %v4000_v4 = vld [vmem:[%s4819_s22 + $0x14] sm:$0xf] }
 0xfa3   : > { %v2791_v6 = vpop.f32.mrf.mxu1 }
 0xfa4   : > { %v2795_v7 = vpack.c.bf16 %v2791_v6, %v2789_v35 }
 0xfa6   : > { %3796 = vmatmul.msk.bf16.gmra.mxu2 %vm1032_vm13, %v2795_v7  ;;  %v3823_v7 = vld [vmem:[%s4819_s22 + $0x30] sm:$0xf] }
 0xfa7   : > { %v3824_v16 = vor.u32 %v4005_v3, %v3823_v7 }
 0xfa9   : > { %3035 = vmatpush.bf16.msrb.mxu0 %v3824_v16 }
 0xfbe   : > { %v2819_v21 = vpop.f32.mrf.mxu2 }
 0xfbf   : > { %v2829_v23 = vadd.f32 %v2819_v21, %v2644_v15  ;;  %v3828_v15 = vor.u32 %v4004_v10, %v3825_v8  ;;  %v4021_v8 = vld [vmem:[%s4821_s11 + $0x38] sm:$0xff] }
 0xfc0   : > { %3205 = vmatpush.bf16.msra.mxu1 %v4021_v8 }
 0xfc1   : > { %v5379_v42 = vadd.f32 %v2829_v23, %v5094_v49  ;;  %3054 = vmatpush.bf16.msra.mxu3 %v3828_v15  ;;  %v4029_v15 = vld [vmem:[%s4821_s11 + $0x78] sm:$0xff] }
 0xfc2   : > { %3224 = vmatpush.bf16.msrb.mxu2 %v4029_v15 }
 0xfc3   : > { %2837 = vadd.xlane.f32.xlu0 %v5379_v42 }
 0xfc6   : > { %v2821_v19 = vpop.f32.mrf.mxu2 }
 0xfc7   : > { %v2830_v18 = vadd.f32 %v2821_v19, %v2645_v61  ;;  %v4002_v61 = vld [vmem:[%s4819_s22 + $0x24] sm:$0xf]  ;;  %v3816_v19 = vor.u32 %v4003_v40, %v3815_v51  ;;  %v4028_v51 = vld [vmem:[%s4821_s11 + $0x70] sm:$0xff] }
 0xfc8   : > { %3225 = vmatpush.bf16.msrb.mxu2 %v4028_v51 }
 0xfc9   : > { %v5384_v25 = vadd.f32 %v2830_v18, %v5098_v58  ;;  %v3817_v18 = vld [vmem:[%s4819_s22 + $0x28] sm:$0xf0]  ;;  %3036 = vmatpush.bf16.msrb.mxu0 %v3816_v19 }
 0xfca   : > { %v3820_v27 = vor.u32 %v4002_v61, %v3817_v18  ;;  %v4019_v18 = vld [vmem:[%s4821_s11 + $0x28] sm:$0xff] }
 0xfcb   : > { %2839 = vadd.xlane.f32.xlu1 %v5384_v25 }
 0xfcc   : > { %3055 = vmatpush.bf16.msra.mxu3 %v3820_v27  ;;  %v4027_v27 = vld [vmem:[%s4821_s11 + $0x68] sm:$0xff] }
 0xfcd   : > { %3226 = vmatpush.bf16.msrb.mxu2 %v4027_v27 }
0x1029   : > { %v2824_v34 = vpop.f32.mrf.mxu2 }
0x102a   : > { %v2831_v49 = vadd.f32 %v2824_v34, %v2646_v28  ;;  %v3807_v34 = vld [vmem:[%s4819_s22 + $0x10] sm:$0xf] }
0x102c   : > { %v5389_v31 = vadd.f32 %v2831_v49, %v5102_v62  ;;  %v4001_v49 = vld [vmem:[%s4819_s22 + $0x14] sm:$0xf0] }
0x102d   : > { %v3808_v22 = vor.u32 %v4001_v49, %v3807_v34  ;;  %v4018_v49 = vld [vmem:[%s4821_s11 + $0x20] sm:$0xff] }
0x102e   : > { %2841 = vadd.xlane.f32.xlu2 %v5389_v31 }
0x102f   : > { %3037 = vmatpush.bf16.msrb.mxu0 %v3808_v22 }
0x1031   : > { %v2826_v58 = vpop.f32.mrf.mxu2 }
0x1032   : > { %v2832_v11 = vadd.f32 %v2826_v58, %v2647_v33  ;;  %v3809_v33 = vld [vmem:[%s4819_s22 + $0x18] sm:$0xf0] }
0x1033   : > { %v3812_v58 = vor.u32 %v4000_v4, %v3809_v33 }
0x1034   : > { %v5394_v17 = vadd.f32 %v2832_v11, %v5110_v5 }
0x1035   : > { %3056 = vmatpush.bf16.msra.mxu3 %v3812_v58  ;;  %v4017_v58 = vld [vmem:[%s4821_s11 + $0x18] sm:$0xff] }
0x1036   : > { %v2838_v30 = vpop.xlane.xlu0 %2837  ;;  %2843 = vadd.xlane.f32.xlu2 %v5394_v17 }
0x1037   : > { %v2845_v62 = vmul.f32 %v2838_v30, %v4848_v14 }
0x1039   : > { %v5399_v37 = vsub.f32 %v5379_v42, %v2845_v62  ;;  %v3799_v62 = vld [vmem:[%s4819_s22] sm:$0xf] }
0x103b   : > { %v2853_v13 = vmul.f32 %v5399_v37, %v5399_v37 }
0x103e   : > { %v2840_v24 = vpop.xlane.xlu1 %2839  ;;  %2857 = vadd.xlane.f32.xlu2 %v2853_v13  ;;  %v3999_v13 = vld [vmem:[%s4819_s22 + $0x4] sm:$0xf0] }
0x103f   : > { %v2846_v5 = vmul.f32 %v2840_v24, %v4848_v14  ;;  %v3998_v24 = vld [vmem:[%s4819_s22 + $0x4] sm:$0xf] }
0x1041   : > { %v5405_v38 = vsub.f32 %v5384_v25, %v2846_v5  ;;  %v3800_v5 = vor.u32 %v3999_v13, %v3799_v62  ;;  %v4026_v13 = vld [vmem:[%s4821_s11 + $0x60] sm:$0xff] }
0x1042   : > { %3227 = vmatpush.bf16.msrb.mxu2 %v4026_v13 }
0x1043   : > { %v2854_v39 = vmul.f32 %v5405_v38, %v5405_v38  ;;  %3038 = vmatpush.bf16.msrb.mxu0 %v3800_v5  ;;  %v4016_v5 = vld [vmem:[%s4821_s11 + $0x10] sm:$0xff] }
0x1045   : > { %2859 = vadd.xlane.f32.xlu0 %v2854_v39  ;;  %v3801_v39 = vld [vmem:[%s4819_s22 + $0x8] sm:$0xf0] }
0x1046   : > { %v3804_v41 = vor.u32 %v3998_v24, %v3801_v39  ;;  %v4025_v39 = vld [vmem:[%s4821_s11 + $0x58] sm:$0xff] }
0x1047   : > { %3228 = vmatpush.bf16.msrb.mxu2 %v4025_v39 }
0x1048   : > { %3057 = vmatpush.bf16.msra.mxu3 %v3804_v41 }
0x10a1   : > { %v2842_v32 = vpop.xlane.xlu2 %2841 }
0x10a2   : > { %v2847_v60 = vmul.f32 %v2842_v32, %v4848_v14  ;;  %v5456_v32 = vperm.slane %v4323_v59, 4 }
0x10a4   : > { %v5427_v35 = vsub.f32 %v5389_v31, %v2847_v60 }
0x10a6   : > { %v2855_v6 = vmul.f32 %v5427_v35, %v5427_v35 }
0x10a8   : > { %2861 = vadd.xlane.f32.xlu2 %v2855_v6 }
0x10a9   : > { %v2844_v21 = vpop.xlane.xlu2 %2843 }
0x10aa   : > { %v2848_v23 = vmul.f32 %v2844_v21, %v4848_v14  ;;  %v4020_v21 = vld [vmem:[%s4821_s11 + $0x30] sm:$0xff] }
0x10ab   : > { %3206 = vmatpush.bf16.msra.mxu1 %v4020_v21 }
0x10ac   : > { %v5441_v1 = vsub.f32 %v5394_v17, %v2848_v23 }
0x10ae   : > { %v2856_v28 = vmul.f32 %v5441_v1, %v5441_v1 }
0x10af   : > { %3207 = vmatpush.bf16.msra.mxu1 %v4019_v18 }
0x10b0   : > { %2863 = vadd.xlane.f32.xlu0 %v2856_v28 }
0x10b1   : > { %v2858_v11 = vpop.xlane.xlu2 %2857 }
0x10b2   : > { %v2865_v30 = vmul.f32 %v2858_v11, %v4848_v14 }
0x10b3   : > { %3208 = vmatpush.bf16.msra.mxu1 %v4018_v49 }
0x10b4   : > { %v2869_v52 = vadd.f32 1e-05, %v2865_v30 }
0x10b6   : > { %4310 = vrsqrt.f32 %v2869_v52  ;;  %vm2879_vm12 = vweird.f32 %v2869_v52 }
0x10b7   : > { %3209 = vmatpush.bf16.msra.mxu1 %v4017_v58 }
0x10b8   : > { %v2860_v43 = vpop.xlane.xlu0 %2859 }
0x10b9   : > { %v2866_v29 = vmul.f32 %v2860_v43, %v4848_v14 }
0x10bb   : > { %v2870_v46 = vadd.f32 1e-05, %v2866_v29  ;;  %3210 = vmatpush.bf16.msra.mxu1 %v4016_v5  ;;  %v4015_v29 = vld [vmem:[%s4821_s11 + $0x8] sm:$0xff] }
0x10bc   : > { %v4311_v44 = vpop.eup %4310 }
0x10bd   : > { %v2874_v26 = vmul.f32 %v4311_v44, %v2869_v52  ;;  %4312 = vrsqrt.f32 %v2870_v46  ;;  %vm2880_vm11 = vweird.f32 %v4311_v44  ;;  %vm2889_vm15 = vweird.f32 %v2870_v46 }
0x10be   : > { %vm2881_vm13 = vmor %vm2879_vm12, %vm2880_vm11 }
0x10bf   : > { %v2875_v47 = vmul.f32 %v4311_v44, %v2874_v26  ;;  %3211 = vmatpush.bf16.msra.mxu1 %v4015_v29  ;;  %v4024_v26 = vld [vmem:[%s4821_s11 + $0x50] sm:$0xff] }
0x10c0   : > { %3229 = vmatpush.bf16.msrb.mxu2 %v4024_v26 }
0x10c1   : > { %v2876_v48 = vmul.f32 0.5, %v2875_v47 }
0x10c3   : > { %v4313_v9 = vpop.eup %4312  ;;  %v2877_v50 = vsub.f32 1.5, %v2876_v48 }
0x10c4   : > { %v2884_v53 = vmul.f32 %v4313_v9, %v2870_v46  ;;  %vm2890_vm14 = vweird.f32 %v4313_v9 }
0x10c5   : > { %v2878_v55 = vmul.f32 %v4311_v44, %v2877_v50  ;;  %vm2891_vm0 = vmor %vm2889_vm15, %vm2890_vm14  ;;  %v4023_v50 = vld [vmem:[%s4821_s11 + $0x48] sm:$0xff] }
0x10c6   : > { %v2885_v56 = vmul.f32 %v4313_v9, %v2884_v53  ;;  %3230 = vmatpush.bf16.msrb.mxu2 %v4023_v50 }
0x10c7   : > { %v2882_v54 = vsel %vm2881_vm13, %v4311_v44, %v2878_v55 }
0x10c8   : > { %v2886_v57 = vmul.f32 0.5, %v2885_v56  ;;  %v2913_v60 = vmul.f32 %v2882_v54, %v5399_v37  ;;  %v2945_v56 = vld [vmem:[%s4841_s20] sm:$0x3] }
0x10c9   : > { %v2947_v54 = vperm.slane %v2945_v56, 0 }
0x10ca   : > { %v2887_v12 = vsub.f32 1.5, %v2886_v57  ;;  %v2918_v2 = vmul.f32 %v5456_v32, %v2913_v60  ;;  %v2948_v60 = vperm.slane %v2945_v56, 1 }
0x10cc   : > { %v2888_v36 = vmul.f32 %v4313_v9, %v2887_v12  ;;  %v2923_v6 = vadd.f32 %v5459_v0, %v2918_v2 }
0x10ce   : > { %v2892_v63 = vsel %vm2891_vm0, %v4313_v9, %v2888_v36 }
0x10cf   : > { %v2914_v20 = vmul.f32 %v2892_v63, %v5405_v38 }
0x10d1   : > { %v2919_v45 = vmul.f32 %v5456_v32, %v2914_v20 }
0x10d3   : > { %v2924_v37 = vadd.f32 %v5459_v0, %v2919_v45 }
0x10d5   : > { %v2927_v7 = vpack.c.bf16 %v2924_v37, %v2923_v6 }
0x10d7   : > { %3039 = vmatmul.bf16.vlgmr.msrb.gmra.mxu0 %v2927_v7  ;;  %3058 = vmatmul.bf16.vlgmr.msra.gmra.mxu3 %v2927_v7 }
0x111b   : > { %v2862_v3 = vpop.xlane.xlu2 %2861 }
0x111c   : > { %v2867_v10 = vmul.f32 %v2862_v3, %v4848_v14 }
0x111e   : > { %v2871_v16 = vadd.f32 1e-05, %v2867_v10 }
0x1120   : > { %4314 = vrsqrt.f32 %v2871_v16  ;;  %vm2899_vm2 = vweird.f32 %v2871_v16 }
0x1123   : > { %v2864_v38 = vpop.xlane.xlu0 %2863 }
0x1124   : > { %v2868_v23 = vmul.f32 %v2864_v38, %v4848_v14 }
0x1126   : > { %v4315_v40 = vpop.eup %4314  ;;  %v2872_v61 = vadd.f32 1e-05, %v2868_v23  ;;  %v4163_v23 = vld [vmem:[%s618_s15] ss:$0 sm:$0xff] }
0x1127   : > { %v2894_v19 = vmul.f32 %v4315_v40, %v2871_v16  ;;  %vm2900_vm1 = vweird.f32 %v4315_v40 }
0x1128   : > { %4316 = vrsqrt.f32 %v2872_v61  ;;  %vm2901_vm3 = vmor %vm2899_vm2, %vm2900_vm1  ;;  %vm2909_vm5 = vweird.f32 %v2872_v61 }
0x1129   : > { %v2895_v28 = vmul.f32 %v4315_v40, %v2894_v19 }
0x112b   : > { %v2896_v34 = vmul.f32 0.5, %v2895_v28 }
0x112d   : > { %v2897_v4 = vsub.f32 1.5, %v2896_v34 }
0x112e   : > { %v4317_v22 = vpop.eup %4316 }
0x112f   : > { %v2898_v14 = vmul.f32 %v4315_v40, %v2897_v4  ;;  %v2904_v33 = vmul.f32 %v4317_v22, %v2872_v61  ;;  %vm2910_vm4 = vweird.f32 %v4317_v22 }
0x1130   : > { %vm2911_vm6 = vmor %vm2909_vm5, %vm2910_vm4 }
0x1131   : > { %v2905_v11 = vmul.f32 %v4317_v22, %v2904_v33  ;;  %v2902_v30 = vsel %vm2901_vm3, %v4315_v40, %v2898_v14 }
0x1132   : > { %v2915_v52 = vmul.f32 %v2902_v30, %v5427_v35  ;;  %v4014_v35 = vld [vmem:[%s4821_s11] sm:$0xff] }
0x1133   : > { %v2906_v62 = vmul.f32 0.5, %v2905_v11  ;;  %3212 = vmatpush.bf16.msra.mxu1 %v4014_v35 }
0x1134   : > { %v2920_v44 = vmul.f32 %v5456_v32, %v2915_v52 }
0x1135   : > { %v2907_v24 = vsub.f32 1.5, %v2906_v62 }
0x1136   : > { %v2925_v48 = vadd.f32 %v5459_v0, %v2920_v44 }
0x1137   : > { %v2908_v41 = vmul.f32 %v4317_v22, %v2907_v24 }
0x1139   : > { %v2912_v43 = vsel %vm2911_vm6, %v4317_v22, %v2908_v41 }
0x113a   : > { %v2916_v46 = vmul.f32 %v2912_v43, %v5441_v1  ;;  %v4022_v1 = vld [vmem:[%s4821_s11 + $0x40] sm:$0xff] }
0x113b   : > { %3231 = vmatpush.bf16.msrb.mxu2 %v4022_v1 }
0x113c   : > { %v2921_v47 = vmul.f32 %v5456_v32, %v2916_v46 }
0x113e   : > { %v2926_v9 = vadd.f32 %v5459_v0, %v2921_v47 }
0x1140   : > { %v2928_v53 = vpack.c.bf16 %v2926_v9, %v2925_v48 }
0x1142   : > { %3044 = vmatmul.bf16.gmra.mxu0 %v2928_v53  ;;  %3063 = vmatmul.bf16.gmra.mxu3 %v2928_v53 }
0x1154   : > { %v3040_v55 = vpop.f32.mrf.mxu0 }
0x1155   : > { %v3041_v59 = vadd.f32 %v3040_v55, %v2947_v54 }
0x115a   : > { %v3059_v57 = vpop.f32.mrf.mxu3 }
0x115b   : > { %v3060_v0 = vadd.f32 %v3059_v57, %v2948_v60 }
0x115c   : > { %v3042_v12 = vpop.f32.mrf.mxu0 }
0x115d   : > { %v3043_v32 = vadd.f32 %v3042_v12, %v2947_v54 }
0x115f   : > { %v3069_v36 = vpack.c.bf16 %v3043_v32, %v3041_v59 }
0x1161   : > { %3213 = vmatmul.bf16.vlgmr.msra.gmra.mxu1 %v3069_v36 }
0x1162   : > { %v3061_v63 = vpop.f32.mrf.mxu3 }
0x1163   : > { %v3062_v2 = vadd.f32 %v3061_v63, %v2948_v60 }
0x1165   : > { %v3070_v20 = vpack.c.bf16 %v3062_v2, %v3060_v0 }
0x1167   : > { %3232 = vmatmul.bf16.vlgmr.msrb.gmra.mxu2 %v3070_v20 }
0x11bf   : > { %v3045_v45 = vpop.f32.mrf.mxu0 }
0x11c0   : > { %v3046_v7 = vadd.f32 %v3045_v45, %v2947_v54 }
0x11c5   : > { %v3064_v6 = vpop.f32.mrf.mxu3 }
0x11c6   : > { %v3065_v8 = vadd.f32 %v3064_v6, %v2948_v60 }
0x11c7   : > { %v3047_v37 = vpop.f32.mrf.mxu0 }
0x11c8   : > { %v3048_v3 = vadd.f32 %v3047_v37, %v2947_v54 }
0x11ca   : > { %v3071_v10 = vpack.c.bf16 %v3048_v3, %v3046_v7 }
0x11cc   : > { %3218 = vmatmul.bf16.gmra.mxu1 %v3071_v10 }
0x11cd   : > { %v3066_v16 = vpop.f32.mrf.mxu3 }
0x11ce   : > { %v3067_v15 = vadd.f32 %v3066_v16, %v2948_v60 }
0x11d0   : > { %v3072_v38 = vpack.c.bf16 %v3067_v15, %v3065_v8 }
0x11d2   : > { %3237 = vmatmul.bf16.gmra.mxu2 %v3072_v38 }
0x11de   : > { %v3214_v21 = vpop.f32.mrf.mxu1 }
0x11df   : > { %v3215_v51 = vadd.f32 %v4163_v23, %v3214_v21 }
0x11e6   : > { %v3216_v18 = vpop.f32.mrf.mxu1 }
0x11e7   : > { %v3217_v28 = vadd.f32 %v4163_v23, %v3216_v18 }
0x11ea   : > { %v3233_v40 = vpop.f32.mrf.mxu2 }
0x11eb   : > { %v3234_v61 = vadd.f32 %v3233_v40, %v3215_v51 }
0x11ed   : > { %v3243_v19 = vmax.f32 %v3234_v61, 0.0 }
0x11ef   : > { %v3247_v27 = vadd.f32 %v3243_v19, %v5379_v42 }
0x11f1   : > { %3251 = vst [vmem:[#allocation13] sm:$0xff] %v3247_v27 }
0x11f2   : > { %v3235_v34 = vpop.f32.mrf.mxu2 }
0x11f3   : > { %v3236_v49 = vadd.f32 %v3235_v34, %v3217_v28 }
0x11f5   : > { %v3244_v4 = vmax.f32 %v3236_v49, 0.0 }
0x11f7   : > { %v3248_v22 = vadd.f32 %v3244_v4, %v5384_v25 }
0x11f9   : > { %3252 = vst [vmem:[#allocation13 + $0x8] sm:$0xff] %v3248_v22 }
0x1249   : > { %v3219_v14 = vpop.f32.mrf.mxu1 }
0x124a   : > { %v3220_v33 = vadd.f32 %v4163_v23, %v3219_v14 }
0x1251   : > { %v3221_v62 = vpop.f32.mrf.mxu1 }
0x1252   : > { %v3222_v24 = vadd.f32 %v4163_v23, %v3221_v62 }
0x1255   : > { %v3238_v58 = vpop.f32.mrf.mxu2 }
0x1256   : > { %v3239_v11 = vadd.f32 %v3238_v58, %v3220_v33 }
0x1258   : > { %v3245_v30 = vmax.f32 %v3239_v11, 0.0 }
0x125a   : > { %v3249_v13 = vadd.f32 %v3245_v30, %v5389_v31 }
0x125c   : > { %3253 = vst [vmem:[#allocation13 + $0x10] sm:$0xff] %v3249_v13 }
0x125d   : > { %v3240_v42 = vpop.f32.mrf.mxu2 }
0x125e   : > { %v3241_v5 = vadd.f32 %v3240_v42, %v3222_v24 }
0x1260   : > { %v3246_v25 = vmax.f32 %v3241_v5, 0.0 }
0x1262   : > { %v3250_v39 = vadd.f32 %v3246_v25, %v5394_v17 }
0x1264   : > { %3254 = vst [vmem:[#allocation13 + $0x18] sm:$0xff] %v3250_v39 }
0x1265   : > { %4067 = dma.vmem_to_hbm [thread:$0]  (%p4097_p3), %s3265_s30, 512, %s3267_s12, [#allocation4], %s4614_s1, %s4614_s1, %s4615_s23  }
0x1266   : > { %4573 = dma.done.wait (%p4097_p3), [#allocation4], 512  }
0x1267   : > { %4575 = vsyncadd (%p4097_p3), [#allocation4], 4294966784 }
0x1268 PF: > { %s5569_s25 = sld [smem:[#allocation20_spill]]  ;;  %s5573_s13 = smov %s4582_s14 }
0x1269   : > { %s5570_s20 = sld [smem:[#allocation19_spill]]  ;;  %s5575_s16 = smov %s4594_s17 }
0x126a   : > { %s5571_s15 = sld [smem:[#allocation22_spill]] }
0x126b   : > { %s5572_s21 = sld [smem:[#allocation21_spill]] }
0x126e   : > { %s29_s18 = sadd.s32 1, %s5569_s25  }
0x126f   : > { %p26_p4 = scmp.ge.s32.totalorder %s29_s18, 4   ;;  %s5574_s14 = smov %s5570_s20 }
0x1271   : > { %s5576_s17 = smov %s5572_s21  ;;  %28 = sbr.rel (!%p26_p4) target bundleno = 18 (0x12), region = 154 }
0x1276   :  { %3283 = vsyncpa [#allocation3], 1 }
0x1277   :  { %3285 = vsyncpa [#allocation3 + $0x1], 1 }
0x1278   :  { %3286 = vsyncpa [#allocation6], 1 }
0x1279   :  { %3287 = vsyncpa [#allocation9], 1 }
0x127a   :  { %3289 = vsyncpa [#allocation9 + $0x1], 1 }
0x127b   :  { %3290 = vsyncpa [#allocation12], 1 }
0x127c   :  { %3292 = vsyncpa [#allocation12 + $0x1], 1 }
0x127d   :  { %3293 = vsyncpa [#allocation4], 1 }
0x127e   :  { %3295 = vsyncpa [#allocation4 + $0x1], 1 }

</bundles_post_ra>
